<compile_context>
chip_gen: v7x
topology: tpu7x:2x2x1
jax: 0.10.0
libtpu: 0.0.40
codegen_flags: <defaults>
</compile_context>

<pallas_src>
import functools

import jax
import jax.numpy as jnp
from jax import lax
from jax.experimental import pallas as pl
from jax.experimental.pallas import tpu as pltpu


# ----------------------------- mask / bias helpers -----------------------------

def create_mask(window_size, displacement, upper_lower, left_right):
    """Same semantics as the PyTorch create_mask()."""
    n = window_size ** 2
    mask = jnp.zeros((n, n), jnp.float32)
    if upper_lower:
        mask = mask.at[-displacement * window_size:, :-displacement * window_size].set(-jnp.inf)
        mask = mask.at[:-displacement * window_size, -displacement * window_size:].set(-jnp.inf)
    if left_right:
        mask = mask.reshape(window_size, window_size, window_size, window_size)
        mask = mask.at[:, -displacement:, :, :-displacement].set(-jnp.inf)
        mask = mask.at[:, :-displacement, :, -displacement:].set(-jnp.inf)
        mask = mask.reshape(n, n)
    return mask


def relative_indices(window_size):
    coords = jnp.stack(
        jnp.meshgrid(jnp.arange(window_size), jnp.arange(window_size), indexing="ij"),
        axis=-1).reshape(-1, 2)
    return coords[None, :, :] - coords[:, None, :] + window_size - 1   # (N, N, 2)


def _tile_bias_tables(pos_bias, window_size, n_w, rows_per_tile, shifted):
    """Additive (L, L) bias tables for one tile of `rows_per_tile` window-rows.

    L = rows_per_tile * ws * n_w tokens in raster order.  Cross-window entries are
    -inf, so one LxL softmax + matmul per head computes every window of the tile at
    once (exactly equal to per-window softmax: exp(-inf - finite_max) == 0).
    Returns (regular_tile, last_tile): the tile containing the image's last window
    row additionally carries the upper/lower shift mask on that row's windows.
    """
    ws = window_size
    nw_w = n_w // ws
    L = rows_per_tile * ws * n_w
    t = jnp.arange(L)
    rr = t // n_w                              # image row within the tile
    col = t % n_w                              # image column
    wid = (rr // ws) * nw_w + (col // ws)      # window id within the tile
    loc = (rr % ws) * ws + (col % ws)          # token index inside its window (w_h*ws + w_w)

    same = wid[:, None] == wid[None, :]
    core = pos_bias[loc[:, None], loc[None, :]]            # (L, L)
    neg_inf = jnp.float32(-jnp.inf)

    if shifted:
        disp = ws // 2
        ul = create_mask(ws, disp, upper_lower=True, left_right=False)
        lr = create_mask(ws, disp, upper_lower=False, left_right=True)
        lr_e = lr[loc[:, None], loc[None, :]]
        ul_e = ul[loc[:, None], loc[None, :]]
        last_wcol = (col // ws == nw_w - 1)[:, None]              # last window column
        last_wrow = (rr // ws == rows_per_tile - 1)[:, None]      # last window row in tile
        base = core + jnp.where(last_wcol, lr_e, 0.0)             # lr mask: last window col
        regular = jnp.where(same, base, neg_inf)
        last = jnp.where(same, base + jnp.where(last_wrow, ul_e, 0.0), neg_inf)
        return regular, last

    table = jnp.where(same, core, neg_inf)
    return table, table


def _pick_rows_per_tile(nw_h, row_tokens):
    """Smallest divisor of nw_h that makes the per-step token count lane-dense (x128);
    falls back to the (8,128) tiling minimum."""
    for r in range(1, nw_h + 1):
        if nw_h % r == 0 and (r * row_tokens) % 128 == 0:
            return r
    for r in range(1, nw_h + 1):
        if nw_h % r == 0 and (r * row_tokens) % 8 == 0:
            return r
    return nw_h


# ----------------------------- fused Pallas kernel -----------------------------

def _window_attention_kernel(x_ref, wqkv_ref, wout_ref, bout_ref, bias_ref, o_ref,
                             *, heads, head_dim, scale):
    """One grid step = one batch element x one tile of window-rows (L tokens).

    x_ref:    (L, dim)  f32   tokens of that tile (raster order)
    wqkv_ref: (dim, 3*inner)  bf16  bias-free qkv projection weight
    wout_ref: (inner, dim)    bf16  output projection weight
    bout_ref: (1, dim)        f32   output projection bias
    bias_ref: (L, L)          f32   rel-pos bias + shift masks, -inf across windows
    o_ref:    (L, dim)
    """
    inner = heads * head_dim
    x = x_ref[...].astype(jnp.bfloat16)                                   # bf16 MXU feed

    # Fused QKV projection: one MXU matmul (bf16 in, f32 acc) for q, k, v of all heads.
    qkv = jnp.dot(x, wqkv_ref[...], preferred_element_type=jnp.float32)  # (L, 3*inner) f32
    bias = bias_ref[...]                                                  # (L, L) f32

    o_heads = []
    # TODO(synk): if heads grows beyond ~4, switch to lax.fori_loop over head groups
    # (bounds live ranges) and a head-batched dot_general to drop the 32-lane slicing.
    for h in range(heads):                                                # static unroll
        q = (qkv[:, h * head_dim:(h + 1) * head_dim] * scale).astype(jnp.bfloat16)
        k = qkv[:, inner + h * head_dim:inner + (h + 1) * head_dim].astype(jnp.bfloat16)
        v = qkv[:, 2 * inner + h * head_dim:2 * inner + (h + 1) * head_dim].astype(jnp.bfloat16)

        # scores for every window of the tile at once; cross-window entries get -inf
        s = lax.dot_general(q, k, (((1,), (1,)), ((), ())),
                            preferred_element_type=jnp.float32) + bias     # (L, L) f32
        m = jnp.max(s, axis=-1, keepdims=True)
        p = jnp.exp(s - m)
        denom = jnp.sum(p, axis=-1, keepdims=True)
        p = p * pl.reciprocal(denom, approx=True)                          # EUP slot
        o_heads.append(jnp.dot(p.astype(jnp.bfloat16), v,
                               preferred_element_type=jnp.float32))        # (L, head_dim)

    # Single K=inner output projection (instead of per-head K=head_dim matmuls).
    o_all = jnp.concatenate(o_heads, axis=-1).astype(jnp.bfloat16)         # (L, inner)
    y = jnp.dot(o_all, wout_ref[...], preferred_element_type=jnp.float32) + bout_ref[...]
    o_ref[...] = y.astype(o_ref.dtype)


def window_attention_forward(x, params, *, heads, head_dim, window_size, shifted,
                             relative_pos_embedding=True):
    """Forward pass of the PyTorch WindowAttention module.  x: (b, n_h, n_w, dim)."""
    b, n_h, n_w, dim = x.shape
    ws = window_size
    assert n_h % ws == 0 and n_w % ws == 0
    nw_h = n_h // ws
    inner = heads * head_dim
    scale = head_dim ** (-0.5)
    disp = ws // 2

    if shifted:
        # TODO(synk): fold the cyclic shift into the kernel (index_map row split +
        # pltpu.roll along lanes) to drop these two extra HBM passes over activations.
        x = jnp.roll(x, shift=(-disp, -disp), axis=(1, 2))   # CyclicShift(-disp)

    if relative_pos_embedding:
        rel = relative_indices(ws)
        pos_bias = params["pos_emb"][rel[..., 0], rel[..., 1]]     # (N, N)
    else:
        pos_bias = params["pos_emb"]                               # (N, N)

    # One grid step handles rows_per_tile window-rows so the score block is lane-dense.
    rows_per_tile = _pick_rows_per_tile(nw_h, ws * n_w)
    n_tiles = nw_h // rows_per_tile
    L = rows_per_tile * ws * n_w                 # tokens per (batch, row-tile) step

    regular, last = _tile_bias_tables(pos_bias, ws, n_w, rows_per_tile, shifted)
    if shifted and n_tiles > 1:
        bias_tab = jnp.stack([regular, last], axis=0)               # 2 entries only
        bias_index = lambda ib, it: (it // (n_tiles - 1), 0, 0)     # 0,...,0,1 -> resident
    else:
        # not shifted (all tiles identical) or a single tile (which is the last one)
        bias_tab = last[None]
        bias_index = lambda ib, it: (0, 0, 0)

    # Free reshape: tokens in raster order -> (b*n_h*n_w, dim); a row-tile is a
    # contiguous, lane-dense block of L rows, so no transposes are needed anywhere.
    x2 = x.reshape(b * n_h * n_w, dim)
    token_index = lambda ib, it: (ib * n_tiles + it, 0)

    kernel = functools.partial(_window_attention_kernel,
                               heads=heads, head_dim=head_dim, scale=scale)

    # TODO(synk): for very wide feature maps, additionally tile the window-column axis
    # (bounded L_tile) and build the block-diagonal bias in-kernel from the (N, N)
    # tables so the f32 (L, L) score block never approaches v7x's 64 MiB VMEM.
    out2 = pl.pallas_call(
        kernel,
        out_shape=jax.ShapeDtypeStruct((b * n_h * n_w, dim), x.dtype),
        grid=(b, n_tiles),
        in_specs=[
            pl.BlockSpec((L, dim), token_index),                     # row-tile of tokens
            pl.BlockSpec((dim, 3 * inner), lambda ib, it: (0, 0)),   # wqkv (resident, bf16)
            pl.BlockSpec((inner, dim), lambda ib, it: (0, 0)),       # wout (resident, bf16)
            pl.BlockSpec((1, dim), lambda ib, it: (0, 0)),           # bout (resident)
            pl.BlockSpec((None, L, L), bias_index),                  # one (L, L) bias slab
        ],
        out_specs=pl.BlockSpec((L, dim), token_index),
        compiler_params=pltpu.CompilerParams(
            dimension_semantics=("parallel", "parallel")),
        # Footprint is < 1 MiB/step at demo sizes; default scoped-VMEM limit is fine.
    )(x2,
      params["wqkv"].astype(jnp.bfloat16),
      params["wout"].astype(jnp.bfloat16),
      params["bout"].reshape(1, dim),
      bias_tab)

    out = out2.reshape(b, n_h, n_w, dim)
    if shifted:
        out = jnp.roll(out, shift=(disp, disp), axis=(1, 2))     # CyclicShift(+disp)
    return out


# ----------------------------- pure-JAX reference -----------------------------

def window_attention_ref(x, params, *, heads, head_dim, window_size, shifted,
                         relative_pos_embedding=True):
    b, n_h, n_w, dim = x.shape
    ws = window_size
    disp = ws // 2
    inner = heads * head_dim
    scale = head_dim ** (-0.5)
    nw_h, nw_w = n_h // ws, n_w // ws
    N = ws * ws

    if shifted:
        x = jnp.roll(x, shift=(-disp, -disp), axis=(1, 2))

    qkv = x @ params["wqkv"]
    q, k, v = jnp.split(qkv, 3, axis=-1)

    def to_w(t):
        t = t.reshape(b, nw_h, ws, nw_w, ws, heads, head_dim)
        return t.transpose(0, 5, 1, 3, 2, 4, 6).reshape(b, heads, nw_h * nw_w, N, head_dim)

    q, k, v = map(to_w, (q, k, v))
    dots = jnp.einsum("bhwid,bhwjd->bhwij", q, k) * scale
    if relative_pos_embedding:
        rel = relative_indices(ws)
        dots = dots + params["pos_emb"][rel[..., 0], rel[..., 1]]
    else:
        dots = dots + params["pos_emb"]
    if shifted:
        ul = create_mask(ws, disp, upper_lower=True, left_right=False)
        lr = create_mask(ws, disp, upper_lower=False, left_right=True)
        dots = dots.at[:, :, -nw_w:].add(ul)
        dots = dots.at[:, :, nw_w - 1::nw_w].add(lr)
    attn = jax.nn.softmax(dots, axis=-1)
    out = jnp.einsum("bhwij,bhwjd->bhwid", attn, v)
    out = out.reshape(b, heads, nw_h, nw_w, ws, ws, head_dim)
    out = out.transpose(0, 2, 4, 3, 5, 1, 6).reshape(b, n_h, n_w, inner)
    out = out @ params["wout"] + params["bout"]
    if shifted:
        out = jnp.roll(out, shift=(disp, disp), axis=(1, 2))
    return out


# ----------------------------- params & main -----------------------------

def init_window_attention_params(key, dim, heads, head_dim, window_size,
                                 relative_pos_embedding=True):
    inner = heads * head_dim
    kq, ko, kb, kp = jax.random.split(key, 4)
    pos_shape = ((2 * window_size - 1, 2 * window_size - 1)
                 if relative_pos_embedding else (window_size ** 2, window_size ** 2))
    return dict(
        wqkv=jax.random.normal(kq, (dim, 3 * inner), jnp.float32) * 0.02,   # bias=False
        wout=jax.random.normal(ko, (inner, dim), jnp.float32) * 0.02,
        bout=jax.random.normal(kb, (dim,), jnp.float32) * 0.02,
        pos_emb=jax.random.normal(kp, pos_shape, jnp.float32),
    )


if __name__ == "__main__":
    key = jax.random.PRNGKey(0)
    b, n_h, n_w = 2, 16, 16
    dim, heads, head_dim, window_size = 128, 4, 32, 4   # dim=128 keeps stores lane-dense

    kp, kx = jax.random.split(key)
    params = init_window_attention_params(kp, dim, heads, head_dim, window_size)
    x = jax.random.normal(kx, (b, n_h, n_w, dim), jnp.float32)

    for shifted in (False, True):
        fwd = jax.jit(functools.partial(
            window_attention_forward, heads=heads, head_dim=head_dim,
            window_size=window_size, shifted=shifted))
        out = jax.block_until_ready(fwd(x, params))
        assert out.shape == (b, n_h, n_w, dim), out.shape
        assert bool(jnp.isfinite(out).all())
        ref = window_attention_ref(x, params, heads=heads, head_dim=head_dim,
                                   window_size=window_size, shifted=shifted)
        err = float(jnp.max(jnp.abs(out - ref)))
        # bf16 MXU operands + approx reciprocal vs. an all-f32 reference
        assert err < 1e-2, f"shifted={shifted} max abs err {err}"

    print("KERNEL_OK")
</pallas_src>

<mosaic_0001>
module attributes {stable_mosaic.version = 11 : i64} {
  func.func @_window_attention_kernel(%arg0: i32, %arg1: i32, %arg2: memref<128x128xf32, #tpu.memory_space<vmem>>, %arg3: memref<128x384xbf16, #tpu.memory_space<vmem>>, %arg4: memref<128x128xbf16, #tpu.memory_space<vmem>>, %arg5: memref<1x128xf32, #tpu.memory_space<vmem>>, %arg6: memref<1x128x128xf32, #tpu.memory_space<vmem>>, %arg7: memref<128x128xf32, #tpu.memory_space<vmem>>) attributes {dimension_semantics = [#tpu.dimension_semantics<parallel>, #tpu.dimension_semantics<parallel>], iteration_bounds = array<i64: 2, 2>, scalar_prefetch = 0 : i64, scratch_operands = 0 : i64, tpu.core_type = #tpu.core_type<tc>, window_params = [{transform_indices = @transform_0, window_bounds = array<i64: 128, 128>}, {pipeline_mode = #tpu.pipeline_mode<synchronous>, transform_indices = @transform_1, window_bounds = array<i64: 128, 384>}, {pipeline_mode = #tpu.pipeline_mode<synchronous>, transform_indices = @transform_2, window_bounds = array<i64: 128, 128>}, {pipeline_mode = #tpu.pipeline_mode<synchronous>, transform_indices = @transform_3, window_bounds = array<i64: 1, 128>}, {pipeline_mode = #tpu.pipeline_mode<synchronous>, transform_indices = @transform_4, window_bounds = array<i64: 1, 128, 128>}, {transform_indices = @transform_5, window_bounds = array<i64: 128, 128>}]} {
    %c0 = arith.constant 0 : index
    %c0_0 = arith.constant 0 : index
    %0 = vector.load %arg2[%c0, %c0_0] : memref<128x128xf32, #tpu.memory_space<vmem>>, vector<128x128xf32>
    %1 = arith.truncf %0 : vector<128x128xf32> to vector<128x128xbf16>
    %c0_1 = arith.constant 0 : index
    %c0_2 = arith.constant 0 : index
    %2 = vector.load %arg3[%c0_1, %c0_2] : memref<128x384xbf16, #tpu.memory_space<vmem>>, vector<128x384xbf16>
    %cst = arith.constant dense<0.000000e+00> : vector<128x384xf32>
    %3 = tpu.matmul %1, %2, %cst {dimension_numbers = #tpu.dot_dimension_numbers<[1], [0], [0], [1], [0, 0, 1, 1], [], []>} : vector<128x128xbf16>, vector<128x384xbf16>, vector<128x384xf32> -> vector<128x384xf32>
    %c0_3 = arith.constant 0 : index
    %c0_4 = arith.constant 0 : index
    %c0_5 = arith.constant 0 : index
    %4 = vector.load %arg6[%c0_3, %c0_4, %c0_5] : memref<1x128x128xf32, #tpu.memory_space<vmem>>, vector<1x128x128xf32>
    %5 = vector.shape_cast %4 : vector<1x128x128xf32> to vector<128x128xf32>
    %6 = vector.extract_strided_slice %3 {offsets = [0, 0], sizes = [128, 32], strides = [1, 1]} : vector<128x384xf32> to vector<128x32xf32>
    %cst_6 = arith.constant 0.176776692 : f32
    %7 = vector.broadcast %cst_6 : f32 to vector<128x32xf32>
    %8 = arith.mulf %6, %7 : vector<128x32xf32>
    %9 = arith.truncf %8 : vector<128x32xf32> to vector<128x32xbf16>
    %10 = vector.extract_strided_slice %3 {offsets = [0, 128], sizes = [128, 32], strides = [1, 1]} : vector<128x384xf32> to vector<128x32xf32>
    %11 = arith.truncf %10 : vector<128x32xf32> to vector<128x32xbf16>
    %12 = vector.extract_strided_slice %3 {offsets = [0, 256], sizes = [128, 32], strides = [1, 1]} : vector<128x384xf32> to vector<128x32xf32>
    %13 = arith.truncf %12 : vector<128x32xf32> to vector<128x32xbf16>
    %cst_7 = arith.constant dense<0.000000e+00> : vector<128x128xf32>
    %14 = tpu.matmul %9, %11, %cst_7 {dimension_numbers = #tpu.dot_dimension_numbers<[1], [1], [0], [0], [0, 0, 1, 0], [], []>} : vector<128x32xbf16>, vector<128x32xbf16>, vector<128x128xf32> -> vector<128x128xf32>
    %15 = arith.addf %14, %5 : vector<128x128xf32>
    %cst_8 = arith.constant dense<0xFF800000> : vector<128xf32>
    %16 = vector.multi_reduction <maximumf>, %15, %cst_8 [1] : vector<128x128xf32> to vector<128xf32>
    %17 = vector.shape_cast %16 : vector<128xf32> to vector<128x1xf32>
    %18 = vector.broadcast %17 : vector<128x1xf32> to vector<128x128xf32>
    %19 = arith.subf %15, %18 : vector<128x128xf32>
    %20 = math.exp %19 : vector<128x128xf32>
    %cst_9 = arith.constant dense<0.000000e+00> : vector<128xf32>
    %21 = vector.multi_reduction <add>, %20, %cst_9 [1] : vector<128x128xf32> to vector<128xf32>
    %22 = vector.shape_cast %21 : vector<128xf32> to vector<128x1xf32>
    %23 = tpu.reciprocal %22 {approx = true} : vector<128x1xf32> -> vector<128x1xf32>
    %24 = vector.broadcast %23 : vector<128x1xf32> to vector<128x128xf32>
    %25 = arith.mulf %20, %24 : vector<128x128xf32>
    %26 = arith.truncf %25 : vector<128x128xf32> to vector<128x128xbf16>
    %cst_10 = arith.constant dense<0.000000e+00> : vector<128x32xf32>
    %27 = tpu.matmul %26, %13, %cst_10 {dimension_numbers = #tpu.dot_dimension_numbers<[1], [0], [0], [1], [0, 0, 1, 1], [], []>} : vector<128x128xbf16>, vector<128x32xbf16>, vector<128x32xf32> -> vector<128x32xf32>
    %28 = vector.extract_strided_slice %3 {offsets = [0, 32], sizes = [128, 32], strides = [1, 1]} : vector<128x384xf32> to vector<128x32xf32>
    %cst_11 = arith.constant 0.176776692 : f32
    %29 = vector.broadcast %cst_11 : f32 to vector<128x32xf32>
    %30 = arith.mulf %28, %29 : vector<128x32xf32>
    %31 = arith.truncf %30 : vector<128x32xf32> to vector<128x32xbf16>
    %32 = vector.extract_strided_slice %3 {offsets = [0, 160], sizes = [128, 32], strides = [1, 1]} : vector<128x384xf32> to vector<128x32xf32>
    %33 = arith.truncf %32 : vector<128x32xf32> to vector<128x32xbf16>
    %34 = vector.extract_strided_slice %3 {offsets = [0, 288], sizes = [128, 32], strides = [1, 1]} : vector<128x384xf32> to vector<128x32xf32>
    %35 = arith.truncf %34 : vector<128x32xf32> to vector<128x32xbf16>
    %cst_12 = arith.constant dense<0.000000e+00> : vector<128x128xf32>
    %36 = tpu.matmul %31, %33, %cst_12 {dimension_numbers = #tpu.dot_dimension_numbers<[1], [1], [0], [0], [0, 0, 1, 0], [], []>} : vector<128x32xbf16>, vector<128x32xbf16>, vector<128x128xf32> -> vector<128x128xf32>
    %37 = arith.addf %36, %5 : vector<128x128xf32>
    %cst_13 = arith.constant dense<0xFF800000> : vector<128xf32>
    %38 = vector.multi_reduction <maximumf>, %37, %cst_13 [1] : vector<128x128xf32> to vector<128xf32>
    %39 = vector.shape_cast %38 : vector<128xf32> to vector<128x1xf32>
    %40 = vector.broadcast %39 : vector<128x1xf32> to vector<128x128xf32>
    %41 = arith.subf %37, %40 : vector<128x128xf32>
    %42 = math.exp %41 : vector<128x128xf32>
    %cst_14 = arith.constant dense<0.000000e+00> : vector<128xf32>
    %43 = vector.multi_reduction <add>, %42, %cst_14 [1] : vector<128x128xf32> to vector<128xf32>
    %44 = vector.shape_cast %43 : vector<128xf32> to vector<128x1xf32>
    %45 = tpu.reciprocal %44 {approx = true} : vector<128x1xf32> -> vector<128x1xf32>
    %46 = vector.broadcast %45 : vector<128x1xf32> to vector<128x128xf32>
    %47 = arith.mulf %42, %46 : vector<128x128xf32>
    %48 = arith.truncf %47 : vector<128x128xf32> to vector<128x128xbf16>
    %cst_15 = arith.constant dense<0.000000e+00> : vector<128x32xf32>
    %49 = tpu.matmul %48, %35, %cst_15 {dimension_numbers = #tpu.dot_dimension_numbers<[1], [0], [0], [1], [0, 0, 1, 1], [], []>} : vector<128x128xbf16>, vector<128x32xbf16>, vector<128x32xf32> -> vector<128x32xf32>
    %50 = vector.extract_strided_slice %3 {offsets = [0, 64], sizes = [128, 32], strides = [1, 1]} : vector<128x384xf32> to vector<128x32xf32>
    %cst_16 = arith.constant 0.176776692 : f32
    %51 = vector.broadcast %cst_16 : f32 to vector<128x32xf32>
    %52 = arith.mulf %50, %51 : vector<128x32xf32>
    %53 = arith.truncf %52 : vector<128x32xf32> to vector<128x32xbf16>
    %54 = vector.extract_strided_slice %3 {offsets = [0, 192], sizes = [128, 32], strides = [1, 1]} : vector<128x384xf32> to vector<128x32xf32>
    %55 = arith.truncf %54 : vector<128x32xf32> to vector<128x32xbf16>
    %56 = vector.extract_strided_slice %3 {offsets = [0, 320], sizes = [128, 32], strides = [1, 1]} : vector<128x384xf32> to vector<128x32xf32>
    %57 = arith.truncf %56 : vector<128x32xf32> to vector<128x32xbf16>
    %cst_17 = arith.constant dense<0.000000e+00> : vector<128x128xf32>
    %58 = tpu.matmul %53, %55, %cst_17 {dimension_numbers = #tpu.dot_dimension_numbers<[1], [1], [0], [0], [0, 0, 1, 0], [], []>} : vector<128x32xbf16>, vector<128x32xbf16>, vector<128x128xf32> -> vector<128x128xf32>
    %59 = arith.addf %58, %5 : vector<128x128xf32>
    %cst_18 = arith.constant dense<0xFF800000> : vector<128xf32>
    %60 = vector.multi_reduction <maximumf>, %59, %cst_18 [1] : vector<128x128xf32> to vector<128xf32>
    %61 = vector.shape_cast %60 : vector<128xf32> to vector<128x1xf32>
    %62 = vector.broadcast %61 : vector<128x1xf32> to vector<128x128xf32>
    %63 = arith.subf %59, %62 : vector<128x128xf32>
    %64 = math.exp %63 : vector<128x128xf32>
    %cst_19 = arith.constant dense<0.000000e+00> : vector<128xf32>
    %65 = vector.multi_reduction <add>, %64, %cst_19 [1] : vector<128x128xf32> to vector<128xf32>
    %66 = vector.shape_cast %65 : vector<128xf32> to vector<128x1xf32>
    %67 = tpu.reciprocal %66 {approx = true} : vector<128x1xf32> -> vector<128x1xf32>
    %68 = vector.broadcast %67 : vector<128x1xf32> to vector<128x128xf32>
    %69 = arith.mulf %64, %68 : vector<128x128xf32>
    %70 = arith.truncf %69 : vector<128x128xf32> to vector<128x128xbf16>
    %cst_20 = arith.constant dense<0.000000e+00> : vector<128x32xf32>
    %71 = tpu.matmul %70, %57, %cst_20 {dimension_numbers = #tpu.dot_dimension_numbers<[1], [0], [0], [1], [0, 0, 1, 1], [], []>} : vector<128x128xbf16>, vector<128x32xbf16>, vector<128x32xf32> -> vector<128x32xf32>
    %72 = vector.extract_strided_slice %3 {offsets = [0, 96], sizes = [128, 32], strides = [1, 1]} : vector<128x384xf32> to vector<128x32xf32>
    %cst_21 = arith.constant 0.176776692 : f32
    %73 = vector.broadcast %cst_21 : f32 to vector<128x32xf32>
    %74 = arith.mulf %72, %73 : vector<128x32xf32>
    %75 = arith.truncf %74 : vector<128x32xf32> to vector<128x32xbf16>
    %76 = vector.extract_strided_slice %3 {offsets = [0, 224], sizes = [128, 32], strides = [1, 1]} : vector<128x384xf32> to vector<128x32xf32>
    %77 = arith.truncf %76 : vector<128x32xf32> to vector<128x32xbf16>
    %78 = vector.extract_strided_slice %3 {offsets = [0, 352], sizes = [128, 32], strides = [1, 1]} : vector<128x384xf32> to vector<128x32xf32>
    %79 = arith.truncf %78 : vector<128x32xf32> to vector<128x32xbf16>
    %cst_22 = arith.constant dense<0.000000e+00> : vector<128x128xf32>
    %80 = tpu.matmul %75, %77, %cst_22 {dimension_numbers = #tpu.dot_dimension_numbers<[1], [1], [0], [0], [0, 0, 1, 0], [], []>} : vector<128x32xbf16>, vector<128x32xbf16>, vector<128x128xf32> -> vector<128x128xf32>
    %81 = arith.addf %80, %5 : vector<128x128xf32>
    %cst_23 = arith.constant dense<0xFF800000> : vector<128xf32>
    %82 = vector.multi_reduction <maximumf>, %81, %cst_23 [1] : vector<128x128xf32> to vector<128xf32>
    %83 = vector.shape_cast %82 : vector<128xf32> to vector<128x1xf32>
    %84 = vector.broadcast %83 : vector<128x1xf32> to vector<128x128xf32>
    %85 = arith.subf %81, %84 : vector<128x128xf32>
    %86 = math.exp %85 : vector<128x128xf32>
    %cst_24 = arith.constant dense<0.000000e+00> : vector<128xf32>
    %87 = vector.multi_reduction <add>, %86, %cst_24 [1] : vector<128x128xf32> to vector<128xf32>
    %88 = vector.shape_cast %87 : vector<128xf32> to vector<128x1xf32>
    %89 = tpu.reciprocal %88 {approx = true} : vector<128x1xf32> -> vector<128x1xf32>
    %90 = vector.broadcast %89 : vector<128x1xf32> to vector<128x128xf32>
    %91 = arith.mulf %86, %90 : vector<128x128xf32>
    %92 = arith.truncf %91 : vector<128x128xf32> to vector<128x128xbf16>
    %cst_25 = arith.constant dense<0.000000e+00> : vector<128x32xf32>
    %93 = tpu.matmul %92, %79, %cst_25 {dimension_numbers = #tpu.dot_dimension_numbers<[1], [0], [0], [1], [0, 0, 1, 1], [], []>} : vector<128x128xbf16>, vector<128x32xbf16>, vector<128x32xf32> -> vector<128x32xf32>
    %94 = tpu.concatenate %27, %49, %71, %93 in 1 : vector<128x32xf32>, vector<128x32xf32>, vector<128x32xf32>, vector<128x32xf32> -> vector<128x128xf32>
    %95 = arith.truncf %94 : vector<128x128xf32> to vector<128x128xbf16>
    %c0_26 = arith.constant 0 : index
    %c0_27 = arith.constant 0 : index
    %96 = vector.load %arg4[%c0_26, %c0_27] : memref<128x128xbf16, #tpu.memory_space<vmem>>, vector<128x128xbf16>
    %cst_28 = arith.constant dense<0.000000e+00> : vector<128x128xf32>
    %97 = tpu.matmul %95, %96, %cst_28 {dimension_numbers = #tpu.dot_dimension_numbers<[1], [0], [0], [1], [0, 0, 1, 1], [], []>} : vector<128x128xbf16>, vector<128x128xbf16>, vector<128x128xf32> -> vector<128x128xf32>
    %c0_29 = arith.constant 0 : index
    %c0_30 = arith.constant 0 : index
    %98 = vector.load %arg5[%c0_29, %c0_30] : memref<1x128xf32, #tpu.memory_space<vmem>>, vector<1x128xf32>
    %99 = vector.broadcast %98 : vector<1x128xf32> to vector<128x128xf32>
    %100 = arith.addf %97, %99 : vector<128x128xf32>
    %c0_31 = arith.constant 0 : index
    %c0_32 = arith.constant 0 : index
    %101 = vector.load %arg7[%c0_31, %c0_32] : memref<128x128xf32, #tpu.memory_space<vmem>>, vector<128x128xf32>
    tpu.vector_store %arg7[%c0_31, %c0_32], %100 {strides = array<i32>} : memref<128x128xf32, #tpu.memory_space<vmem>>, vector<128x128xf32>,
    return
  }
  func.func @transform_0(%arg0: i32, %arg1: i32) -> (i32, i32) {
    %c2_i32 = arith.constant 2 : i32
    %0 = arith.muli %arg0, %c2_i32 : i32
    %1 = arith.addi %0, %arg1 : i32
    %c0_i32 = arith.constant 0 : i32
    %c0_i32_0 = arith.constant 0 : i32
    return %1, %c0_i32 : i32, i32
  }
  func.func @transform_1(%arg0: i32, %arg1: i32) -> (i32, i32) {
    %c0_i32 = arith.constant 0 : i32
    %c0_i32_0 = arith.constant 0 : i32
    %c0_i32_1 = arith.constant 0 : i32
    return %c0_i32, %c0_i32_0 : i32, i32
  }
  func.func @transform_2(%arg0: i32, %arg1: i32) -> (i32, i32) {
    %c0_i32 = arith.constant 0 : i32
    %c0_i32_0 = arith.constant 0 : i32
    %c0_i32_1 = arith.constant 0 : i32
    return %c0_i32, %c0_i32_0 : i32, i32
  }
  func.func @transform_3(%arg0: i32, %arg1: i32) -> (i32, i32) {
    %c0_i32 = arith.constant 0 : i32
    %c0_i32_0 = arith.constant 0 : i32
    %c0_i32_1 = arith.constant 0 : i32
    return %c0_i32, %c0_i32_0 : i32, i32
  }
  func.func @transform_4(%arg0: i32, %arg1: i32) -> (i32, i32, i32) {
    %c0_i32 = arith.constant 0 : i32
    %c0_i32_0 = arith.constant 0 : i32
    %c0_i32_1 = arith.constant 0 : i32
    %c0_i32_2 = arith.constant 0 : i32
    return %c0_i32, %c0_i32_0, %c0_i32_1 : i32, i32, i32
  }
  func.func @transform_5(%arg0: i32, %arg1: i32) -> (i32, i32) {
    %c2_i32 = arith.constant 2 : i32
    %0 = arith.muli %arg0, %c2_i32 : i32
    %1 = arith.addi %0, %arg1 : i32
    %c0_i32 = arith.constant 0 : i32
    %c0_i32_0 = arith.constant 0 : i32
    return %1, %c0_i32 : i32, i32
  }
}

</mosaic_0001>

<bundles_post_ra>
// kernel: sub.15
= control target key start
LH: loop header
LB: loop body
LE: loop exit
PB: predicated region body
PF: predicated region fallthrough
CT: control target
= control target key end

     0   :  { %s29_s10 = smov 3  ;;  %s10_s11 = smov 3  ;;  %vm12_vm0 = vcmask 31744   ;;  %vm19_vm1 = vcmask 130144   ;;  %vm26_vm2 = vcmask 97344   ;;  %vm33_vm3 = vcmask 64544   ;;  %s67_s0 = inlined_call_operand.vmem [shape: s32[4,4,2], index: 0, kind: input, shape index: {}]   ;;  %s68_s1 = inlined_call_operand.vmem [shape: s32[16,2], index: 1, kind: output, shape index: {}]  }
   0x1   :  { %v41_v0 = vld [vmem:[%s67_s0 + $0x4] sm:$0xf]  ;;  %v8_v1 = vld [vmem:[%s67_s0] sm:$0xf]  ;;  %s15_s0 = smov 3  ;;  %s22_s12 = smov 3 }
   0x2   :  { %7 = vst [vmem:[#allocation1 + $0x8] sm:$0xf] %v41_v0  ;;  %9 = vst [vmem:[#allocation1] sm:$0xf] %v8_v1  ;;  %s45_s13 = smov 12   ;;  %s46_s14 = smov 4  }
   0x3   :  { %s47_s15 = smov 8  }
   0x9   :  { %v16_v2 = vld [vmem:[#allocation1 + $0x3] ss:$8 sm:%s15_s0]   ;;  %v30_v3 = vld [vmem:[#allocation1 + $0x1] ss:$8 sm:%s29_s10]   ;;  %v11_v4 = vld [vmem:[#allocation1] ss:$8 sm:%s10_s11]  }
   0xa   :  { %17 = vrot.lane.b32.xlu0 %v16_v2, %s45_s13  ;;  %31 = vrot.lane.b32.xlu1 %v30_v3, %s46_s14  ;;  %v23_v5 = vld [vmem:[#allocation1 + $0x2] ss:$8 sm:%s22_s12]   ;;  %13 = vst.msk [vmem:[#allocation0] sm:$0x3] %vm12_vm0, %v11_v4  }
   0xe   :  { %24 = vrot.lane.b32.xlu0 %v23_v5, %s47_s15 }
  0x7c   :  { %v18_v6 = vpop.permute.xlu0 %17   ;;  %v32_v7 = vpop.permute.xlu1 %31  }
  0x7d   :  { %20 = vst.msk [vmem:[#allocation0] sm:$0x3] %vm19_vm1, %v18_v6  }
  0x80   :  { %v25_v8 = vpop.permute.xlu0 %24  }
  0x81   :  { %27 = vst.msk [vmem:[#allocation0] sm:$0x3] %vm26_vm2, %v25_v8  }
  0x82   :  { %34 = vst.msk [vmem:[#allocation0] sm:$0x3] %vm33_vm3, %v32_v7  }
  0x89   :  { %v38_v9 = vld [vmem:[#allocation0] sm:$0x3] }
  0x8a   :  { %40 = vst [vmem:[%s68_s1] sm:$0x3] %v38_v9 }

// kernel: window_attention_forward.1
= control target key start
LH: loop header
LB: loop body
LE: loop exit
PB: predicated region body
PF: predicated region fallthrough
CT: control target
= control target key end

     0   :  { %10 = vsyncpa [#allocation3], 0  ;;  %s5894_s0 = inlined_call_operand.vmem [shape: f32[512,128], index: 0, kind: input, shape index: {}]   ;;  %s5895_s1 = inlined_call_operand.vmem [shape: bf16[128,384], index: 1, kind: input, shape index: {}]   ;;  %s5896_s2 = inlined_call_operand.vmem [shape: bf16[128,128], index: 2, kind: input, shape index: {}]   ;;  %s5897_s3 = inlined_call_operand.vmem [shape: f32[1,128], index: 3, kind: input, shape index: {}]   ;;  %s5898_s4 = inlined_call_operand.vmem [shape: f32[1,128,128], index: 4, kind: input, shape index: {}]   ;;  %s5899_s5 = inlined_call_operand.hbm [shape: f32[512,128], index: 5, kind: output, shape index: {}]  }
   0x1   :  { %12 = vsyncpa [#allocation3 + $0x1], 0  ;;  %s4258_s18 = smov 0   ;;  %s4260_s19 = smov 0  }
   0x2   :  { %s4262_s20 = smov 0   ;;  %s4264_s21 = smov 0  }
   0x3   :  { %s4266_s22 = smov 0   ;;  %s4268_s23 = smov 0  }
   0x4   :  { %s4270_s24 = smov 0   ;;  %s4272_s25 = smov 0  }
   0x5 LB: > { %s3003_s26 = sadd.s32 4294967295, %s4219_s25   ;;  %s27_s27 = sadd.s32 1, %s4211_s23  ;;  %s4219_s25 = sphi %s4272_s25, %s18_s25   ;;  %s4215_s24 = sphi %s4270_s24, %s6057_s24   ;;  %s4211_s23 = sphi %s4268_s23, %s6056_s23   ;;  %s4207_s22 = sphi %s4266_s22, %s6055_s22   ;;  %s4203_s21 = sphi %s4264_s21, %s6054_s21   ;;  %s4199_s20 = sphi %s4262_s20, %s6053_s20   ;;  %s4195_s19 = sphi %s4260_s19, %s6052_s19   ;;  %s4191_s18 = sphi %s4258_s18, %s6051_s18  }
   0x6   : > { %s30_s28 = sadd.s32 1, %s4215_s24  ;;  %p28_p0 = scmp.ge.s32.totalorder %s27_s27, 2 }
   0x7   : > { %s3007_s29 = sshll.u32 %s4215_s24, 1  ;;  %s3004_s30 = sadd.s32 4294967294, %s4219_s25  }
   0x8   : > { %s149_s6 = sadd.s32 %s4211_s23, %s3007_s29  ;;  %s6059_s27 = smov (%p28_p0, %s27_s27), 0 }
   0x9   : > { %s6061_s28 = smov (!%p28_p0, %s30_s28), %s4215_s24  ;;  %p165_p1 = scmp.ne.s32.totalorder %s4199_s20, %s4195_s19 }
   0xa   : > { %p166_p2 = scmp.eq.s32.totalorder %s3003_s26, 3  ;;  %p32_p3 = scmp.ge.s32.totalorder %s6061_s28, 2 }
   0xb   : > { %p171_p4 = scmp.ne.s32.totalorder %s4195_s19, %s4191_s18  ;;  %p172_p6 = scmp.eq.s32.totalorder %s3004_s30, 3 }
   0xc   : > { %p4311_p5 = por %p166_p2, %p165_p1  ;;  %s6063_s28 = smov (%p32_p3, %s6061_s28), 0 }
   0xd   : > { %p4317_p7 = por %p172_p6, %p171_p4  ;;  %p3011_p8 = scmp.ge.s32.totalorder %s4219_s25, 1 }
   0xe   : > { %s3008_s9 = sshll.u32 %s6063_s28, 1  ;;  %p215_p9 = scmp.lt.s32.totalorder %s4219_s25, 5 }
   0xf   : > { %s151_s10 = sadd.s32 %s3008_s9, %s6059_s27  ;;  %s155_s11 = sadd.s32 1, %s4199_s20 }
  0x10   : > { %s152_s12 = ssub.s32 %s149_s6, %s151_s10  ;;  %p216_p10 = pnand %p3011_p8, %p215_p9 }
  0x11   : > { %p153_p11 = scmp.eq.s32.totalorder %s152_s12, 0 }
  0x12   : > { %219 = sbr.rel (%p216_p10) target bundleno = 3399 (0xd47), region = 40 }
  0x13   : > { %s4327_s13 = scalar_select %p153_p11, %s4199_s20, %s155_s11  }
  0x19   : > { %v3813_v0 = vld [vmem:[%s5895_s1 + $0x4] ss:$12 sps:$4 sm:$0xff]   ;;  %s3013_s16 = sshll.u32 %s4207_s22, 1  ;;  %v3815_v1 = vld [vmem:[%s5895_s1] ss:$12 sps:$4 sm:$0xff]   ;;  %v4221_v2 = vmov 0  }
  0x1a   : > { %475 = vmatprep.mubr.bf16.mxu0 %v4221_v2  ;;  %s4338_s29 = sadd.s32 %s4203_s21, %s3013_s16  ;;  %443 = vmatprep.subr.bf16.mxu0 %v3813_v0  ;;  %v3816_v3 = vld [vmem:[%s5895_s1 + $0x1c] ss:$12 sps:$4 sm:$0xff]   ;;  %v3818_v4 = vld [vmem:[%s5895_s1 + $0x18] ss:$12 sps:$4 sm:$0xff]   ;;  %v3819_v5 = vld [vmem:[%s5895_s1 + $0x34] ss:$12 sps:$4 sm:$0xff]  }
  0x1b   : > { %s3014_s9 = sshll.u32 %s4338_s29, 4  ;;  %444 = vmatpush1.bf16.msra.mxu0 %v3815_v1  ;;  %v3821_v6 = vld [vmem:[%s5895_s1 + $0x30] ss:$12 sps:$4 sm:$0xff]   ;;  %v3822_v7 = vld [vmem:[%s5895_s1 + $0x4c] ss:$12 sps:$4 sm:$0xff]   ;;  %vm709_vm0 = vcmask 261120  }
  0x1c   : > { %p248_p12 = scmp.lt.s32.totalorder %s3014_s9, 63  ;;  %445 = vmatprep.subr.bf16.mxu0 %v3816_v3  ;;  %v3824_v9 = vld [vmem:[%s5895_s1 + $0x48] ss:$12 sps:$4 sm:$0xff]   ;;  %v3825_v11 = vld [vmem:[%s5895_s1 + $0x64] ss:$12 sps:$4 sm:$0xff]   ;;  %s4223_s14 = smov 64  }
  0x1d   : > { %v3827_v13 = vld [vmem:[%s5895_s1 + $0x60] ss:$12 sps:$4 sm:$0xff]   ;;  %v3828_v14 = vld [vmem:[%s5895_s1 + $0x7c] ss:$12 sps:$4 sm:$0xff]   ;;  %v3830_v17 = vld [vmem:[%s5895_s1 + $0x78] ss:$12 sps:$4 sm:$0xff]  }
  0x1e   : > { %s6065_s9 = smov (!%p248_p12, %s3014_s9), 63  ;;  %v3837_v15 = vld [vmem:[%s5895_s1 + $0x8] ss:$12 sps:$4 sm:$0xff]   ;;  %v3838_v16 = vld [vmem:[%s5895_s1 + $0x20] ss:$12 sps:$4 sm:$0xff]   ;;  %vm2686_vm1 = vcmask 523264  }
  0x1f   : > { %446 = vmatpush1.bf16.msra.mxu0 %v3818_v4  ;;  %s3015_s15 = sshll.u32 %s6065_s9, 3  ;;  %3248 = vmatprep.subr.bf16.mxu1 %v3837_v15  ;;  %v3831_v18 = vld [vmem:[%s5895_s1 + $0x94] ss:$12 sps:$4 sm:$0xff]   ;;  %v3839_v19 = vld [vmem:[%s5895_s1 + $0x38] ss:$12 sps:$4 sm:$0xff]   ;;  %vm2703_vm2 = vcmask 785408  }
  0x20   : > { %447 = vmatprep.subr.bf16.mxu0 %v3819_v5  ;;  %s4359_s6 = scalar_lea.vmem %s5894_s0, %s3015_s15  ;;  %3249 = vmatpush3.bf16.msra.mxu1 %v3837_v15  ;;  %v3833_v20 = vld [vmem:[%s5895_s1 + $0x90] ss:$12 sps:$4 sm:$0xff]   ;;  %v3834_v21 = vld [vmem:[%s5895_s1 + $0xac] ss:$12 sps:$4 sm:$0xff]   ;;  %v3836_v23 = vld [vmem:[%s5895_s1 + $0xa8] ss:$12 sps:$4 sm:$0xff]  }
  0x21   : > { %v259_v8 = vld [vmem:[%s4359_s6] sm:$0xff]  ;;  %v260_v10 = vld [vmem:[%s4359_s6 + $0x8] sm:$0xff]  ;;  %3250 = vmatprep.subr.bf16.mxu1 %v3838_v16  ;;  %v3840_v22 = vld [vmem:[%s5895_s1 + $0x50] ss:$12 sps:$4 sm:$0xff]   ;;  %s4224_s15 = smov 32   ;;  %s3087_s21 = sshll.u32 %s4338_s29, 11 }
  0x22   : > { %v275_v12 = vpack.c.bf16 %v260_v10, %v259_v8  ;;  %v3841_v24 = vld [vmem:[%s5895_s1 + $0x68] ss:$12 sps:$4 sm:$0xff]   ;;  %v3842_v25 = vld [vmem:[%s5895_s1 + $0x80] ss:$12 sps:$4 sm:$0xff]   ;;  %v262_v27 = vld [vmem:[%s4359_s6 + $0x18] sm:$0xff]  ;;  %s5832_s26 = scalar_lea.hbm %s5899_s5, %s3087_s21  ;;  %s4225_s10 = smov [#allocation2]  }
  0x23   : > { %448 = vmatpush1.bf16.msra.mxu0 %v3821_v6  ;;  %v261_v26 = vld [vmem:[%s4359_s6 + $0x10] sm:$0xff]  ;;  %v3843_v28 = vld [vmem:[%s5895_s1 + $0x98] ss:$12 sps:$4 sm:$0xff]   ;;  %v264_v32 = vld [vmem:[%s4359_s6 + $0x28] sm:$0xff]  ;;  %s4129_s11 = sshll.u32 %s4225_s10, 4  ;;  %s4130_s11 = int_to_ptr.vmem [resolvable:$false] %s4129_s11 }
  0x24   : > { %449 = vmatprep.subr.bf16.mxu0 %v3822_v7  ;;  %3264 = vmatprep.mubr.bf16.mxu1 %v275_v12  ;;  %v276_v29 = vpack.c.bf16 %v262_v27, %v261_v26  ;;  %v3844_v30 = vld [vmem:[%s5895_s1 + $0xb0] ss:$12 sps:$4 sm:$0xff]   ;;  %v263_v31 = vld [vmem:[%s4359_s6 + $0x20] sm:$0xff]  ;;  %v268_v38 = vld [vmem:[%s4359_s6 + $0x48] sm:$0xff] }
  0x25   : > { %3251 = vmatpush3.bf16.msra.mxu1 %v3838_v16  ;;  %v277_v33 = vpack.c.bf16 %v264_v32, %v263_v31  ;;  %v265_v34 = vld [vmem:[%s4359_s6 + $0x30] sm:$0xff]  ;;  %v266_v35 = vld [vmem:[%s4359_s6 + $0x38] sm:$0xff]  ;;  %v267_v37 = vld [vmem:[%s4359_s6 + $0x40] sm:$0xff] }
  0x26   : > { %3252 = vmatprep.subr.bf16.mxu1 %v3839_v19  ;;  %v278_v36 = vpack.c.bf16 %v266_v35, %v265_v34  ;;  %v279_v39 = vpack.c.bf16 %v268_v38, %v267_v37  ;;  %v269_v40 = vld [vmem:[%s4359_s6 + $0x50] sm:$0xff]  ;;  %v270_v41 = vld [vmem:[%s4359_s6 + $0x58] sm:$0xff]  ;;  %v271_v42 = vld [vmem:[%s4359_s6 + $0x60] sm:$0xff] }
  0x27   : > { %450 = vmatpush1.bf16.msra.mxu0 %v3824_v9  ;;  %v272_v43 = vld [vmem:[%s4359_s6 + $0x68] sm:$0xff]  ;;  %v280_v44 = vpack.c.bf16 %v270_v41, %v269_v40  ;;  %v273_v46 = vld [vmem:[%s4359_s6 + $0x70] sm:$0xff]  ;;  %v274_v47 = vld [vmem:[%s4359_s6 + $0x78] sm:$0xff]  ;;  %s4222_s6 = smov 96  }
  0x28   : > { %451 = vmatprep.subr.bf16.mxu0 %v3825_v11  ;;  %v281_v45 = vpack.c.bf16 %v272_v43, %v271_v42  ;;  %v282_v48 = vpack.c.bf16 %v274_v47, %v273_v46 }
  0x29   : > { %3253 = vmatpush3.bf16.msra.mxu1 %v3839_v19 }
  0x2a   : > { %3254 = vmatprep.subr.bf16.mxu1 %v3840_v22 }
  0x2b   : > { %452 = vmatpush1.bf16.msra.mxu0 %v3827_v13 }
  0x2c   : > { %453 = vmatprep.subr.bf16.mxu0 %v3828_v14 }
  0x2d   : > { %3255 = vmatpush3.bf16.msra.mxu1 %v3840_v22 }
  0x2e   : > { %3256 = vmatprep.subr.bf16.mxu1 %v3841_v24 }
  0x2f   : > { %454 = vmatpush1.bf16.msra.mxu0 %v3830_v17 }
  0x30   : > { %455 = vmatprep.subr.bf16.mxu0 %v3831_v18 }
  0x31   : > { %3257 = vmatpush3.bf16.msra.mxu1 %v3841_v24 }
  0x32   : > { %3258 = vmatprep.subr.bf16.mxu1 %v3842_v25 }
  0x33   : > { %456 = vmatpush1.bf16.msra.mxu0 %v3833_v20 }
  0x34   : > { %457 = vmatprep.subr.bf16.mxu0 %v3834_v21 }
  0x35   : > { %3259 = vmatpush3.bf16.msra.mxu1 %v3842_v25 }
  0x36   : > { %3260 = vmatprep.subr.bf16.mxu1 %v3843_v28 }
  0x37   : > { %458 = vmatpush1.bf16.msra.mxu0 %v3836_v23 }
  0x39   : > { %3261 = vmatpush3.bf16.msra.mxu1 %v3843_v28 }
  0x3a   : > { %476 = vmatmul.mubr.bf16.vlgmr.msra.gmra.mrb[0].mxu0 %v275_v12  ;;  %3262 = vmatprep.subr.bf16.mxu1 %v3844_v30 }
  0x3b   : > { %485 = vmatprep.mubr.bf16.mxu0 %v4221_v2 }
  0x3d   : > { %3263 = vmatpush3.bf16.msra.mxu1 %v3844_v30 }
  0x40   : > { %3265 = vmatmul.mubr.bf16.vlgmr.msra.gmra.mrb[0].mxu1 %v276_v29 }
  0x41   : > { %3268 = vmatprep.mubr.bf16.mxu1 %v277_v33 }
  0x42   : > { %486 = vmatmul.mubr.bf16.gmra.mrb[4].mxu0 %v276_v29 }
  0x43   : > { %495 = vmatprep.mubr.bf16.mxu0 %v4221_v2 }
  0x48   : > { %3269 = vmatmul.mubr.bf16.gmra.mrb[4].mxu1 %v278_v36 }
  0x49   : > { %3272 = vmatprep.mubr.bf16.mxu1 %v279_v39 }
  0x4a   : > { %496 = vmatmul.mubr.bf16.gmra.mrb[8].mxu0 %v277_v33 }
  0x4b   : > { %505 = vmatprep.mubr.bf16.mxu0 %v4221_v2 }
  0x50   : > { %3273 = vmatmul.mubr.bf16.gmra.mrb[8].mxu1 %v280_v44 }
  0x51   : > { %3276 = vmatprep.mubr.bf16.mxu1 %v281_v45 }
  0x52   : > { %506 = vmatmul.mubr.bf16.gmra.mrb[12].mxu0 %v278_v36 }
  0x53   : > { %515 = vmatprep.mubr.bf16.mxu0 %v4221_v2 }
  0x58   : > { %3277 = vmatmul.mubr.bf16.gmra.mrb[12].mxu1 %v282_v48 }
  0x5a   : > { %516 = vmatmul.mubr.bf16.gmra.mrb[16].mxu0 %v279_v39 }
  0x5b   : > { %525 = vmatprep.mubr.bf16.mxu0 %v4221_v2 }
  0x62   : > { %526 = vmatmul.mubr.bf16.gmra.mrb[20].mxu0 %v280_v44 }
  0x63   : > { %535 = vmatprep.mubr.bf16.mxu0 %v4221_v2 }
  0x6a   : > { %536 = vmatmul.mubr.bf16.gmra.mrb[24].mxu0 %v281_v45 }
  0x6b   : > { %545 = vmatprep.mubr.bf16.mxu0 %v4221_v2 }
  0x72   : > { %546 = vmatmul.mubr.bf16.gmra.mrb[28].mxu0 %v282_v48 }
 0x10d   : > { %v477_v49 = vpop.f32.mrb[0].mxu0 }
 0x10e   : > { %v479_v50 = vpop.f32.mrb[1].mxu0  ;;  %v669_v52 = vmul.f32 0.17677669, %v477_v49 }
 0x10f   : > { %v481_v51 = vpop.f32.mrb[2].mxu0 }
 0x110   : > { %v670_v53 = vmul.f32 0.17677669, %v481_v51  ;;  %v483_v54 = vpop.f32.mrb[3].mxu0 }
 0x111   : > { %v4435_v55 = vpack.c.bf16 %v483_v54, %v479_v50 }
 0x112   : > { %v4437_v56 = vpack.c.bf16 %v670_v53, %v669_v52 }
 0x113   : > { %1136 = vrot.lane.b32.xlu0 %v4435_v55, %s4222_s6  ;;  %3584 = vmatprep.subr.msk.bf16.mxu0 %vm709_vm0, %v4435_v55  ;;  %v735_v57 = vsel %vm709_vm0, %v4435_v55, 0  ;;  %v3266_v4 = vpop.f32.mrb[0].mxu1 }
 0x114   : > { %3281 = vmatpush3.bf16.xpose.msra.mxu0 %v735_v57  ;;  %3296 = vmatprep.mubr.msk.bf16.mxu0 %vm709_vm0, %v4437_v56  ;;  %v590_v6 = vpop.f32.mrb[1].mxu1 }
 0x115   : > { %v487_v58 = vpop.f32.mrb[4].mxu0  ;;  %v3267_v8 = vpop.f32.mrb[2].mxu1 }
 0x116   : > { %v489_v59 = vpop.f32.mrb[5].mxu0  ;;  %v671_v61 = vmul.f32 0.17677669, %v487_v58  ;;  %v4457_v12 = vpack.c.bf16 %v3267_v8, %v3266_v4  ;;  %v593_v13 = vpop.f32.mrb[3].mxu1 }
 0x117   : > { %v491_v60 = vpop.f32.mrb[6].mxu0  ;;  %v4461_v15 = vpack.c.bf16 %v593_v13, %v590_v6 }
 0x118   : > { %v672_v62 = vmul.f32 0.17677669, %v491_v60  ;;  %v493_v63 = vpop.f32.mrb[7].mxu0 }
 0x119   : > { %v4447_v0 = vpack.c.bf16 %v493_v63, %v489_v59  ;;  %3312 = vmatprep.subr.bf16.mxu1 %v4461_v15 }
 0x11a   : > { %v4449_v1 = vpack.c.bf16 %v672_v62, %v671_v61  ;;  %3313 = vmatpush3.bf16.msra.mxu1 %v4461_v15 }
 0x11b   : > { %1138 = vrot.lane.b32.xlu1 %v4447_v0, %s4222_s6  ;;  %3585 = vmatprep.subr.msk.bf16.mxu0 %vm709_vm0, %v4447_v0  ;;  %v738_v2 = vsel %vm709_vm0, %v4447_v0, 0  ;;  %v3270_v19 = vpop.f32.mrb[4].mxu1 }
 0x11c   : > { %3283 = vmatpush3.bf16.xpose.msra.mxu0 %v738_v2  ;;  %3314 = vmatprep.subr.bf16.mxu1 %v4457_v12  ;;  %v606_v21 = vpop.f32.mrb[5].mxu1 }
 0x11d   : > { %v497_v3 = vpop.f32.mrb[8].mxu0  ;;  %v3271_v23 = vpop.f32.mrb[6].mxu1 }
 0x11e   : > { %v499_v5 = vpop.f32.mrb[9].mxu0  ;;  %v673_v9 = vmul.f32 0.17677669, %v497_v3  ;;  %v4472_v27 = vpack.c.bf16 %v3271_v23, %v3270_v19  ;;  %v609_v28 = vpop.f32.mrb[7].mxu1  ;;  %3315 = vmatpush3.bf16.msra.mxu1 %v4457_v12 }
 0x11f   : > { %v501_v7 = vpop.f32.mrb[10].mxu0  ;;  %v4477_v30 = vpack.c.bf16 %v609_v28, %v606_v21  ;;  %v4563_v28 = vld [vmem:[%s5898_s4] sm:$0xff] }
 0x120   : > { %v674_v10 = vmul.f32 0.17677669, %v501_v7  ;;  %v503_v11 = vpop.f32.mrb[11].mxu0  ;;  %5942 = vst [vmem:[#allocation6_spill] sm:$0xff] %v4472_v27 }
 0x121   : > { %v4459_v14 = vpack.c.bf16 %v503_v11, %v499_v5  ;;  %3316 = vmatprep.subr.bf16.mxu1 %v4477_v30 }
 0x122   : > { %v4463_v16 = vpack.c.bf16 %v674_v10, %v673_v9  ;;  %3317 = vmatpush3.bf16.msra.mxu1 %v4477_v30 }
 0x123   : > { %5941 = vst [vmem:[#allocation5_spill] sm:$0xff] %v4459_v14  ;;  %3586 = vmatprep.subr.msk.bf16.mxu0 %vm709_vm0, %v4459_v14  ;;  %v741_v17 = vsel %vm709_vm0, %v4459_v14, 0  ;;  %v3274_v34 = vpop.f32.mrb[8].mxu1  ;;  %3318 = vmatprep.subr.bf16.mxu1 %v4472_v27 }
 0x124   : > { %3285 = vmatpush3.bf16.xpose.msra.mxu0 %v741_v17  ;;  %v622_v36 = vpop.f32.mrb[9].mxu1 }
 0x125   : > { %v507_v18 = vpop.f32.mrb[12].mxu0  ;;  %v3275_v38 = vpop.f32.mrb[10].mxu1 }
 0x126   : > { %v509_v20 = vpop.f32.mrb[13].mxu0  ;;  %v675_v24 = vmul.f32 0.17677669, %v507_v18  ;;  %v4488_v42 = vpack.c.bf16 %v3275_v38, %v3274_v34  ;;  %v625_v43 = vpop.f32.mrb[11].mxu1  ;;  %3319 = vmatpush3.bf16.msra.mxu1 %v4472_v27 }
 0x127   : > { %v511_v22 = vpop.f32.mrb[14].mxu0  ;;  %v4493_v45 = vpack.c.bf16 %v625_v43, %v622_v36  ;;  %v4574_v36 = vld [vmem:[%s5898_s4 + $0x18] sm:$0xff]  ;;  %v4592_v43 = vld [vmem:[%s5898_s4 + $0x30] sm:$0xff] }
 0x128   : > { %v676_v25 = vmul.f32 0.17677669, %v511_v22  ;;  %v513_v26 = vpop.f32.mrb[15].mxu0  ;;  %5944 = vst [vmem:[#allocation8_spill] sm:$0xff] %v4488_v42 }
 0x129   : > { %v4475_v29 = vpack.c.bf16 %v513_v26, %v509_v20  ;;  %3320 = vmatprep.subr.bf16.mxu1 %v4493_v45  ;;  %v4558_v26 = vld [vmem:[%s5898_s4 + $0x10] sm:$0xff] }
 0x12a   : > { %v4479_v31 = vpack.c.bf16 %v676_v25, %v675_v24  ;;  %3321 = vmatpush3.bf16.msra.mxu1 %v4493_v45 }
 0x12b   : > { %5943 = vst [vmem:[#allocation7_spill] sm:$0xff] %v4475_v29  ;;  %3587 = vmatprep.subr.msk.bf16.mxu0 %vm709_vm0, %v4475_v29  ;;  %v744_v32 = vsel %vm709_vm0, %v4475_v29, 0  ;;  %v3278_v49 = vpop.f32.mrb[12].mxu1  ;;  %3322 = vmatprep.subr.bf16.mxu1 %v4488_v42 }
 0x12c   : > { %3287 = vmatpush3.bf16.xpose.msra.mxu0 %v744_v32  ;;  %v638_v51 = vpop.f32.mrb[13].mxu1 }
 0x12d   : > { %v517_v33 = vpop.f32.mrb[16].mxu0  ;;  %v3279_v53 = vpop.f32.mrb[14].mxu1 }
 0x12e   : > { %v519_v35 = vpop.f32.mrb[17].mxu0  ;;  %v677_v39 = vmul.f32 0.17677669, %v517_v33  ;;  %v4504_v59 = vpack.c.bf16 %v3279_v53, %v3278_v49  ;;  %v641_v60 = vpop.f32.mrb[15].mxu1  ;;  %3323 = vmatpush3.bf16.msra.mxu1 %v4488_v42 }
 0x12f   : > { %v521_v37 = vpop.f32.mrb[18].mxu0  ;;  %v4509_v62 = vpack.c.bf16 %v641_v60, %v638_v51  ;;  %v4625_v60 = vld [vmem:[%s5898_s4 + $0x50] sm:$0xff] }
 0x130   : > { %v678_v40 = vmul.f32 0.17677669, %v521_v37  ;;  %v523_v41 = vpop.f32.mrb[19].mxu0  ;;  %5946 = vst [vmem:[#allocation10_spill] sm:$0xff] %v4504_v59  ;;  %5950 = vst [vmem:[#allocation14_spill] sm:$0xff] %v4625_v60 }
 0x131   : > { %v4491_v44 = vpack.c.bf16 %v523_v41, %v519_v35  ;;  %5948 = vst [vmem:[#allocation12_spill] sm:$0xff] %v4509_v62  ;;  %3324 = vmatprep.subr.bf16.mxu1 %v4509_v62 }
 0x132   : > { %v4495_v46 = vpack.c.bf16 %v678_v40, %v677_v39  ;;  %3325 = vmatpush3.bf16.msra.mxu1 %v4509_v62  ;;  %v4580_v39 = vld [vmem:[%s5898_s4 + $0x8] sm:$0xff] }
 0x133   : > { %5945 = vst [vmem:[#allocation9_spill] sm:$0xff] %v4491_v44  ;;  %3588 = vmatprep.subr.msk.bf16.mxu0 %vm709_vm0, %v4491_v44  ;;  %v747_v47 = vsel %vm709_vm0, %v4491_v44, 0  ;;  %3326 = vmatprep.subr.bf16.mxu1 %v4504_v59 }
 0x134   : > { %3289 = vmatpush3.bf16.xpose.msra.mxu0 %v747_v47 }
 0x135   : > { %v527_v48 = vpop.f32.mrb[20].mxu0 }
 0x136   : > { %v529_v50 = vpop.f32.mrb[21].mxu0  ;;  %v679_v54 = vmul.f32 0.17677669, %v527_v48  ;;  %3327 = vmatpush3.bf16.msra.mxu1 %v4504_v59  ;;  %v4599_v48 = vld [vmem:[%s5898_s4 + $0x38] sm:$0xff] }
 0x137   : > { %v531_v52 = vpop.f32.mrb[22].mxu0 }
 0x138   : > { %v680_v57 = vmul.f32 0.17677669, %v531_v52  ;;  %v533_v58 = vpop.f32.mrb[23].mxu0  ;;  %v4607_v52 = vld [vmem:[%s5898_s4 + $0x20] sm:$0xff] }
 0x139   : > { %v4507_v61 = vpack.c.bf16 %v533_v58, %v529_v50  ;;  %5949 = vst [vmem:[#allocation13_spill] sm:$0xff] %v4607_v52 }
 0x13a   : > { %v4511_v63 = vpack.c.bf16 %v680_v57, %v679_v54  ;;  %v4615_v57 = vld [vmem:[%s5898_s4 + $0x28] sm:$0xff] }
 0x13b   : > { %5947 = vst [vmem:[#allocation11_spill] sm:$0xff] %v4507_v61  ;;  %3589 = vmatprep.subr.msk.bf16.mxu0 %vm709_vm0, %v4507_v61  ;;  %v750_v2 = vsel %vm709_vm0, %v4507_v61, 0 }
 0x13c   : > { %3291 = vmatpush3.bf16.xpose.msra.mxu0 %v750_v2 }
 0x13d   : > { %v537_v3 = vpop.f32.mrb[24].mxu0 }
 0x13e   : > { %v539_v4 = vpop.f32.mrb[25].mxu0  ;;  %v681_v6 = vmul.f32 0.17677669, %v537_v3 }
 0x13f   : > { %v541_v5 = vpop.f32.mrb[26].mxu0 }
 0x140   : > { %v682_v7 = vmul.f32 0.17677669, %v541_v5  ;;  %v543_v8 = vpop.f32.mrb[27].mxu0 }
 0x141   : > { %v4521_v9 = vpack.c.bf16 %v543_v8, %v539_v4  ;;  %v4634_v4 = vld [vmem:[%s5898_s4 + $0x58] sm:$0xff]  ;;  %v4643_v8 = vld [vmem:[%s5898_s4 + $0x40] sm:$0xff] }
 0x142   : > { %v4523_v10 = vpack.c.bf16 %v682_v7, %v681_v6  ;;  %5951 = vst [vmem:[#allocation15_spill] sm:$0xff] %v4634_v4  ;;  %5952 = vst [vmem:[#allocation16_spill] sm:$0xff] %v4643_v8 }
 0x143   : > { %3590 = vmatprep.subr.msk.bf16.mxu0 %vm709_vm0, %v4521_v9  ;;  %v753_v11 = vsel %vm709_vm0, %v4521_v9, 0 }
 0x144   : > { %3293 = vmatpush3.bf16.xpose.msra.mxu0 %v753_v11 }
 0x145   : > { %v547_v13 = vpop.f32.mrb[28].mxu0 }
 0x146   : > { %v549_v17 = vpop.f32.mrb[29].mxu0  ;;  %v683_v19 = vmul.f32 0.17677669, %v547_v13 }
 0x147   : > { %v551_v18 = vpop.f32.mrb[30].mxu0 }
 0x148   : > { %v684_v20 = vmul.f32 0.17677669, %v551_v18  ;;  %v553_v21 = vpop.f32.mrb[31].mxu0 }
 0x149   : > { %v4529_v22 = vpack.c.bf16 %v553_v21, %v549_v17  ;;  %v4651_v17 = vld [vmem:[%s5898_s4 + $0x48] sm:$0xff] }
 0x14a   : > { %v4531_v23 = vpack.c.bf16 %v684_v20, %v683_v19  ;;  %5953 = vst [vmem:[#allocation17_spill] sm:$0xff] %v4651_v17  ;;  %v4661_v19 = vld [vmem:[%s5898_s4 + $0x70] sm:$0xff] }
 0x14b   : > { %3591 = vmatprep.subr.msk.bf16.mxu0 %vm709_vm0, %v4529_v22  ;;  %v756_v24 = vsel %vm709_vm0, %v4529_v22, 0  ;;  %5954 = vst [vmem:[#allocation18_spill] sm:$0xff] %v4661_v19 }
 0x14c   : > { %3295 = vmatpush3.bf16.xpose.msra.mxu0 %v756_v24 }
 0x153   : > { %3297 = vmatmul.mubr.msk.bf16.vlgmr.msra.gmra.mrb[32].mxu0 %vm709_vm0, %v4449_v1 }
 0x154   : > { %3300 = vmatprep.mubr.msk.bf16.mxu0 %vm709_vm0, %v4463_v16 }
 0x15b   : > { %3301 = vmatmul.mubr.msk.bf16.gmra.mrb[36].mxu0 %vm709_vm0, %v4479_v31 }
 0x15c   : > { %3304 = vmatprep.mubr.msk.bf16.mxu0 %vm709_vm0, %v4495_v46 }
 0x163   : > { %3305 = vmatmul.mubr.msk.bf16.gmra.mrb[40].mxu0 %vm709_vm0, %v4511_v63 }
 0x164   : > { %3308 = vmatprep.mubr.msk.bf16.mxu0 %vm709_vm0, %v4523_v10 }
 0x16b   : > { %3309 = vmatmul.mubr.msk.bf16.gmra.mrb[44].mxu0 %vm709_vm0, %v4531_v23 }
 0x185   : > { %v4551_v25 = vpop.permute.xlu0 %1136 }
 0x186   : > { %3592 = vmatprep.subr.msk.bf16.mxu1 %vm709_vm0, %v4551_v25 }
 0x226   : > { %v3298_v32 = vpop.f32.mrb[32].mxu0 }
 0x227   : > { %v4566_v33 = vadd.f32 %v3298_v32, %v4558_v26  ;;  %v792_v34 = vpop.f32.mrb[33].mxu0 }
 0x228   : > { %v4569_v35 = vadd.f32 %v792_v34, %v4563_v28  ;;  %v3299_v37 = vpop.f32.mrb[34].mxu0 }
 0x229   : > { %859 = vmax.xlane.f32.xlu1 %v4566_v33  ;;  %v795_v38 = vpop.f32.mrb[35].mxu0  ;;  %v4584_v40 = vadd.f32 %v3299_v37, %v4574_v36  ;;  %v4674_v37 = vld [vmem:[%s5898_s4 + $0x60] sm:$0xff] }
 0x22a   : > { %855 = vmax.xlane.f32.xlu0 %v4569_v35  ;;  %v4587_v41 = vadd.f32 %v795_v38, %v4580_v39  ;;  %5955 = vst [vmem:[#allocation19_spill] sm:$0xff] %v4674_v37 }
 0x22d   : > { %861 = vmax.xlane.f32.xlu1 %v4584_v40 }
 0x22e   : > { %v3302_v47 = vpop.f32.mrb[36].mxu0  ;;  %857 = vmax.xlane.f32.xlu0 %v4587_v41 }
 0x22f   : > { %v4602_v49 = vadd.f32 %v3302_v47, %v4592_v43  ;;  %v808_v50 = vpop.f32.mrb[37].mxu0 }
 0x230   : > { %v3303_v51 = vpop.f32.mrb[38].mxu0  ;;  %v4620_v58 = vadd.f32 %v808_v50, %v4607_v52  ;;  %v4688_v50 = vld [vmem:[%s5898_s4 + $0x78] sm:$0xff] }
 0x231   : > { %v4610_v53 = vadd.f32 %v3303_v51, %v4599_v48  ;;  %v811_v54 = vpop.f32.mrb[39].mxu0  ;;  %5956 = vst [vmem:[#allocation20_spill] sm:$0xff] %v4688_v50 }
 0x232   : > { %867 = vmax.xlane.f32.xlu0 %v4602_v49  ;;  %v4628_v2 = vadd.f32 %v811_v54, %v4615_v57  ;;  %v4696_v54 = vld [vmem:[%s5898_s4 + $0x68] sm:$0xff] }
 0x233   : > { %869 = vmax.xlane.f32.xlu1 %v4610_v53  ;;  %5957 = vst [vmem:[#allocation21_spill] sm:$0xff] %v4696_v54 }
 0x236   : > { %v3306_v3 = vpop.f32.mrb[40].mxu0  ;;  %863 = vmax.xlane.f32.xlu0 %v4620_v58 }
 0x237   : > { %v4637_v5 = vadd.f32 %v3306_v3, %v4625_v60  ;;  %v824_v6 = vpop.f32.mrb[41].mxu0  ;;  %865 = vmax.xlane.f32.xlu1 %v4628_v2 }
 0x238   : > { %v3307_v7 = vpop.f32.mrb[42].mxu0  ;;  %v4656_v18 = vadd.f32 %v824_v6, %v4643_v8  ;;  %v4703_v6 = vpop.permute.xlu1 %1138 }
 0x239   : > { %v4646_v11 = vadd.f32 %v3307_v7, %v4634_v4  ;;  %v827_v13 = vpop.f32.mrb[43].mxu0 }
 0x23a   : > { %875 = vmax.xlane.f32.xlu0 %v4637_v5  ;;  %v4664_v20 = vadd.f32 %v827_v13, %v4651_v17 }
 0x23b   : > { %877 = vmax.xlane.f32.xlu1 %v4646_v11 }
 0x23e   : > { %v3310_v21 = vpop.f32.mrb[44].mxu0  ;;  %871 = vmax.xlane.f32.xlu0 %v4656_v18 }
 0x23f   : > { %v4668_v24 = vadd.f32 %v3310_v21, %v4661_v19  ;;  %v840_v32 = vpop.f32.mrb[45].mxu0  ;;  %873 = vmax.xlane.f32.xlu1 %v4664_v20 }
 0x240   : > { %v3311_v34 = vpop.f32.mrb[46].mxu0  ;;  %v4678_v47 = vadd.f32 %v840_v32, %v4674_v37 }
 0x241   : > { %v843_v38 = vpop.f32.mrb[47].mxu0  ;;  %v4691_v51 = vadd.f32 %v3311_v34, %v4688_v50 }
 0x242   : > { %883 = vmax.xlane.f32.xlu0 %v4668_v24  ;;  %v4700_v3 = vadd.f32 %v843_v38, %v4696_v54 }
 0x246   : > { %879 = vmax.xlane.f32.xlu0 %v4678_v47 }
 0x250   : > { %1142 = vrot.lane.b32.xlu1 %v4475_v29, %s4222_s6 }
 0x25c   : > { %1140 = vrot.lane.b32.xlu0 %v4459_v14, %s4222_s6 }
 0x274   : > { %885 = vmax.xlane.f32.xlu1 %v4691_v51 }
 0x278   : > { %881 = vmax.xlane.f32.xlu1 %v4700_v3 }
 0x2b6   : > { %v860_v7 = vpop.xlane.xlu1 %859 }
 0x2b7   : > { %v889_v13 = vsub.f32 %v4566_v33, %v860_v7  ;;  %v856_v21 = vpop.xlane.xlu0 %855 }
 0x2b8   : > { %v887_v32 = vsub.f32 %v4569_v35, %v856_v21 }
 0x2b9   : > { %v907_v34 = vmul.f32 1.442695, %v889_v13 }
 0x2ba   : > { %v903_v50 = vmul.f32 1.442695, %v887_v32  ;;  %v862_v14 = vpop.xlane.xlu1 %861 }
 0x2bb   : > { %3853 = vpow2.f32 %v907_v34  ;;  %v890_v29 = vsub.f32 %v4584_v40, %v862_v14  ;;  %v858_v37 = vpop.xlane.xlu0 %857 }
 0x2bc   : > { %v888_v38 = vsub.f32 %v4587_v41, %v858_v37  ;;  %3855 = vpow2.f32 %v903_v50 }
 0x2bd   : > { %v909_v54 = vmul.f32 1.442695, %v890_v29 }
 0x2be   : > { %v905_v19 = vmul.f32 1.442695, %v888_v38 }
 0x2bf   : > { %3857 = vpow2.f32 %v909_v54  ;;  %v868_v29 = vpop.xlane.xlu0 %867 }
 0x2c0   : > { %3859 = vpow2.f32 %v905_v19  ;;  %v870_v19 = vpop.xlane.xlu1 %869  ;;  %v893_v54 = vsub.f32 %v4602_v49, %v868_v29 }
 0x2c1   : > { %v894_v38 = vsub.f32 %v4610_v53, %v870_v19 }
 0x2c2   : > { %v915_v21 = vmul.f32 1.442695, %v893_v54 }
 0x2c3   : > { %v864_v40 = vpop.xlane.xlu0 %863  ;;  %v917_v4 = vmul.f32 1.442695, %v894_v38 }
 0x2c4   : > { %v866_v50 = vpop.xlane.xlu1 %865  ;;  %v891_v7 = vsub.f32 %v4620_v58, %v864_v40  ;;  %3861 = vpow2.f32 %v915_v21 }
 0x2c5   : > { %v4709_v8 = vpop.eup %3853  ;;  %v892_v32 = vsub.f32 %v4628_v2, %v866_v50 }
 0x2c6   : > { %939 = vadd.xlane.f32.xlu0 %v4709_v8  ;;  %v4712_v33 = vpop.eup %3855  ;;  %v911_v17 = vmul.f32 1.442695, %v891_v7 }
 0x2c7   : > { %v876_v41 = vpop.xlane.xlu0 %875 }
 0x2c8   : > { %v878_v34 = vpop.xlane.xlu1 %877  ;;  %3863 = vpow2.f32 %v911_v17  ;;  %v897_v52 = vsub.f32 %v4637_v5, %v876_v41 }
 0x2c9   : > { %v4714_v35 = vpop.eup %3857  ;;  %v898_v5 = vsub.f32 %v4646_v11, %v878_v34 }
 0x2ca   : > { %941 = vadd.xlane.f32.xlu1 %v4714_v35  ;;  %935 = vadd.xlane.f32.xlu0 %v4712_v33  ;;  %v4718_v14 = vpop.eup %3859  ;;  %v923_v2 = vmul.f32 1.442695, %v897_v52 }
 0x2cb   : > { %v872_v37 = vpop.xlane.xlu0 %871 }
 0x2cc   : > { %v874_v49 = vpop.xlane.xlu1 %873  ;;  %v895_v40 = vsub.f32 %v4656_v18, %v872_v37 }
 0x2cd   : > { %v896_v18 = vsub.f32 %v4664_v20, %v874_v49 }
 0x2ce   : > { %937 = vadd.xlane.f32.xlu1 %v4718_v14  ;;  %v4735_v50 = vpop.eup %3861  ;;  %v919_v17 = vmul.f32 1.442695, %v895_v40 }
 0x2cf   : > { %v884_v13 = vpop.xlane.xlu0 %883 }
 0x2d0   : > { %v4733_v19 = vpop.permute.xlu1 %1142 }
 0x2d3   : > { %v880_v60 = vpop.xlane.xlu0 %879 }
 0x2d4   : > { %v899_v29 = vsub.f32 %v4678_v47, %v880_v60 }
 0x2d6   : > { %v927_v53 = vmul.f32 1.442695, %v899_v29 }
 0x2d7   : > { %v1141_v38 = vpop.permute.xlu0 %1140 }
 0x2df   : > { %1146 = vrot.lane.b32.xlu1 %v4507_v61, %s4222_s6  ;;  %v913_v61 = vmul.f32 1.442695, %v892_v32 }
 0x2e0   : > { %1144 = vrot.lane.b32.xlu0 %v4491_v44, %s4222_s6  ;;  %v901_v44 = vsub.f32 %v4668_v24, %v884_v13 }
 0x2e1   : > { %3865 = vpow2.f32 %v913_v61 }
 0x2e2   : > { %v931_v58 = vmul.f32 1.442695, %v901_v44  ;;  %3867 = vpow2.f32 %v917_v4  ;;  %v4739_v44 = vpop.eup %3863  ;;  %v925_v4 = vmul.f32 1.442695, %v898_v5 }
 0x2e4   : > { %3869 = vpow2.f32 %v931_v58 }
 0x2e5   : > { %3871 = vpow2.f32 %v923_v2 }
 0x2e6   : > { %3873 = vpow2.f32 %v927_v53 }
 0x2e7   : > { %3875 = vpow2.f32 %v919_v17 }
 0x2eb   : > { %v4741_v60 = vpop.eup %3865 }
 0x2ec   : > { %v4747_v47 = vpop.eup %3867 }
 0x2ee   : > { %v4749_v41 = vpop.eup %3869 }
 0x2ef   : > { %v4754_v54 = vpop.eup %3871 }
 0x2f0   : > { %v4756_v7 = vpop.eup %3873 }
 0x2f1   : > { %v4760_v13 = vpop.eup %3875 }
 0x2ff   : > { %947 = vadd.xlane.f32.xlu0 %v4735_v50 }
 0x301   : > { %v886_v61 = vpop.xlane.xlu1 %885 }
 0x302   : > { %v902_v52 = vsub.f32 %v4691_v51, %v886_v61  ;;  %v921_v51 = vmul.f32 1.442695, %v896_v18 }
 0x303   : > { %945 = vadd.xlane.f32.xlu0 %v4741_v60  ;;  %943 = vadd.xlane.f32.xlu1 %v4739_v44 }
 0x304   : > { %v933_v24 = vmul.f32 1.442695, %v902_v52 }
 0x305   : > { %v882_v11 = vpop.xlane.xlu1 %881 }
 0x306   : > { %3877 = vpow2.f32 %v933_v24  ;;  %v900_v37 = vsub.f32 %v4700_v3, %v882_v11 }
 0x307   : > { %949 = vadd.xlane.f32.xlu1 %v4747_v47  ;;  %963 = vadd.xlane.f32.xlu0 %v4749_v41  ;;  %3879 = vpow2.f32 %v925_v4 }
 0x308   : > { %3881 = vpow2.f32 %v921_v51  ;;  %v929_v20 = vmul.f32 1.442695, %v900_v37  ;;  %v1177_v51 = vsel %vm709_vm0, %v4551_v25, 0 }
 0x30a   : > { %3883 = vpow2.f32 %v929_v20 }
 0x30b   : > { %955 = vadd.xlane.f32.xlu1 %v4754_v54  ;;  %959 = vadd.xlane.f32.xlu0 %v4756_v7 }
 0x30f   : > { %951 = vadd.xlane.f32.xlu1 %v4760_v13 }
 0x310   : > { %v4763_v21 = vpop.eup %3877 }
 0x311   : > { %965 = vadd.xlane.f32.xlu0 %v4763_v21  ;;  %v4766_v3 = vpop.eup %3879 }
 0x312   : > { %v4769_v32 = vpop.eup %3881 }
 0x313   : > { %957 = vadd.xlane.f32.xlu1 %v4766_v3 }
 0x314   : > { %v4772_v34 = vpop.eup %3883 }
 0x317   : > { %953 = vadd.xlane.f32.xlu1 %v4769_v32 }
 0x31b   : > { %961 = vadd.xlane.f32.xlu1 %v4772_v34 }
 0x327   : > { %1148 = vrot.lane.b32.xlu0 %v4521_v9, %s4222_s6 }
 0x32b   : > { %1112 = vrot.lane.b32.xlu0 %v4437_v56, %s4222_s6 }
 0x32c   : > { %1150 = vrot.lane.b32.xlu1 %v4529_v22, %s4222_s6 }
 0x32f   : > { %1116 = vrot.lane.b32.xlu0 %v4463_v16, %s4222_s6 }
 0x330   : > { %1114 = vrot.lane.b32.xlu1 %v4449_v1, %s4222_s6 }
 0x333   : > { %1120 = vrot.lane.b32.xlu0 %v4495_v46, %s4222_s6 }
 0x334   : > { %1118 = vrot.lane.b32.xlu1 %v4479_v31, %s4222_s6 }
 0x337   : > { %1124 = vrot.lane.b32.xlu0 %v4523_v10, %s4222_s6 }
 0x338   : > { %1122 = vrot.lane.b32.xlu1 %v4511_v63, %s4222_s6 }
 0x33b   : > { %1457 = vrot.lane.b32.xlu0 %v4461_v15, %s4222_s6 }
 0x33c   : > { %1126 = vrot.lane.b32.xlu1 %v4531_v23, %s4222_s6 }
 0x33f   : > { %1461 = vrot.lane.b32.xlu0 %v4477_v30, %s4222_s6 }
 0x340   : > { %1459 = vrot.lane.b32.xlu1 %v4457_v12, %s4222_s6 }
 0x343   : > { %1465 = vrot.lane.b32.xlu0 %v4493_v45, %s4222_s6 }
 0x344   : > { %1463 = vrot.lane.b32.xlu1 %v4472_v27, %s4222_s6 }
 0x347   : > { %1469 = vrot.lane.b32.xlu0 %v4509_v62, %s4222_s6 }
 0x348   : > { %1467 = vrot.lane.b32.xlu1 %v4488_v42, %s4222_s6 }
 0x34b   : > { %1594 = vrot.lane.b32.xlu0 %v4435_v55, %s4223_s14 }
 0x34c   : > { %1471 = vrot.lane.b32.xlu1 %v4504_v59, %s4222_s6 }
 0x350   : > { %1596 = vrot.lane.b32.xlu1 %v4447_v0, %s4223_s14 }
 0x353   : > { %v940_v49 = vpop.xlane.xlu0 %939 }
 0x357   : > { %v942_v58 = vpop.xlane.xlu1 %941  ;;  %v936_v29 = vpop.xlane.xlu0 %935 }
 0x358   : > { %3885 = vrcp.f32 %v942_v58 }
 0x359   : > { %3887 = vrcp.f32 %v936_v29 }
 0x35a   : > { %3889 = vrcp.f32 %v940_v49 }
 0x35b   : > { %v938_v2 = vpop.xlane.xlu1 %937  ;;  %v1145_v25 = vpop.permute.xlu0 %1144 }
 0x35c   : > { %3891 = vrcp.f32 %v938_v2  ;;  %v1189_v37 = vsel %vm709_vm0, %v1145_v25, 0 }
 0x362   : > { %v3886_v40 = vpop.eup %3885 }
 0x363   : > { %v3888_v53 = vpop.eup %3887  ;;  %v986_v61 = vmul.f32 %v3886_v40, %v4714_v35  ;;  %v1180_v35 = vsel %vm709_vm0, %v4703_v6, 0 }
 0x364   : > { %v3890_v5 = vpop.eup %3889  ;;  %v983_v52 = vmul.f32 %v3888_v53, %v4712_v33  ;;  %v1183_v33 = vsel %vm709_vm0, %v1141_v38, 0 }
 0x365   : > { %v985_v18 = vmul.f32 %v3890_v5, %v4709_v8  ;;  %v1186_v8 = vsel %vm709_vm0, %v4733_v19, 0 }
 0x366   : > { %v3892_v17 = vpop.eup %3891 }
 0x367   : > { %v984_v4 = vmul.f32 %v3892_v17, %v4718_v14  ;;  %v1000_v11 = vpack.c.bf16 %v986_v61, %v985_v18  ;;  %v1147_v14 = vpop.permute.xlu1 %1146 }
 0x368   : > { %v1192_v58 = vsel %vm709_vm0, %v1147_v14, 0 }
 0x369   : > { %v999_v24 = vpack.c.bf16 %v984_v4, %v983_v52 }
 0x36b   : > { %3328 = vmatprep.mubr.bf16.mxu1 %v999_v24 }
 0x36c   : > { %3329 = vmatmul.mubr.bf16.vlgmr.msra.gmra.mrb[16].mxu1 %v1000_v11 }
 0x36d   : > { %3345 = vmatpush3.bf16.xpose.msra.mxu1 %v1177_v51 }
 0x36e   : > { %3593 = vmatprep.subr.msk.bf16.mxu1 %vm709_vm0, %v4703_v6 }
 0x375   : > { %3347 = vmatpush3.bf16.xpose.msra.mxu1 %v1180_v35 }
 0x376   : > { %3594 = vmatprep.subr.msk.bf16.mxu1 %vm709_vm0, %v1141_v38 }
 0x37d   : > { %3349 = vmatpush3.bf16.xpose.msra.mxu1 %v1183_v33 }
 0x37e   : > { %3595 = vmatprep.subr.msk.bf16.mxu1 %vm709_vm0, %v4733_v19 }
 0x385   : > { %3351 = vmatpush3.bf16.xpose.msra.mxu1 %v1186_v8 }
 0x386   : > { %3596 = vmatprep.subr.msk.bf16.mxu1 %vm709_vm0, %v1145_v25 }
 0x38c   : > { %v948_v6 = vpop.xlane.xlu0 %947 }
 0x38d   : > { %3353 = vmatpush3.bf16.xpose.msra.mxu1 %v1189_v37 }
 0x38e   : > { %3597 = vmatprep.subr.msk.bf16.mxu1 %vm709_vm0, %v1147_v14 }
 0x390   : > { %v944_v20 = vpop.xlane.xlu1 %943  ;;  %v946_v38 = vpop.xlane.xlu0 %945 }
 0x391   : > { %3893 = vrcp.f32 %v944_v20 }
 0x392   : > { %3895 = vrcp.f32 %v946_v38 }
 0x393   : > { %3897 = vrcp.f32 %v948_v6 }
 0x394   : > { %v950_v49 = vpop.xlane.xlu1 %949  ;;  %v964_v19 = vpop.xlane.xlu0 %963 }
 0x395   : > { %3899 = vrcp.f32 %v950_v49  ;;  %3355 = vmatpush3.bf16.xpose.msra.mxu1 %v1192_v58 }
 0x398   : > { %v956_v29 = vpop.xlane.xlu1 %955  ;;  %v960_v2 = vpop.xlane.xlu0 %959 }
 0x39b   : > { %v3894_v40 = vpop.eup %3893 }
 0x39c   : > { %v3896_v53 = vpop.eup %3895  ;;  %v952_v5 = vpop.xlane.xlu1 %951  ;;  %v987_v17 = vmul.f32 %v3894_v40, %v4739_v44 }
 0x39d   : > { %v3898_v61 = vpop.eup %3897  ;;  %v988_v52 = vmul.f32 %v3896_v53, %v4741_v60 }
 0x39e   : > { %v966_v4 = vpop.xlane.xlu0 %965  ;;  %v989_v51 = vmul.f32 %v3898_v61, %v4735_v50 }
 0x39f   : > { %v3900_v18 = vpop.eup %3899  ;;  %v1001_v24 = vpack.c.bf16 %v988_v52, %v987_v17 }
 0x3a0   : > { %v958_v11 = vpop.xlane.xlu1 %957  ;;  %v990_v35 = vmul.f32 %v3900_v18, %v4747_v47 }
 0x3a1   : > { %3332 = vmatprep.mubr.bf16.mxu1 %v1001_v24  ;;  %3901 = vrcp.f32 %v958_v11 }
 0x3a2   : > { %v1149_v33 = vpop.permute.xlu0 %1148  ;;  %v1002_v8 = vpack.c.bf16 %v990_v35, %v989_v51  ;;  %3903 = vrcp.f32 %v952_v5 }
 0x3a3   : > { %3598 = vmatprep.subr.msk.bf16.mxu1 %vm709_vm0, %v1149_v33  ;;  %v1195_v44 = vsel %vm709_vm0, %v1149_v33, 0  ;;  %3905 = vrcp.f32 %v956_v29 }
 0x3a4   : > { %v954_v25 = vpop.xlane.xlu1 %953  ;;  %3333 = vmatmul.mubr.bf16.gmra.mrb[20].mxu1 %v1002_v8 }
 0x3a5   : > { %3907 = vrcp.f32 %v954_v25  ;;  %3357 = vmatpush3.bf16.xpose.msra.mxu1 %v1195_v44 }
 0x3a6   : > { %v1113_v60 = vpop.permute.xlu0 %1112  ;;  %3909 = vrcp.f32 %v960_v2 }
 0x3a8   : > { %v962_v14 = vpop.xlane.xlu1 %961 }
 0x3a9   : > { %3911 = vrcp.f32 %v962_v14 }
 0x3aa   : > { %3913 = vrcp.f32 %v966_v4  ;;  %v1117_v50 = vpop.permute.xlu0 %1116 }
 0x3ab   : > { %v3902_v47 = vpop.eup %3901  ;;  %3915 = vrcp.f32 %v964_v19 }
 0x3ac   : > { %v1151_v37 = vpop.permute.xlu1 %1150  ;;  %v3904_v6 = vpop.eup %3903  ;;  %v994_v29 = vmul.f32 %v3902_v47, %v4766_v3 }
 0x3ad   : > { %3599 = vmatprep.subr.msk.bf16.mxu1 %vm709_vm0, %v1151_v37  ;;  %v1198_v20 = vsel %vm709_vm0, %v1151_v37, 0  ;;  %v3906_v38 = vpop.eup %3905  ;;  %v991_v2 = vmul.f32 %v3904_v6, %v4760_v13 }
 0x3ae   : > { %3359 = vmatpush3.bf16.xpose.msra.mxu1 %v1198_v20  ;;  %v1121_v49 = vpop.permute.xlu0 %1120  ;;  %v993_v19 = vmul.f32 %v3906_v38, %v4754_v54 }
 0x3af   : > { %v3908_v58 = vpop.eup %3907 }
 0x3b0   : > { %v1115_v40 = vpop.permute.xlu1 %1114  ;;  %v992_v53 = vmul.f32 %v3908_v58, %v4769_v32  ;;  %v3910_v5 = vpop.eup %3909  ;;  %v1004_v4 = vpack.c.bf16 %v994_v29, %v993_v19 }
 0x3b1   : > { %v995_v11 = vmul.f32 %v3910_v5, %v4756_v7 }
 0x3b2   : > { %v1125_v17 = vpop.permute.xlu0 %1124  ;;  %v1003_v61 = vpack.c.bf16 %v992_v53, %v991_v2 }
 0x3b3   : > { %v3912_v52 = vpop.eup %3911 }
 0x3b4   : > { %v3914_v18 = vpop.eup %3913  ;;  %v1119_v24 = vpop.permute.xlu1 %1118  ;;  %3336 = vmatprep.mubr.bf16.mxu1 %v1003_v61  ;;  %v996_v51 = vmul.f32 %v3912_v52, %v4772_v34 }
 0x3b5   : > { %3337 = vmatmul.mubr.bf16.gmra.mrb[24].mxu1 %v1004_v4  ;;  %v3916_v3 = vpop.eup %3915  ;;  %v998_v32 = vmul.f32 %v3914_v18, %v4763_v21 }
 0x3b6   : > { %v1458_v35 = vpop.permute.xlu0 %1457  ;;  %v1005_v13 = vpack.c.bf16 %v996_v51, %v995_v11  ;;  %v997_v54 = vmul.f32 %v3916_v3, %v4749_v41 }
 0x3b7   : > { %3376 = vmatprep.subr.bf16.mxu0 %v1458_v35 }
 0x3b8   : > { %v1123_v33 = vpop.permute.xlu1 %1122  ;;  %3340 = vmatprep.mubr.bf16.mxu1 %v1005_v13  ;;  %3377 = vmatpush3.bf16.msra.mxu0 %v1458_v35  ;;  %v1006_v8 = vpack.c.bf16 %v998_v32, %v997_v54 }
 0x3ba   : > { %v1462_v34 = vpop.permute.xlu0 %1461 }
 0x3bc   : > { %v1127_v44 = vpop.permute.xlu1 %1126 }
 0x3bd   : > { %3341 = vmatmul.mubr.bf16.gmra.mrb[28].mxu1 %v1006_v8 }
 0x3be   : > { %3360 = vmatprep.mubr.msk.bf16.mxu1 %vm709_vm0, %v1113_v60  ;;  %v1466_v21 = vpop.permute.xlu0 %1465 }
 0x3c0   : > { %v1460_v7 = vpop.permute.xlu1 %1459 }
 0x3c1   : > { %3378 = vmatprep.subr.bf16.mxu0 %v1460_v7 }
 0x3c2   : > { %3379 = vmatpush3.bf16.msra.mxu0 %v1460_v7  ;;  %v1470_v60 = vpop.permute.xlu0 %1469  ;;  %v5974_v7 = vld [vmem:[#allocation13_spill] sm:$0xff] }
 0x3c3   : > { %3380 = vmatprep.subr.bf16.mxu0 %v1462_v34 }
 0x3c4   : > { %v1464_v25 = vpop.permute.xlu1 %1463 }
 0x3c5   : > { %3361 = vmatmul.mubr.msk.bf16.vlgmr.msra.gmra.mrb[32].mxu1 %vm709_vm0, %v1115_v40 }
 0x3c6   : > { %3364 = vmatprep.mubr.msk.bf16.mxu1 %vm709_vm0, %v1117_v50  ;;  %3381 = vmatpush3.bf16.msra.mxu0 %v1462_v34  ;;  %v4858_v50 = vpop.permute.xlu0 %1594 }
 0x3c7   : > { %3382 = vmatprep.subr.bf16.mxu0 %v1464_v25 }
 0x3c8   : > { %v1468_v41 = vpop.permute.xlu1 %1467 }
 0x3ca   : > { %3383 = vmatpush3.bf16.msra.mxu0 %v1464_v25  ;;  %v5975_v25 = vld [vmem:[#allocation15_spill] sm:$0xff] }
 0x3cb   : > { %3384 = vmatprep.subr.bf16.mxu0 %v1466_v21 }
 0x3cc   : > { %v1472_v14 = vpop.permute.xlu1 %1471 }
 0x3cd   : > { %3365 = vmatmul.mubr.msk.bf16.gmra.mrb[36].mxu1 %vm709_vm0, %v1119_v24 }
 0x3ce   : > { %3368 = vmatprep.mubr.msk.bf16.mxu1 %vm709_vm0, %v1121_v49  ;;  %3385 = vmatpush3.bf16.msra.mxu0 %v1466_v21 }
 0x3cf   : > { %3386 = vmatprep.subr.bf16.mxu0 %v1468_v41 }
 0x3d2   : > { %3387 = vmatpush3.bf16.msra.mxu0 %v1468_v41  ;;  %v5976_v41 = vld [vmem:[#allocation14_spill] sm:$0xff] }
 0x3d3   : > { %3388 = vmatprep.subr.bf16.mxu0 %v1470_v60 }
 0x3d5   : > { %3369 = vmatmul.mubr.msk.bf16.gmra.mrb[40].mxu1 %vm709_vm0, %v1123_v33 }
 0x3d6   : > { %3372 = vmatprep.mubr.msk.bf16.mxu1 %vm709_vm0, %v1125_v17  ;;  %3389 = vmatpush3.bf16.msra.mxu0 %v1470_v60 }
 0x3d7   : > { %3390 = vmatprep.subr.bf16.mxu0 %v1472_v14 }
 0x3da   : > { %3391 = vmatpush3.bf16.msra.mxu0 %v1472_v14 }
 0x3db   : > { %3600 = vmatprep.subr.msk.bf16.mxu0 %vm709_vm0, %v4858_v50 }
 0x3dd   : > { %3373 = vmatmul.mubr.msk.bf16.gmra.mrb[44].mxu1 %vm709_vm0, %v1127_v44 }
 0x43f   : > { %v4863_v47 = vpop.f32.mrb[16].mxu1 }
 0x440   : > { %5958 = vst [vmem:[#allocation22_spill] sm:$0xff] %v4863_v47  ;;  %v4865_v37 = vpop.f32.mrb[17].mxu1 }
 0x441   : > { %5959 = vst [vmem:[#allocation23_spill] sm:$0xff] %v4865_v37  ;;  %v4867_v6 = vpop.f32.mrb[18].mxu1 }
 0x442   : > { %5960 = vst [vmem:[#allocation24_spill] sm:$0xff] %v4867_v6  ;;  %v4869_v20 = vpop.f32.mrb[19].mxu1  ;;  %v5247_v6 = vld [vmem:[%s5898_s4 + $0x48] sm:$0xff] }
 0x443   : > { %5961 = vst [vmem:[#allocation25_spill] sm:$0xff] %v4869_v20 }
 0x477   : > { %v4871_v38 = vpop.f32.mrb[20].mxu1 }
 0x478   : > { %5962 = vst [vmem:[#allocation26_spill] sm:$0xff] %v4871_v38  ;;  %v4873_v49 = vpop.f32.mrb[21].mxu1 }
 0x479   : > { %5963 = vst [vmem:[#allocation27_spill] sm:$0xff] %v4873_v49  ;;  %v4875_v58 = vpop.f32.mrb[22].mxu1 }
 0x47a   : > { %5964 = vst [vmem:[#allocation28_spill] sm:$0xff] %v4875_v58  ;;  %v4877_v29 = vpop.f32.mrb[23].mxu1 }
 0x47b   : > { %5965 = vst [vmem:[#allocation29_spill] sm:$0xff] %v4877_v29 }
 0x488   : > { %v4879_v40 = vpop.f32.mrb[24].mxu1 }
 0x489   : > { %5966 = vst [vmem:[#allocation30_spill] sm:$0xff] %v4879_v40  ;;  %v4881_v2 = vpop.f32.mrb[25].mxu1 }
 0x48a   : > { %5967 = vst [vmem:[#allocation31_spill] sm:$0xff] %v4881_v2  ;;  %v4883_v53 = vpop.f32.mrb[26].mxu1 }
 0x48b   : > { %5968 = vst [vmem:[#allocation32_spill] sm:$0xff] %v4883_v53  ;;  %v4885_v5 = vpop.f32.mrb[27].mxu1 }
 0x48c   : > { %5969 = vst [vmem:[#allocation33_spill] sm:$0xff] %v4885_v5 }
 0x490   : > { %v4887_v19 = vpop.f32.mrb[28].mxu1 }
 0x491   : > { %5970 = vst [vmem:[#allocation34_spill] sm:$0xff] %v4887_v19  ;;  %v4889_v17 = vpop.f32.mrb[29].mxu1 }
 0x492   : > { %5971 = vst [vmem:[#allocation35_spill] sm:$0xff] %v4889_v17  ;;  %v4891_v61 = vpop.f32.mrb[30].mxu1 }
 0x493   : > { %5972 = vst [vmem:[#allocation36_spill] sm:$0xff] %v4891_v61  ;;  %v4893_v52 = vpop.f32.mrb[31].mxu1 }
 0x494   : > { %5973 = vst [vmem:[#allocation37_spill] sm:$0xff] %v4893_v52 }
 0x498   : > { %v3362_v4 = vpop.f32.mrb[32].mxu1 }
 0x499   : > { %v1243_v18 = vadd.f32 %v3362_v4, %v4558_v26  ;;  %v1234_v24 = vpop.f32.mrb[33].mxu1 }
 0x49a   : > { %v3363_v11 = vpop.f32.mrb[34].mxu1  ;;  %v1235_v35 = vadd.f32 %v1234_v24, %v4563_v28  ;;  %v5978_v24 = vld [vmem:[#allocation16_spill] sm:$0xff] }
 0x49b   : > { %1301 = vmax.xlane.f32.xlu0 %v1243_v18  ;;  %v1237_v51 = vpop.f32.mrb[35].mxu1  ;;  %v1246_v32 = vadd.f32 %v3363_v11, %v4574_v36 }
 0x49c   : > { %v1238_v3 = vadd.f32 %v1237_v51, %v4580_v39 }
 0x49e   : > { %1299 = vmax.xlane.f32.xlu1 %v1238_v3 }
 0x49f   : > { %1297 = vmax.xlane.f32.xlu0 %v1235_v35 }
 0x4a0   : > { %v3366_v13 = vpop.f32.mrb[36].mxu1 }
 0x4a1   : > { %v1250_v33 = vpop.f32.mrb[37].mxu1  ;;  %v4903_v44 = vadd.f32 %v3366_v13, %v4592_v43 }
 0x4a2   : > { %v3367_v54 = vpop.f32.mrb[38].mxu1  ;;  %v4911_v36 = vadd.f32 %v1250_v33, %v5974_v7 }
 0x4a3   : > { %v4900_v8 = vadd.f32 %v3367_v54, %v4599_v48  ;;  %1303 = vmax.xlane.f32.xlu0 %v1246_v32  ;;  %v1253_v26 = vpop.f32.mrb[39].mxu1  ;;  %v5979_v54 = vld [vmem:[#allocation18_spill] sm:$0xff] }
 0x4a4   : > { %v4907_v39 = vadd.f32 %v1253_v26, %v4615_v57  ;;  %v5977_v57 = vld [vmem:[#allocation17_spill] sm:$0xff] }
 0x4a5   : > { %1311 = vmax.xlane.f32.xlu1 %v4900_v8 }
 0x4a7   : > { %1309 = vmax.xlane.f32.xlu0 %v4903_v44 }
 0x4a8   : > { %v3370_v28 = vpop.f32.mrb[40].mxu1 }
 0x4a9   : > { %1307 = vmax.xlane.f32.xlu1 %v4907_v39  ;;  %v1266_v48 = vpop.f32.mrb[41].mxu1  ;;  %v4919_v60 = vadd.f32 %v3370_v28, %v5976_v41  ;;  %v5980_v28 = vld [vmem:[#allocation19_spill] sm:$0xff]  ;;  %v5984_v41 = vld [vmem:[#allocation21_spill] sm:$0xff] }
 0x4aa   : > { %v3371_v34 = vpop.f32.mrb[42].mxu1  ;;  %v4927_v11 = vadd.f32 %v1266_v48, %v5978_v24  ;;  %v5981_v48 = vld [vmem:[#allocation7_spill] sm:$0xff] }
 0x4ab   : > { %v4915_v21 = vadd.f32 %v3371_v34, %v5975_v25  ;;  %1305 = vmax.xlane.f32.xlu0 %v4911_v36  ;;  %v1269_v43 = vpop.f32.mrb[43].mxu1  ;;  %v5982_v34 = vld [vmem:[#allocation5_spill] sm:$0xff]  ;;  %v5983_v25 = vld [vmem:[#allocation20_spill] sm:$0xff] }
 0x4ac   : > { %v4923_v14 = vadd.f32 %v1269_v43, %v5977_v57 }
 0x4ad   : > { %1319 = vmax.xlane.f32.xlu1 %v4915_v21 }
 0x4af   : > { %1317 = vmax.xlane.f32.xlu0 %v4919_v60 }
 0x4b0   : > { %v3374_v4 = vpop.f32.mrb[44].mxu1 }
 0x4b1   : > { %1315 = vmax.xlane.f32.xlu1 %v4923_v14  ;;  %v1282_v51 = vpop.f32.mrb[45].mxu1  ;;  %v4932_v26 = vadd.f32 %v3374_v4, %v5979_v54  ;;  %v4951_v4 = vpop.permute.xlu1 %1596 }
 0x4b2   : > { %v3375_v13 = vpop.f32.mrb[46].mxu1  ;;  %v4936_v7 = vadd.f32 %v1282_v51, %v5980_v28 }
 0x4b3   : > { %1313 = vmax.xlane.f32.xlu0 %v4927_v11  ;;  %v1285_v33 = vpop.f32.mrb[47].mxu1  ;;  %v4944_v43 = vadd.f32 %v3375_v13, %v5983_v25 }
 0x4b4   : > { %v4948_v57 = vadd.f32 %v1285_v33, %v5984_v41 }
 0x4b7   : > { %1325 = vmax.xlane.f32.xlu0 %v4932_v26 }
 0x4bb   : > { %1321 = vmax.xlane.f32.xlu0 %v4936_v7 }
 0x4c2   : > { %1600 = vrot.lane.b32.xlu1 %v5981_v48, %s4223_s14 }
 0x4d1   : > { %1598 = vrot.lane.b32.xlu0 %v5982_v34, %s4223_s14 }
 0x4e6   : > { %1327 = vmax.xlane.f32.xlu1 %v4944_v43 }
 0x4ea   : > { %1323 = vmax.xlane.f32.xlu1 %v4948_v57 }
 0x528   : > { %v1302_v24 = vpop.xlane.xlu0 %1301 }
 0x529   : > { %v1331_v51 = vsub.f32 %v1243_v18, %v1302_v24 }
 0x52b   : > { %v1349_v54 = vmul.f32 1.442695, %v1331_v51  ;;  %v1300_v28 = vpop.xlane.xlu1 %1299 }
 0x52c   : > { %v1330_v19 = vsub.f32 %v1238_v3, %v1300_v28  ;;  %v1298_v61 = vpop.xlane.xlu0 %1297 }
 0x52d   : > { %3917 = vpow2.f32 %v1349_v54  ;;  %v1329_v17 = vsub.f32 %v1235_v35, %v1298_v61  ;;  %v5986_v61 = vld [vmem:[#allocation11_spill] sm:$0xff] }
 0x52e   : > { %v1347_v52 = vmul.f32 1.442695, %v1330_v19 }
 0x52f   : > { %v1345_v13 = vmul.f32 1.442695, %v1329_v17 }
 0x530   : > { %3919 = vpow2.f32 %v1347_v52  ;;  %v1304_v25 = vpop.xlane.xlu0 %1303 }
 0x531   : > { %3921 = vpow2.f32 %v1345_v13  ;;  %v1332_v2 = vsub.f32 %v1246_v32, %v1304_v25 }
 0x532   : > { %v1312_v3 = vpop.xlane.xlu1 %1311 }
 0x533   : > { %v1351_v33 = vmul.f32 1.442695, %v1332_v2  ;;  %v5985_v2 = vld [vmem:[#allocation9_spill] sm:$0xff]  ;;  %v1336_v38 = vsub.f32 %v4900_v8, %v1312_v3 }
 0x534   : > { %v1310_v17 = vpop.xlane.xlu0 %1309 }
 0x535   : > { %3923 = vpow2.f32 %v1351_v33  ;;  %v1335_v32 = vsub.f32 %v4903_v44, %v1310_v17  ;;  %v1359_v29 = vmul.f32 1.442695, %v1336_v38 }
 0x536   : > { %v1308_v24 = vpop.xlane.xlu1 %1307 }
 0x537   : > { %v4953_v41 = vpop.eup %3917  ;;  %v1357_v54 = vmul.f32 1.442695, %v1335_v32  ;;  %v1334_v13 = vsub.f32 %v4907_v39, %v1308_v24 }
 0x538   : > { %1381 = vadd.xlane.f32.xlu1 %v4953_v41  ;;  %v1306_v52 = vpop.xlane.xlu0 %1305 }
 0x539   : > { %v1333_v28 = vsub.f32 %v4911_v36, %v1306_v52  ;;  %3925 = vpow2.f32 %v1357_v54  ;;  %v1355_v40 = vmul.f32 1.442695, %v1334_v13 }
 0x53a   : > { %v4956_v5 = vpop.eup %3919  ;;  %v1320_v25 = vpop.xlane.xlu1 %1319 }
 0x53b   : > { %v4958_v18 = vpop.eup %3921  ;;  %1379 = vadd.xlane.f32.xlu0 %v4956_v5  ;;  %v1353_v58 = vmul.f32 1.442695, %v1333_v28  ;;  %v1340_v8 = vsub.f32 %v4915_v21, %v1320_v25 }
 0x53c   : > { %1377 = vadd.xlane.f32.xlu1 %v4958_v18  ;;  %v1318_v35 = vpop.xlane.xlu0 %1317 }
 0x53d   : > { %v1339_v49 = vsub.f32 %v4919_v60, %v1318_v35  ;;  %3927 = vpow2.f32 %v1353_v58 }
 0x53e   : > { %v1316_v53 = vpop.xlane.xlu1 %1315  ;;  %3929 = vpow2.f32 %v1355_v40 }
 0x53f   : > { %v4962_v19 = vpop.eup %3923  ;;  %v1365_v17 = vmul.f32 1.442695, %v1339_v49  ;;  %3931 = vpow2.f32 %v1359_v29  ;;  %v1367_v49 = vmul.f32 1.442695, %v1340_v8  ;;  %v1338_v40 = vsub.f32 %v4923_v14, %v1316_v53 }
 0x540   : > { %1383 = vadd.xlane.f32.xlu1 %v4962_v19  ;;  %v1314_v51 = vpop.xlane.xlu0 %1313 }
 0x541   : > { %v1337_v36 = vsub.f32 %v4927_v11, %v1314_v51  ;;  %3933 = vpow2.f32 %v1365_v17 }
 0x542   : > { %v4980_v38 = vpop.permute.xlu1 %1600 }
 0x543   : > { %v1361_v3 = vmul.f32 1.442695, %v1337_v36  ;;  %v4978_v24 = vpop.eup %3925 }
 0x544   : > { %v1326_v33 = vpop.xlane.xlu0 %1325 }
 0x545   : > { %v1343_v44 = vsub.f32 %v4932_v26, %v1326_v33  ;;  %v1363_v26 = vmul.f32 1.442695, %v1338_v40 }
 0x547   : > { %v1373_v39 = vmul.f32 1.442695, %v1343_v44  ;;  %v4984_v29 = vpop.eup %3927 }
 0x548   : > { %v1322_v52 = vpop.xlane.xlu0 %1321  ;;  %v4986_v11 = vpop.eup %3929 }
 0x549   : > { %v1341_v32 = vsub.f32 %v4936_v7, %v1322_v52  ;;  %3935 = vpow2.f32 %v1373_v39  ;;  %v4991_v35 = vpop.eup %3931 }
 0x54a   : > { %3937 = vpow2.f32 %v1361_v3 }
 0x54b   : > { %v1369_v58 = vmul.f32 1.442695, %v1341_v32  ;;  %v4993_v53 = vpop.eup %3933 }
 0x54c   : > { %v1599_v17 = vpop.permute.xlu0 %1598 }
 0x54d   : > { %3939 = vpow2.f32 %v1369_v58 }
 0x54e   : > { %3941 = vpow2.f32 %v1367_v49 }
 0x551   : > { %1602 = vrot.lane.b32.xlu0 %v5985_v2, %s4223_s14  ;;  %1604 = vrot.lane.b32.xlu1 %v5986_v61, %s4223_s14 }
 0x553   : > { %v4998_v54 = vpop.eup %3935 }
 0x554   : > { %v5000_v28 = vpop.eup %3937 }
 0x557   : > { %v5004_v13 = vpop.eup %3939 }
 0x558   : > { %v5006_v25 = vpop.eup %3941 }
 0x570   : > { %1389 = vadd.xlane.f32.xlu0 %v4978_v24 }
 0x573   : > { %v1328_v60 = vpop.xlane.xlu1 %1327 }
 0x574   : > { %v1344_v21 = vsub.f32 %v4944_v43, %v1328_v60  ;;  %1385 = vadd.xlane.f32.xlu0 %v4984_v29 }
 0x575   : > { %1387 = vadd.xlane.f32.xlu1 %v4986_v11 }
 0x576   : > { %v1375_v7 = vmul.f32 1.442695, %v1344_v21 }
 0x577   : > { %v1324_v51 = vpop.xlane.xlu1 %1323 }
 0x578   : > { %3943 = vpow2.f32 %v1375_v7  ;;  %v1342_v14 = vsub.f32 %v4948_v57, %v1324_v51  ;;  %1391 = vadd.xlane.f32.xlu0 %v4991_v35  ;;  %v1635_v7 = vsel %vm709_vm0, %v4858_v50, 0 }
 0x579   : > { %1397 = vadd.xlane.f32.xlu1 %v4993_v53  ;;  %3945 = vpow2.f32 %v1363_v26 }
 0x57a   : > { %v1371_v43 = vmul.f32 1.442695, %v1342_v14 }
 0x57c   : > { %1405 = vadd.xlane.f32.xlu0 %v4998_v54  ;;  %3947 = vpow2.f32 %v1371_v43 }
 0x57d   : > { %1393 = vadd.xlane.f32.xlu1 %v5000_v28 }
 0x580   : > { %1401 = vadd.xlane.f32.xlu0 %v5004_v13 }
 0x581   : > { %1399 = vadd.xlane.f32.xlu1 %v5006_v25 }
 0x582   : > { %v5010_v57 = vpop.eup %3943 }
 0x583   : > { %v5012_v33 = vpop.eup %3945 }
 0x584   : > { %1407 = vadd.xlane.f32.xlu0 %v5010_v57 }
 0x585   : > { %1395 = vadd.xlane.f32.xlu1 %v5012_v33 }
 0x586   : > { %v5016_v44 = vpop.eup %3947 }
 0x589   : > { %1403 = vadd.xlane.f32.xlu1 %v5016_v44 }
 0x59a   : > { %1608 = vrot.lane.b32.xlu1 %v4529_v22, %s4223_s14  ;;  %1606 = vrot.lane.b32.xlu0 %v4521_v9, %s4223_s14 }
 0x59e   : > { %1580 = vrot.lane.b32.xlu1 %v4449_v1, %s4223_s14  ;;  %1578 = vrot.lane.b32.xlu0 %v4437_v56, %s4223_s14 }
 0x5a2   : > { %1584 = vrot.lane.b32.xlu1 %v4479_v31, %s4223_s14  ;;  %1582 = vrot.lane.b32.xlu0 %v4463_v16, %s4223_s14 }
 0x5a6   : > { %1588 = vrot.lane.b32.xlu1 %v4511_v63, %s4223_s14  ;;  %1586 = vrot.lane.b32.xlu0 %v4495_v46, %s4223_s14 }
 0x5aa   : > { %1592 = vrot.lane.b32.xlu1 %v4531_v23, %s4223_s14  ;;  %1590 = vrot.lane.b32.xlu0 %v4523_v10, %s4223_s14 }
 0x5ae   : > { %1909 = vrot.lane.b32.xlu1 %v4457_v12, %s4223_s14  ;;  %1907 = vrot.lane.b32.xlu0 %v4461_v15, %s4223_s14 }
 0x5b2   : > { %1913 = vrot.lane.b32.xlu1 %v4472_v27, %s4223_s14  ;;  %1911 = vrot.lane.b32.xlu0 %v4477_v30, %s4223_s14 }
 0x5b6   : > { %1917 = vrot.lane.b32.xlu1 %v4488_v42, %s4223_s14  ;;  %1915 = vrot.lane.b32.xlu0 %v4493_v45, %s4223_s14 }
 0x5ba   : > { %1921 = vrot.lane.b32.xlu1 %v4504_v59, %s4223_s14  ;;  %1919 = vrot.lane.b32.xlu0 %v4509_v62, %s4223_s14 }
 0x5be   : > { %2046 = vrot.lane.b32.xlu1 %v4447_v0, %s4224_s15  ;;  %2044 = vrot.lane.b32.xlu0 %v4435_v55, %s4224_s15 }
 0x5c5   : > { %v1382_v36 = vpop.xlane.xlu1 %1381 }
 0x5c8   : > { %v1380_v52 = vpop.xlane.xlu0 %1379 }
 0x5c9   : > { %3949 = vrcp.f32 %v1380_v52  ;;  %v1378_v39 = vpop.xlane.xlu1 %1377 }
 0x5ca   : > { %3951 = vrcp.f32 %v1378_v39 }
 0x5cb   : > { %3953 = vrcp.f32 %v1382_v36 }
 0x5cc   : > { %v1603_v50 = vpop.permute.xlu0 %1602 }
 0x5cd   : > { %v1384_v32 = vpop.xlane.xlu1 %1383 }
 0x5ce   : > { %3955 = vrcp.f32 %v1384_v32 }
 0x5d3   : > { %v3950_v8 = vpop.eup %3949 }
 0x5d4   : > { %v3952_v3 = vpop.eup %3951  ;;  %v1426_v58 = vmul.f32 %v3950_v8, %v4956_v5  ;;  %v1638_v5 = vsel %vm709_vm0, %v4951_v4, 0 }
 0x5d5   : > { %v1425_v49 = vmul.f32 %v3952_v3, %v4958_v18  ;;  %v3954_v40 = vpop.eup %3953  ;;  %v1644_v18 = vsel %vm709_vm0, %v4980_v38, 0 }
 0x5d6   : > { %v1427_v55 = vmul.f32 %v3954_v40, %v4953_v41  ;;  %v1641_v41 = vsel %vm709_vm0, %v1599_v17, 0 }
 0x5d7   : > { %v1441_v0 = vpack.c.bf16 %v1426_v58, %v1425_v49 }
 0x5d8   : > { %v3956_v60 = vpop.eup %3955 }
 0x5d9   : > { %v1428_v21 = vmul.f32 %v3956_v60, %v4962_v19  ;;  %3392 = vmatprep.mubr.bf16.mxu0 %v1441_v0  ;;  %v1647_v19 = vsel %vm709_vm0, %v1603_v50, 0 }
 0x5db   : > { %v1442_v26 = vpack.c.bf16 %v1428_v21, %v1427_v55 }
 0x5dd   : > { %3393 = vmatmul.mubr.bf16.vlgmr.msra.gmra.mrb[48].mxu0 %v1442_v26 }
 0x5de   : > { %3409 = vmatpush3.bf16.xpose.msra.mxu0 %v1635_v7 }
 0x5df   : > { %3601 = vmatprep.subr.msk.bf16.mxu0 %vm709_vm0, %v4951_v4  ;;  %v1605_v4 = vpop.permute.xlu1 %1604 }
 0x5e6   : > { %3411 = vmatpush3.bf16.xpose.msra.mxu0 %v1638_v5 }
 0x5e7   : > { %3602 = vmatprep.subr.msk.bf16.mxu0 %vm709_vm0, %v1599_v17  ;;  %v1650_v17 = vsel %vm709_vm0, %v1605_v4, 0 }
 0x5ee   : > { %3413 = vmatpush3.bf16.xpose.msra.mxu0 %v1641_v41 }
 0x5ef   : > { %3603 = vmatprep.subr.msk.bf16.mxu0 %vm709_vm0, %v4980_v38 }
 0x5f6   : > { %3415 = vmatpush3.bf16.xpose.msra.mxu0 %v1644_v18 }
 0x5f7   : > { %3604 = vmatprep.subr.msk.bf16.mxu0 %vm709_vm0, %v1603_v50 }
 0x5fd   : > { %v1390_v51 = vpop.xlane.xlu0 %1389 }
 0x5fe   : > { %3417 = vmatpush3.bf16.xpose.msra.mxu0 %v1647_v19 }
 0x5ff   : > { %3605 = vmatprep.subr.msk.bf16.mxu0 %vm709_vm0, %v1605_v4 }
 0x601   : > { %v1386_v14 = vpop.xlane.xlu0 %1385 }
 0x602   : > { %3957 = vrcp.f32 %v1386_v14  ;;  %v1388_v43 = vpop.xlane.xlu1 %1387 }
 0x603   : > { %3959 = vrcp.f32 %v1388_v43 }
 0x604   : > { %3961 = vrcp.f32 %v1390_v51 }
 0x605   : > { %v1392_v36 = vpop.xlane.xlu0 %1391 }
 0x606   : > { %3419 = vmatpush3.bf16.xpose.msra.mxu0 %v1650_v17  ;;  %3963 = vrcp.f32 %v1392_v36  ;;  %v1398_v38 = vpop.xlane.xlu1 %1397 }
 0x609   : > { %v1406_v52 = vpop.xlane.xlu0 %1405 }
 0x60a   : > { %v1394_v39 = vpop.xlane.xlu1 %1393 }
 0x60c   : > { %v3958_v32 = vpop.eup %3957 }
 0x60d   : > { %v3960_v8 = vpop.eup %3959  ;;  %v1402_v3 = vpop.xlane.xlu0 %1401  ;;  %v1429_v58 = vmul.f32 %v3958_v32, %v4984_v29 }
 0x60e   : > { %v3962_v49 = vpop.eup %3961  ;;  %v1400_v40 = vpop.xlane.xlu1 %1399  ;;  %v1430_v0 = vmul.f32 %v3960_v8, %v4986_v11 }
 0x60f   : > { %3965 = vrcp.f32 %v1400_v40  ;;  %v1431_v26 = vmul.f32 %v3962_v49, %v4978_v24 }
 0x610   : > { %v3964_v60 = vpop.eup %3963  ;;  %v1443_v55 = vpack.c.bf16 %v1430_v0, %v1429_v58  ;;  %3967 = vrcp.f32 %v1394_v39 }
 0x611   : > { %v1408_v21 = vpop.xlane.xlu0 %1407  ;;  %v1432_v7 = vmul.f32 %v3964_v60, %v4991_v35  ;;  %3969 = vrcp.f32 %v1398_v38 }
 0x612   : > { %v1396_v5 = vpop.xlane.xlu1 %1395  ;;  %3396 = vmatprep.mubr.bf16.mxu0 %v1443_v55 }
 0x613   : > { %3971 = vrcp.f32 %v1396_v5  ;;  %v1444_v41 = vpack.c.bf16 %v1432_v7, %v1431_v26 }
 0x614   : > { %3973 = vrcp.f32 %v1402_v3 }
 0x615   : > { %3397 = vmatmul.mubr.bf16.gmra.mrb[52].mxu0 %v1444_v41  ;;  %v1607_v29 = vpop.permute.xlu0 %1606 }
 0x616   : > { %v1404_v18 = vpop.xlane.xlu1 %1403  ;;  %3606 = vmatprep.subr.msk.bf16.mxu0 %vm709_vm0, %v1607_v29  ;;  %v1653_v11 = vsel %vm709_vm0, %v1607_v29, 0 }
 0x617   : > { %3975 = vrcp.f32 %v1404_v18  ;;  %3421 = vmatpush3.bf16.xpose.msra.mxu0 %v1653_v11 }
 0x618   : > { %3977 = vrcp.f32 %v1408_v21 }
 0x619   : > { %v1579_v50 = vpop.permute.xlu0 %1578  ;;  %v3966_v24 = vpop.eup %3965  ;;  %3979 = vrcp.f32 %v1406_v52 }
 0x61a   : > { %v1609_v35 = vpop.permute.xlu1 %1608  ;;  %v3968_v19 = vpop.eup %3967  ;;  %v1436_v43 = vmul.f32 %v3966_v24, %v5006_v25 }
 0x61b   : > { %3607 = vmatprep.subr.msk.bf16.mxu0 %vm709_vm0, %v1609_v35  ;;  %v3970_v51 = vpop.eup %3969  ;;  %v1656_v36 = vsel %vm709_vm0, %v1609_v35, 0  ;;  %v1433_v38 = vmul.f32 %v3968_v19, %v5000_v28 }
 0x61c   : > { %v1435_v52 = vmul.f32 %v3970_v51, %v4993_v53 }
 0x61d   : > { %v3972_v4 = vpop.eup %3971  ;;  %v1583_v14 = vpop.permute.xlu0 %1582 }
 0x61e   : > { %v1581_v17 = vpop.permute.xlu1 %1580  ;;  %v1434_v39 = vmul.f32 %v3972_v4, %v5012_v33  ;;  %v3974_v32 = vpop.eup %3973  ;;  %v1446_v49 = vpack.c.bf16 %v1436_v43, %v1435_v52 }
 0x61f   : > { %3423 = vmatpush3.bf16.xpose.msra.mxu0 %v1656_v36  ;;  %v1437_v25 = vmul.f32 %v3974_v32, %v5004_v13 }
 0x620   : > { %v1445_v8 = vpack.c.bf16 %v1434_v39, %v1433_v38 }
 0x621   : > { %v3976_v3 = vpop.eup %3975  ;;  %v1587_v58 = vpop.permute.xlu0 %1586 }
 0x622   : > { %v3978_v40 = vpop.eup %3977  ;;  %v1585_v0 = vpop.permute.xlu1 %1584  ;;  %3400 = vmatprep.mubr.bf16.mxu0 %v1445_v8  ;;  %v1438_v60 = vmul.f32 %v3976_v3, %v5016_v44 }
 0x623   : > { %3401 = vmatmul.mubr.bf16.gmra.mrb[56].mxu0 %v1446_v49  ;;  %v3980_v55 = vpop.eup %3979  ;;  %v1440_v33 = vmul.f32 %v3978_v40, %v5010_v57 }
 0x624   : > { %v1447_v28 = vpack.c.bf16 %v1438_v60, %v1437_v25  ;;  %v1439_v53 = vmul.f32 %v3980_v55, %v4998_v54  ;;  %v5211_v55 = vld [vmem:[%s5898_s4 + $0x28] sm:$0xff] }
 0x625   : > { %v1591_v21 = vpop.permute.xlu0 %1590 }
 0x626   : > { %v1589_v26 = vpop.permute.xlu1 %1588  ;;  %3404 = vmatprep.mubr.bf16.mxu0 %v1447_v28  ;;  %v1448_v5 = vpack.c.bf16 %v1440_v33, %v1439_v53 }
 0x629   : > { %v1908_v7 = vpop.permute.xlu0 %1907 }
 0x62a   : > { %v1593_v41 = vpop.permute.xlu1 %1592  ;;  %3440 = vmatprep.subr.bf16.mxu1 %v1908_v7 }
 0x62b   : > { %3405 = vmatmul.mubr.bf16.gmra.mrb[60].mxu0 %v1448_v5  ;;  %3441 = vmatpush3.bf16.msra.mxu1 %v1908_v7 }
 0x62c   : > { %3424 = vmatprep.mubr.msk.bf16.mxu0 %vm709_vm0, %v1579_v50 }
 0x62d   : > { %v1912_v44 = vpop.permute.xlu0 %1911 }
 0x62e   : > { %v1910_v13 = vpop.permute.xlu1 %1909 }
 0x62f   : > { %3442 = vmatprep.subr.bf16.mxu1 %v1910_v13 }
 0x630   : > { %3443 = vmatpush3.bf16.msra.mxu1 %v1910_v13  ;;  %v5167_v13 = vld [vmem:[%s5898_s4 + $0x8] sm:$0xff] }
 0x631   : > { %3444 = vmatprep.subr.bf16.mxu1 %v1912_v44  ;;  %v1916_v54 = vpop.permute.xlu0 %1915 }
 0x632   : > { %v1914_v57 = vpop.permute.xlu1 %1913 }
 0x633   : > { %3425 = vmatmul.mubr.msk.bf16.vlgmr.msra.gmra.mrb[64].mxu0 %vm709_vm0, %v1581_v17 }
 0x634   : > { %3428 = vmatprep.mubr.msk.bf16.mxu0 %vm709_vm0, %v1583_v14  ;;  %3445 = vmatpush3.bf16.msra.mxu1 %v1912_v44  ;;  %v5202_v14 = vld [vmem:[%s5898_s4 + $0x30] sm:$0xff] }
 0x635   : > { %3446 = vmatprep.subr.bf16.mxu1 %v1914_v57  ;;  %v1920_v18 = vpop.permute.xlu0 %1919 }
 0x636   : > { %v1918_v29 = vpop.permute.xlu1 %1917 }
 0x638   : > { %3447 = vmatpush3.bf16.msra.mxu1 %v1914_v57  ;;  %v5175_v57 = vld [vmem:[%s5898_s4] sm:$0xff] }
 0x639   : > { %3448 = vmatprep.subr.bf16.mxu1 %v1916_v54  ;;  %v5102_v50 = vpop.permute.xlu0 %2044 }
 0x63a   : > { %v1922_v11 = vpop.permute.xlu1 %1921 }
 0x63b   : > { %3429 = vmatmul.mubr.msk.bf16.gmra.mrb[68].mxu0 %vm709_vm0, %v1585_v0 }
 0x63c   : > { %3432 = vmatprep.mubr.msk.bf16.mxu0 %vm709_vm0, %v1587_v58  ;;  %3449 = vmatpush3.bf16.msra.mxu1 %v1916_v54  ;;  %v5220_v58 = vld [vmem:[%s5898_s4 + $0x20] sm:$0xff] }
 0x63d   : > { %3450 = vmatprep.subr.bf16.mxu1 %v1918_v29 }
 0x640   : > { %3451 = vmatpush3.bf16.msra.mxu1 %v1918_v29 }
 0x641   : > { %3452 = vmatprep.subr.bf16.mxu1 %v1920_v18 }
 0x643   : > { %3433 = vmatmul.mubr.msk.bf16.gmra.mrb[72].mxu0 %vm709_vm0, %v1589_v26  ;;  %v5158_v26 = vld [vmem:[%s5898_s4 + $0x10] sm:$0xff] }
 0x644   : > { %3436 = vmatprep.mubr.msk.bf16.mxu0 %vm709_vm0, %v1591_v21  ;;  %3453 = vmatpush3.bf16.msra.mxu1 %v1920_v18  ;;  %v5185_v18 = vld [vmem:[%s5898_s4 + $0x18] sm:$0xff] }
 0x645   : > { %3454 = vmatprep.subr.bf16.mxu1 %v1922_v11 }
 0x648   : > { %3455 = vmatpush3.bf16.msra.mxu1 %v1922_v11 }
 0x649   : > { %3608 = vmatprep.subr.msk.bf16.mxu1 %vm709_vm0, %v5102_v50 }
 0x64b   : > { %3437 = vmatmul.mubr.msk.bf16.gmra.mrb[76].mxu0 %vm709_vm0, %v1593_v41 }
 0x6b0   : > { %v5107_v24 = vpop.f32.mrb[48].mxu0 }
 0x6b1   : > { %5987 = vst [vmem:[#allocation13_spill] sm:$0xff] %v5107_v24  ;;  %v5109_v35 = vpop.f32.mrb[49].mxu0 }
 0x6b2   : > { %5988 = vst [vmem:[#allocation15_spill] sm:$0xff] %v5109_v35  ;;  %v5111_v19 = vpop.f32.mrb[50].mxu0 }
 0x6b3   : > { %5989 = vst [vmem:[#allocation14_spill] sm:$0xff] %v5111_v19  ;;  %v5115_v4 = vpop.f32.mrb[51].mxu0 }
 0x6b4   : > { %5990 = vst [vmem:[#allocation17_spill] sm:$0xff] %v5115_v4 }
 0x6e8   : > { %v5119_v43 = vpop.f32.mrb[52].mxu0 }
 0x6e9   : > { %5991 = vst [vmem:[#allocation16_spill] sm:$0xff] %v5119_v43  ;;  %v5121_v17 = vpop.f32.mrb[53].mxu0 }
 0x6ea   : > { %5992 = vst [vmem:[#allocation18_spill] sm:$0xff] %v5121_v17  ;;  %v5123_v36 = vpop.f32.mrb[54].mxu0 }
 0x6eb   : > { %5993 = vst [vmem:[#allocation19_spill] sm:$0xff] %v5123_v36  ;;  %v5127_v39 = vpop.f32.mrb[55].mxu0  ;;  %v5256_v36 = vld [vmem:[%s5898_s4 + $0x40] sm:$0xff] }
 0x6ec   : > { %5994 = vst [vmem:[#allocation7_spill] sm:$0xff] %v5127_v39 }
 0x6f6   : > { %v5131_v52 = vpop.f32.mrb[56].mxu0 }
 0x6f7   : > { %5995 = vst [vmem:[#allocation5_spill] sm:$0xff] %v5131_v52  ;;  %v5133_v8 = vpop.f32.mrb[57].mxu0 }
 0x6f8   : > { %5996 = vst [vmem:[#allocation20_spill] sm:$0xff] %v5133_v8  ;;  %v5135_v3 = vpop.f32.mrb[58].mxu0 }
 0x6f9   : > { %5997 = vst [vmem:[#allocation21_spill] sm:$0xff] %v5135_v3  ;;  %v5139_v49 = vpop.f32.mrb[59].mxu0 }
 0x6fa   : > { %5998 = vst [vmem:[#allocation9_spill] sm:$0xff] %v5139_v49 }
 0x6fe   : > { %v5143_v0 = vpop.f32.mrb[60].mxu0 }
 0x6ff   : > { %5999 = vst [vmem:[#allocation11_spill] sm:$0xff] %v5143_v0  ;;  %v5145_v25 = vpop.f32.mrb[61].mxu0 }
 0x700   : > { %6000 = vst [vmem:[#allocation38_spill] sm:$0xff] %v5145_v25  ;;  %v5147_v60 = vpop.f32.mrb[62].mxu0 }
 0x701   : > { %6001 = vst [vmem:[#allocation39_spill] sm:$0xff] %v5147_v60  ;;  %v5151_v28 = vpop.f32.mrb[63].mxu0 }
 0x702   : > { %6002 = vst [vmem:[#allocation40_spill] sm:$0xff] %v5151_v28 }
 0x706   : > { %v3426_v33 = vpop.f32.mrb[64].mxu0 }
 0x707   : > { %v5161_v53 = vadd.f32 %v5158_v26, %v3426_v33  ;;  %v1692_v7 = vpop.f32.mrb[65].mxu0 }
 0x708   : > { %v3427_v5 = vpop.f32.mrb[66].mxu0  ;;  %v5178_v54 = vadd.f32 %v5175_v57, %v1692_v7  ;;  %v5193_v7 = vld [vmem:[%s5898_s4 + $0x38] sm:$0xff] }
 0x709   : > { %1759 = vmax.xlane.f32.xlu0 %v5161_v53  ;;  %v1695_v41 = vpop.f32.mrb[67].mxu0  ;;  %v5188_v11 = vadd.f32 %v5185_v18, %v3427_v5 }
 0x70a   : > { %v5170_v44 = vadd.f32 %v5167_v13, %v1695_v41 }
 0x70c   : > { %1757 = vmax.xlane.f32.xlu1 %v5170_v44 }
 0x70d   : > { %1755 = vmax.xlane.f32.xlu0 %v5178_v54 }
 0x70e   : > { %v3430_v29 = vpop.f32.mrb[68].mxu0 }
 0x70f   : > { %v1708_v33 = vpop.f32.mrb[69].mxu0  ;;  %v5205_v5 = vadd.f32 %v5202_v14, %v3430_v29 }
 0x710   : > { %v3431_v41 = vpop.f32.mrb[70].mxu0  ;;  %v5223_v29 = vadd.f32 %v5220_v58, %v1708_v33  ;;  %v5238_v33 = vld [vmem:[%s5898_s4 + $0x50] sm:$0xff] }
 0x711   : > { %v5196_v38 = vadd.f32 %v5193_v7, %v3431_v41  ;;  %1761 = vmax.xlane.f32.xlu0 %v5188_v11  ;;  %v1711_v32 = vpop.f32.mrb[71].mxu0 }
 0x712   : > { %v5214_v41 = vadd.f32 %v5211_v55, %v1711_v32  ;;  %v5229_v32 = vld [vmem:[%s5898_s4 + $0x58] sm:$0xff] }
 0x713   : > { %1769 = vmax.xlane.f32.xlu1 %v5196_v38 }
 0x715   : > { %1767 = vmax.xlane.f32.xlu0 %v5205_v5 }
 0x716   : > { %v3434_v21 = vpop.f32.mrb[72].mxu0 }
 0x717   : > { %1765 = vmax.xlane.f32.xlu1 %v5214_v41  ;;  %v1724_v51 = vpop.f32.mrb[73].mxu0  ;;  %v5241_v47 = vadd.f32 %v5238_v33, %v3434_v21 }
 0x718   : > { %v3435_v40 = vpop.f32.mrb[74].mxu0  ;;  %v5259_v21 = vadd.f32 %v5256_v36, %v1724_v51  ;;  %v5275_v51 = vld [vmem:[%s5898_s4 + $0x60] sm:$0xff] }
 0x719   : > { %v5232_v37 = vadd.f32 %v5229_v32, %v3435_v40  ;;  %1763 = vmax.xlane.f32.xlu0 %v5223_v29  ;;  %v1727_v20 = vpop.f32.mrb[75].mxu0 }
 0x71a   : > { %v5250_v40 = vadd.f32 %v5247_v6, %v1727_v20  ;;  %v5266_v20 = vld [vmem:[%s5898_s4 + $0x70] sm:$0xff] }
 0x71b   : > { %1777 = vmax.xlane.f32.xlu1 %v5232_v37 }
 0x71d   : > { %1775 = vmax.xlane.f32.xlu0 %v5241_v47 }
 0x71e   : > { %v3438_v43 = vpop.f32.mrb[76].mxu0 }
 0x71f   : > { %1773 = vmax.xlane.f32.xlu1 %v5250_v40  ;;  %v1740_v17 = vpop.f32.mrb[77].mxu0  ;;  %v5269_v4 = vadd.f32 %v5266_v20, %v3438_v43  ;;  %v5288_v43 = vld [vmem:[%s5898_s4 + $0x78] sm:$0xff] }
 0x720   : > { %v3439_v39 = vpop.f32.mrb[78].mxu0  ;;  %v5278_v0 = vadd.f32 %v5275_v51, %v1740_v17  ;;  %6003 = vst [vmem:[#allocation41_spill] sm:$0xff] %v5288_v43  ;;  %v5297_v17 = vld [vmem:[%s5898_s4 + $0x68] sm:$0xff] }
 0x721   : > { %1771 = vmax.xlane.f32.xlu0 %v5259_v21  ;;  %v1743_v35 = vpop.f32.mrb[79].mxu0  ;;  %v5291_v60 = vadd.f32 %v5288_v43, %v3439_v39  ;;  %6004 = vst [vmem:[#allocation42_spill] sm:$0xff] %v5297_v17 }
 0x725   : > { %1783 = vmax.xlane.f32.xlu0 %v5269_v4 }
 0x729   : > { %1779 = vmax.xlane.f32.xlu0 %v5278_v0 }
 0x730   : > { %2050 = vrot.lane.b32.xlu1 %v5981_v48, %s4224_s15  ;;  %v5300_v48 = vadd.f32 %v5297_v17, %v1743_v35 }
 0x73f   : > { %2048 = vrot.lane.b32.xlu0 %v5982_v34, %s4224_s15  ;;  %v5303_v34 = vpop.permute.xlu1 %2046 }
 0x754   : > { %1785 = vmax.xlane.f32.xlu1 %v5291_v60 }
 0x758   : > { %1781 = vmax.xlane.f32.xlu1 %v5300_v48 }
 0x796   : > { %v1760_v25 = vpop.xlane.xlu0 %1759 }
 0x797   : > { %v1789_v28 = vsub.f32 %v5161_v53, %v1760_v25 }
 0x799   : > { %v1807_v52 = vmul.f32 1.442695, %v1789_v28  ;;  %v1758_v39 = vpop.xlane.xlu1 %1757 }
 0x79a   : > { %v1788_v3 = vsub.f32 %v5170_v44, %v1758_v39  ;;  %v1756_v24 = vpop.xlane.xlu0 %1755 }
 0x79b   : > { %3981 = vpow2.f32 %v1807_v52  ;;  %v1787_v19 = vsub.f32 %v5178_v54, %v1756_v24 }
 0x79c   : > { %v1805_v62 = vmul.f32 1.442695, %v1788_v3 }
 0x79d   : > { %v1803_v8 = vmul.f32 1.442695, %v1787_v19 }
 0x79e   : > { %3983 = vpow2.f32 %v1805_v62  ;;  %v1762_v35 = vpop.xlane.xlu0 %1761 }
 0x79f   : > { %3985 = vpow2.f32 %v1803_v8  ;;  %v1790_v49 = vsub.f32 %v5188_v11, %v1762_v35 }
 0x7a0   : > { %v1770_v19 = vpop.xlane.xlu1 %1769 }
 0x7a1   : > { %v1809_v59 = vmul.f32 1.442695, %v1790_v49  ;;  %v1794_v35 = vsub.f32 %v5196_v38, %v1770_v19 }
 0x7a2   : > { %v1768_v62 = vpop.xlane.xlu0 %1767 }
 0x7a3   : > { %3987 = vpow2.f32 %v1809_v59  ;;  %v1793_v8 = vsub.f32 %v5205_v5, %v1768_v62  ;;  %v1817_v43 = vmul.f32 1.442695, %v1794_v35 }
 0x7a4   : > { %v1766_v3 = vpop.xlane.xlu1 %1765 }
 0x7a5   : > { %v5309_v42 = vpop.eup %3981  ;;  %v1815_v53 = vmul.f32 1.442695, %v1793_v8  ;;  %v1792_v54 = vsub.f32 %v5214_v41, %v1766_v3 }
 0x7a6   : > { %1839 = vadd.xlane.f32.xlu1 %v5309_v42  ;;  %v1764_v59 = vpop.xlane.xlu0 %1763 }
 0x7a7   : > { %v1791_v44 = vsub.f32 %v5223_v29, %v1764_v59  ;;  %3989 = vpow2.f32 %v1815_v53  ;;  %v1813_v17 = vmul.f32 1.442695, %v1792_v54 }
 0x7a8   : > { %v5312_v25 = vpop.eup %3983  ;;  %v1778_v11 = vpop.xlane.xlu1 %1777 }
 0x7a9   : > { %v5314_v28 = vpop.eup %3985  ;;  %1837 = vadd.xlane.f32.xlu0 %v5312_v25  ;;  %v1798_v38 = vsub.f32 %v5232_v37, %v1778_v11 }
 0x7aa   : > { %1835 = vadd.xlane.f32.xlu1 %v5314_v28  ;;  %v1776_v52 = vpop.xlane.xlu0 %1775 }
 0x7ac   : > { %v1774_v27 = vpop.xlane.xlu1 %1773 }
 0x7ad   : > { %v5318_v24 = vpop.eup %3987 }
 0x7ae   : > { %1841 = vadd.xlane.f32.xlu1 %v5318_v24  ;;  %v1772_v49 = vpop.xlane.xlu0 %1771 }
 0x7af   : > { %v1795_v29 = vsub.f32 %v5259_v21, %v1772_v49  ;;  %v1796_v21 = vsub.f32 %v5250_v40, %v1774_v27 }
 0x7b1   : > { %v1819_v19 = vmul.f32 1.442695, %v1795_v29  ;;  %v5334_v3 = vpop.eup %3989  ;;  %v1821_v49 = vmul.f32 1.442695, %v1796_v21 }
 0x7b2   : > { %v1784_v39 = vpop.xlane.xlu0 %1783 }
 0x7b3   : > { %v1801_v5 = vsub.f32 %v5269_v4, %v1784_v39 }
 0x7b5   : > { %v1831_v41 = vmul.f32 1.442695, %v1801_v5 }
 0x7b6   : > { %v1780_v59 = vpop.xlane.xlu0 %1779 }
 0x7b7   : > { %v1799_v8 = vsub.f32 %v5278_v0, %v1780_v59  ;;  %v2085_v59 = vsel %vm709_vm0, %v5102_v50, 0 }
 0x7b9   : > { %v1827_v4 = vmul.f32 1.442695, %v1799_v8 }
 0x7bf   : > { %2052 = vrot.lane.b32.xlu0 %v5985_v2, %s4224_s15  ;;  %2054 = vrot.lane.b32.xlu1 %v5986_v61, %s4224_s15  ;;  %v1811_v2 = vmul.f32 1.442695, %v1791_v44  ;;  %v1797_v61 = vsub.f32 %v5241_v47, %v1776_v52  ;;  %v5336_v47 = vpop.permute.xlu1 %2050 }
 0x7c1   : > { %3991 = vpow2.f32 %v1811_v2  ;;  %v1823_v62 = vmul.f32 1.442695, %v1797_v61 }
 0x7c2   : > { %3993 = vpow2.f32 %v1813_v17  ;;  %v1825_v17 = vmul.f32 1.442695, %v1798_v38 }
 0x7c3   : > { %3995 = vpow2.f32 %v1817_v43 }
 0x7c4   : > { %3997 = vpow2.f32 %v1823_v62 }
 0x7c5   : > { %3999 = vpow2.f32 %v1831_v41 }
 0x7c6   : > { %4001 = vpow2.f32 %v1819_v19 }
 0x7c7   : > { %4003 = vpow2.f32 %v1827_v4 }
 0x7c8   : > { %4005 = vpow2.f32 %v1825_v17 }
 0x7cb   : > { %v5340_v43 = vpop.eup %3991 }
 0x7cc   : > { %v5342_v0 = vpop.eup %3993 }
 0x7cd   : > { %v5347_v44 = vpop.eup %3995 }
 0x7ce   : > { %v5349_v27 = vpop.eup %3997 }
 0x7cf   : > { %v5354_v11 = vpop.eup %3999 }
 0x7d0   : > { %v5356_v39 = vpop.eup %4001 }
 0x7d1   : > { %v5360_v35 = vpop.eup %4003 }
 0x7d2   : > { %v5362_v2 = vpop.eup %4005 }
 0x7de   : > { %1847 = vadd.xlane.f32.xlu0 %v5334_v3 }
 0x7e1   : > { %v1786_v52 = vpop.xlane.xlu1 %1785 }
 0x7e2   : > { %v1802_v37 = vsub.f32 %v5291_v60, %v1786_v52  ;;  %1843 = vadd.xlane.f32.xlu0 %v5340_v43 }
 0x7e3   : > { %1845 = vadd.xlane.f32.xlu1 %v5342_v0 }
 0x7e4   : > { %v1833_v53 = vmul.f32 1.442695, %v1802_v37 }
 0x7e5   : > { %v1782_v54 = vpop.xlane.xlu1 %1781 }
 0x7e6   : > { %4007 = vpow2.f32 %v1833_v53  ;;  %v1800_v40 = vsub.f32 %v5300_v48, %v1782_v54  ;;  %1849 = vadd.xlane.f32.xlu0 %v5347_v44 }
 0x7e7   : > { %1855 = vadd.xlane.f32.xlu1 %v5349_v27  ;;  %4009 = vpow2.f32 %v1821_v49 }
 0x7e8   : > { %v1829_v60 = vmul.f32 1.442695, %v1800_v40 }
 0x7ea   : > { %1863 = vadd.xlane.f32.xlu0 %v5354_v11  ;;  %4011 = vpow2.f32 %v1829_v60 }
 0x7eb   : > { %1851 = vadd.xlane.f32.xlu1 %v5356_v39 }
 0x7ee   : > { %1859 = vadd.xlane.f32.xlu0 %v5360_v35 }
 0x7ef   : > { %1857 = vadd.xlane.f32.xlu1 %v5362_v2 }
 0x7f0   : > { %v5366_v48 = vpop.eup %4007 }
 0x7f1   : > { %v5368_v61 = vpop.eup %4009 }
 0x7f2   : > { %1865 = vadd.xlane.f32.xlu0 %v5366_v48 }
 0x7f3   : > { %1853 = vadd.xlane.f32.xlu1 %v5368_v61 }
 0x7f4   : > { %v5372_v5 = vpop.eup %4011 }
 0x7f7   : > { %1861 = vadd.xlane.f32.xlu1 %v5372_v5 }
 0x808   : > { %2058 = vrot.lane.b32.xlu1 %v4529_v22, %s4224_s15  ;;  %2056 = vrot.lane.b32.xlu0 %v4521_v9, %s4224_s15 }
 0x80c   : > { %2030 = vrot.lane.b32.xlu1 %v4449_v1, %s4224_s15  ;;  %2028 = vrot.lane.b32.xlu0 %v4437_v56, %s4224_s15  ;;  %v2049_v56 = vpop.permute.xlu0 %2048 }
 0x810   : > { %2034 = vrot.lane.b32.xlu1 %v4479_v31, %s4224_s15  ;;  %2032 = vrot.lane.b32.xlu0 %v4463_v16, %s4224_s15 }
 0x814   : > { %2038 = vrot.lane.b32.xlu1 %v4511_v63, %s4224_s15  ;;  %2036 = vrot.lane.b32.xlu0 %v4495_v46, %s4224_s15 }
 0x818   : > { %2042 = vrot.lane.b32.xlu1 %v4531_v23, %s4224_s15  ;;  %2040 = vrot.lane.b32.xlu0 %v4523_v10, %s4224_s15 }
 0x81c   : > { %2359 = vrot.lane.b32.xlu1 %v4457_v12, %s4224_s15  ;;  %2357 = vrot.lane.b32.xlu0 %v4461_v15, %s4224_s15 }
 0x820   : > { %2361 = vrot.lane.b32.xlu0 %v4477_v30, %s4224_s15 }
 0x833   : > { %v1840_v1 = vpop.xlane.xlu1 %1839 }
 0x836   : > { %v1838_v16 = vpop.xlane.xlu0 %1837 }
 0x837   : > { %4013 = vrcp.f32 %v1838_v16  ;;  %v1836_v31 = vpop.xlane.xlu1 %1835 }
 0x838   : > { %4015 = vrcp.f32 %v1836_v31 }
 0x839   : > { %4017 = vrcp.f32 %v1840_v1 }
 0x83a   : > { %v2053_v50 = vpop.permute.xlu0 %2052 }
 0x83b   : > { %v1842_v46 = vpop.xlane.xlu1 %1841 }
 0x83c   : > { %4019 = vrcp.f32 %v1842_v46 }
 0x841   : > { %v4014_v63 = vpop.eup %4013 }
 0x842   : > { %v4016_v9 = vpop.eup %4015  ;;  %v1884_v10 = vmul.f32 %v4014_v63, %v5312_v25  ;;  %v2088_v25 = vsel %vm709_vm0, %v5303_v34, 0 }
 0x843   : > { %v1883_v12 = vmul.f32 %v4016_v9, %v5314_v28  ;;  %v4018_v22 = vpop.eup %4017  ;;  %v2094_v28 = vsel %vm709_vm0, %v5336_v47, 0 }
 0x844   : > { %v1885_v30 = vmul.f32 %v4018_v22, %v5309_v42  ;;  %v2091_v42 = vsel %vm709_vm0, %v2049_v56, 0 }
 0x845   : > { %v1899_v15 = vpack.c.bf16 %v1884_v10, %v1883_v12 }
 0x846   : > { %v4020_v23 = vpop.eup %4019 }
 0x847   : > { %v1886_v62 = vmul.f32 %v4020_v23, %v5318_v24  ;;  %3456 = vmatprep.mubr.bf16.mxu1 %v1899_v15  ;;  %v2097_v24 = vsel %vm709_vm0, %v2053_v50, 0 }
 0x849   : > { %v1900_v29 = vpack.c.bf16 %v1886_v62, %v1885_v30 }
 0x84b   : > { %3457 = vmatmul.mubr.bf16.vlgmr.msra.gmra.mrb[48].mxu1 %v1900_v29 }
 0x84c   : > { %3473 = vmatpush3.bf16.xpose.msra.mxu1 %v2085_v59 }
 0x84d   : > { %3609 = vmatprep.subr.msk.bf16.mxu1 %vm709_vm0, %v5303_v34  ;;  %v2055_v34 = vpop.permute.xlu1 %2054 }
 0x84e   : > { %v2100_v19 = vsel %vm709_vm0, %v2055_v34, 0 }
 0x854   : > { %3475 = vmatpush3.bf16.xpose.msra.mxu1 %v2088_v25 }
 0x855   : > { %3610 = vmatprep.subr.msk.bf16.mxu1 %vm709_vm0, %v2049_v56 }
 0x85c   : > { %3477 = vmatpush3.bf16.xpose.msra.mxu1 %v2091_v42 }
 0x85d   : > { %3611 = vmatprep.subr.msk.bf16.mxu1 %vm709_vm0, %v5336_v47 }
 0x864   : > { %3479 = vmatpush3.bf16.xpose.msra.mxu1 %v2094_v28 }
 0x865   : > { %3612 = vmatprep.subr.msk.bf16.mxu1 %vm709_vm0, %v2053_v50 }
 0x86b   : > { %v1848_v41 = vpop.xlane.xlu0 %1847 }
 0x86c   : > { %3481 = vmatpush3.bf16.xpose.msra.mxu1 %v2097_v24 }
 0x86d   : > { %3613 = vmatprep.subr.msk.bf16.mxu1 %vm709_vm0, %v2055_v34 }
 0x86f   : > { %v1844_v8 = vpop.xlane.xlu0 %1843 }
 0x870   : > { %4021 = vrcp.f32 %v1844_v8  ;;  %v1846_v38 = vpop.xlane.xlu1 %1845 }
 0x871   : > { %4023 = vrcp.f32 %v1846_v38 }
 0x872   : > { %4025 = vrcp.f32 %v1848_v41 }
 0x873   : > { %v1850_v4 = vpop.xlane.xlu0 %1849 }
 0x874   : > { %3483 = vmatpush3.bf16.xpose.msra.mxu1 %v2100_v19  ;;  %4027 = vrcp.f32 %v1850_v4  ;;  %v1856_v47 = vpop.xlane.xlu1 %1855 }
 0x877   : > { %v1864_v17 = vpop.xlane.xlu0 %1863 }
 0x878   : > { %v1852_v21 = vpop.xlane.xlu1 %1851 }
 0x87a   : > { %v4022_v52 = vpop.eup %4021 }
 0x87b   : > { %v4024_v37 = vpop.eup %4023  ;;  %v1860_v49 = vpop.xlane.xlu0 %1859  ;;  %v1887_v53 = vmul.f32 %v4022_v52, %v5340_v43 }
 0x87c   : > { %v4026_v54 = vpop.eup %4025  ;;  %v1858_v40 = vpop.xlane.xlu1 %1857  ;;  %v1888_v60 = vmul.f32 %v4024_v37, %v5342_v0 }
 0x87d   : > { %4029 = vrcp.f32 %v1858_v40  ;;  %v1889_v31 = vmul.f32 %v4026_v54, %v5334_v3 }
 0x87e   : > { %v4028_v56 = vpop.eup %4027  ;;  %v1901_v1 = vpack.c.bf16 %v1888_v60, %v1887_v53  ;;  %4031 = vrcp.f32 %v1852_v21 }
 0x87f   : > { %v1866_v16 = vpop.xlane.xlu0 %1865  ;;  %v1890_v46 = vmul.f32 %v4028_v56, %v5347_v44  ;;  %4033 = vrcp.f32 %v1856_v47 }
 0x880   : > { %v1854_v63 = vpop.xlane.xlu1 %1853  ;;  %3460 = vmatprep.mubr.bf16.mxu1 %v1901_v1 }
 0x881   : > { %4035 = vrcp.f32 %v1854_v63  ;;  %v1902_v9 = vpack.c.bf16 %v1890_v46, %v1889_v31 }
 0x882   : > { %4037 = vrcp.f32 %v1860_v49 }
 0x883   : > { %3461 = vmatmul.mubr.bf16.gmra.mrb[52].mxu1 %v1902_v9  ;;  %v2057_v43 = vpop.permute.xlu0 %2056 }
 0x884   : > { %v2103_v10 = vsel %vm709_vm0, %v2057_v43, 0  ;;  %v1862_v0 = vpop.xlane.xlu1 %1861  ;;  %3614 = vmatprep.subr.msk.bf16.mxu1 %vm709_vm0, %v2057_v43 }
 0x885   : > { %4039 = vrcp.f32 %v1862_v0  ;;  %3485 = vmatpush3.bf16.xpose.msra.mxu1 %v2103_v10 }
 0x886   : > { %4041 = vrcp.f32 %v1866_v16 }
 0x887   : > { %v2029_v12 = vpop.permute.xlu0 %2028  ;;  %v4030_v3 = vpop.eup %4029  ;;  %4043 = vrcp.f32 %v1864_v17 }
 0x888   : > { %v2059_v44 = vpop.permute.xlu1 %2058  ;;  %v4032_v22 = vpop.eup %4031  ;;  %v1894_v62 = vmul.f32 %v4030_v3, %v5362_v2 }
 0x889   : > { %3615 = vmatprep.subr.msk.bf16.mxu1 %vm709_vm0, %v2059_v44  ;;  %v4034_v15 = vpop.eup %4033  ;;  %v2106_v29 = vsel %vm709_vm0, %v2059_v44, 0  ;;  %v1891_v25 = vmul.f32 %v4032_v22, %v5356_v39 }
 0x88a   : > { %v1893_v50 = vmul.f32 %v4034_v15, %v5349_v27 }
 0x88b   : > { %v4036_v23 = vpop.eup %4035  ;;  %v2033_v30 = vpop.permute.xlu0 %2032 }
 0x88c   : > { %v2031_v59 = vpop.permute.xlu1 %2030  ;;  %v1892_v42 = vmul.f32 %v4036_v23, %v5368_v61  ;;  %v4038_v28 = vpop.eup %4037  ;;  %v1904_v8 = vpack.c.bf16 %v1894_v62, %v1893_v50 }
 0x88d   : > { %3487 = vmatpush3.bf16.xpose.msra.mxu1 %v2106_v29  ;;  %v1895_v2 = vmul.f32 %v4038_v28, %v5360_v35 }
 0x88e   : > { %v1903_v24 = vpack.c.bf16 %v1892_v42, %v1891_v25 }
 0x88f   : > { %v4040_v41 = vpop.eup %4039  ;;  %v2037_v34 = vpop.permute.xlu0 %2036 }
 0x890   : > { %v4042_v38 = vpop.eup %4041  ;;  %v2035_v19 = vpop.permute.xlu1 %2034  ;;  %3464 = vmatprep.mubr.bf16.mxu1 %v1903_v24  ;;  %v1896_v4 = vmul.f32 %v4040_v41, %v5372_v5 }
 0x891   : > { %3465 = vmatmul.mubr.bf16.gmra.mrb[56].mxu1 %v1904_v8  ;;  %v4044_v47 = vpop.eup %4043  ;;  %v1898_v61 = vmul.f32 %v4042_v38, %v5366_v48 }
 0x892   : > { %v1905_v39 = vpack.c.bf16 %v1896_v4, %v1895_v2  ;;  %v1897_v27 = vmul.f32 %v4044_v47, %v5354_v11 }
 0x893   : > { %v2041_v17 = vpop.permute.xlu0 %2040 }
 0x894   : > { %v2039_v21 = vpop.permute.xlu1 %2038  ;;  %3468 = vmatprep.mubr.bf16.mxu1 %v1905_v39  ;;  %v1906_v37 = vpack.c.bf16 %v1898_v61, %v1897_v27 }
 0x897   : > { %v2358_v52 = vpop.permute.xlu0 %2357 }
 0x898   : > { %v2043_v49 = vpop.permute.xlu1 %2042  ;;  %3504 = vmatprep.subr.bf16.mxu0 %v2358_v52 }
 0x899   : > { %3469 = vmatmul.mubr.bf16.gmra.mrb[60].mxu1 %v1906_v37  ;;  %3505 = vmatpush3.bf16.msra.mxu0 %v2358_v52 }
 0x89a   : > { %3488 = vmatprep.mubr.msk.bf16.mxu1 %vm709_vm0, %v2029_v12 }
 0x89b   : > { %v2362_v5 = vpop.permute.xlu0 %2361 }
 0x89c   : > { %v2360_v35 = vpop.permute.xlu1 %2359 }
 0x89d   : > { %3506 = vmatprep.subr.bf16.mxu0 %v2360_v35 }
 0x89e   : > { %3507 = vmatpush3.bf16.msra.mxu0 %v2360_v35 }
 0x89f   : > { %3508 = vmatprep.subr.bf16.mxu0 %v2362_v5 }
 0x8a1   : > { %3489 = vmatmul.mubr.msk.bf16.vlgmr.msra.gmra.mrb[64].mxu1 %vm709_vm0, %v2031_v59 }
 0x8a2   : > { %3492 = vmatprep.mubr.msk.bf16.mxu1 %vm709_vm0, %v2033_v30  ;;  %3509 = vmatpush3.bf16.msra.mxu0 %v2362_v5 }
 0x8a9   : > { %3493 = vmatmul.mubr.msk.bf16.gmra.mrb[68].mxu1 %vm709_vm0, %v2035_v19 }
 0x8aa   : > { %3496 = vmatprep.mubr.msk.bf16.mxu1 %vm709_vm0, %v2037_v34 }
 0x8b1   : > { %3497 = vmatmul.mubr.msk.bf16.gmra.mrb[72].mxu1 %vm709_vm0, %v2039_v21 }
 0x8b2   : > { %3500 = vmatprep.mubr.msk.bf16.mxu1 %vm709_vm0, %v2041_v17 }
 0x8b9   : > { %3501 = vmatmul.mubr.msk.bf16.gmra.mrb[76].mxu1 %vm709_vm0, %v2043_v49 }
 0x91e   : > { %v5445_v11 = vpop.f32.mrb[48].mxu1 }
 0x91f   : > { %v5447_v48 = vpop.f32.mrb[49].mxu1 }
 0x920   : > { %v5449_v53 = vpop.f32.mrb[50].mxu1 }
 0x921   : > { %v3723_v54 = vpack.i.bf16 %v5449_v53, %v5445_v11  ;;  %v5453_v40 = vpop.f32.mrb[51].mxu1 }
 0x922   : > { %v3713_v60 = vpack.i.bf16 %v5453_v40, %v5447_v48 }
 0x956   : > { %v5457_v56 = vpop.f32.mrb[52].mxu1 }
 0x957   : > { %v5459_v1 = vpop.f32.mrb[53].mxu1 }
 0x958   : > { %v5461_v16 = vpop.f32.mrb[54].mxu1 }
 0x959   : > { %v3773_v31 = vpack.i.bf16 %v5461_v16, %v5457_v56  ;;  %v5465_v46 = vpop.f32.mrb[55].mxu1 }
 0x95a   : > { %v3753_v63 = vpack.i.bf16 %v5465_v46, %v5459_v1 }
 0x964   : > { %v5469_v9 = vpop.f32.mrb[56].mxu1 }
 0x965   : > { %v5471_v43 = vpop.f32.mrb[57].mxu1 }
 0x966   : > { %v5473_v10 = vpop.f32.mrb[58].mxu1 }
 0x967   : > { %v3728_v0 = vpack.i.bf16 %v5473_v10, %v5469_v9  ;;  %v5477_v12 = vpop.f32.mrb[59].mxu1 }
 0x968   : > { %v3718_v3 = vpack.i.bf16 %v5477_v12, %v5471_v43  ;;  %v6023_v12 = vld [vmem:[#allocation39_spill] sm:$0xff] }
 0x96c   : > { %v5481_v44 = vpop.f32.mrb[60].mxu1 }
 0x96d   : > { %v5483_v22 = vpop.f32.mrb[61].mxu1 }
 0x96e   : > { %v5485_v15 = vpop.f32.mrb[62].mxu1 }
 0x96f   : > { %v3788_v23 = vpack.i.bf16 %v5485_v15, %v5481_v44  ;;  %v5489_v30 = vpop.f32.mrb[63].mxu1 }
 0x970   : > { %v3758_v62 = vpack.i.bf16 %v5489_v30, %v5483_v22  ;;  %v6029_v22 = vld [vmem:[#allocation7_spill] sm:$0xff]  ;;  %v6030_v30 = vld [vmem:[#allocation18_spill] sm:$0xff] }
 0x974   : > { %v3490_v29 = vpop.f32.mrb[64].mxu1 }
 0x975   : > { %v2151_v59 = vadd.f32 %v5158_v26, %v3490_v29  ;;  %v2142_v25 = vpop.f32.mrb[65].mxu1 }
 0x976   : > { %v3491_v42 = vpop.f32.mrb[66].mxu1  ;;  %v2143_v24 = vadd.f32 %v5175_v57, %v2142_v25 }
 0x977   : > { %2209 = vmax.xlane.f32.xlu0 %v2151_v59  ;;  %v2145_v28 = vpop.f32.mrb[67].mxu1  ;;  %v2154_v34 = vadd.f32 %v5185_v18, %v3491_v42 }
 0x978   : > { %v2146_v50 = vadd.f32 %v5167_v13, %v2145_v28 }
 0x97a   : > { %2207 = vmax.xlane.f32.xlu1 %v2146_v50 }
 0x97b   : > { %2205 = vmax.xlane.f32.xlu0 %v2143_v24 }
 0x97c   : > { %v3494_v41 = vpop.f32.mrb[68].mxu1 }
 0x97d   : > { %v2158_v8 = vpop.f32.mrb[69].mxu1  ;;  %v2167_v2 = vadd.f32 %v5202_v14, %v3494_v41 }
 0x97e   : > { %v3495_v38 = vpop.f32.mrb[70].mxu1  ;;  %v2159_v4 = vadd.f32 %v5220_v58, %v2158_v8 }
 0x97f   : > { %v5498_v19 = vadd.f32 %v5193_v7, %v3495_v38  ;;  %2211 = vmax.xlane.f32.xlu0 %v2154_v34  ;;  %v2161_v26 = vpop.f32.mrb[71].mxu1 }
 0x980   : > { %v2162_v13 = vadd.f32 %v5211_v55, %v2161_v26 }
 0x981   : > { %2219 = vmax.xlane.f32.xlu1 %v5498_v19 }
 0x983   : > { %2217 = vmax.xlane.f32.xlu0 %v2167_v2 }
 0x984   : > { %v3498_v57 = vpop.f32.mrb[72].mxu1 }
 0x985   : > { %2215 = vmax.xlane.f32.xlu1 %v2162_v13  ;;  %v2174_v47 = vpop.f32.mrb[73].mxu1  ;;  %v2183_v17 = vadd.f32 %v5238_v33, %v3498_v57  ;;  %v6006_v33 = vld [vmem:[#allocation41_spill] sm:$0xff] }
 0x986   : > { %v3499_v18 = vpop.f32.mrb[74].mxu1  ;;  %v5513_v61 = vadd.f32 %v5256_v36, %v2174_v47  ;;  %v6005_v36 = vld [vmem:[#allocation6_spill] sm:$0xff] }
 0x987   : > { %v5505_v39 = vadd.f32 %v5229_v32, %v3499_v18  ;;  %2213 = vmax.xlane.f32.xlu0 %v2159_v4  ;;  %v2177_v7 = vpop.f32.mrb[75].mxu1 }
 0x988   : > { %v5510_v14 = vadd.f32 %v5247_v6, %v2177_v7 }
 0x989   : > { %2227 = vmax.xlane.f32.xlu1 %v5505_v39 }
 0x98b   : > { %2225 = vmax.xlane.f32.xlu0 %v2183_v17 }
 0x98c   : > { %v3502_v55 = vpop.f32.mrb[76].mxu1 }
 0x98d   : > { %2223 = vmax.xlane.f32.xlu1 %v5510_v14  ;;  %v2190_v58 = vpop.f32.mrb[77].mxu1  ;;  %v5518_v27 = vadd.f32 %v5266_v20, %v3502_v55  ;;  %v6007_v20 = vld [vmem:[#allocation42_spill] sm:$0xff] }
 0x98e   : > { %v3503_v21 = vpop.f32.mrb[78].mxu1  ;;  %v5522_v6 = vadd.f32 %v5275_v51, %v2190_v58  ;;  %v6008_v51 = vld [vmem:[#allocation8_spill] sm:$0xff] }
 0x98f   : > { %2221 = vmax.xlane.f32.xlu0 %v5513_v61  ;;  %v2193_v32 = vpop.f32.mrb[79].mxu1  ;;  %v5530_v52 = vadd.f32 %v6006_v33, %v3503_v21 }
 0x990   : > { %v5534_v37 = vadd.f32 %v6007_v20, %v2193_v32 }
 0x993   : > { %2233 = vmax.xlane.f32.xlu0 %v5518_v27 }
 0x997   : > { %2229 = vmax.xlane.f32.xlu0 %v5522_v6 }
 0x99e   : > { %2365 = vrot.lane.b32.xlu1 %v4493_v45, %s4224_s15 }
 0x9ad   : > { %2363 = vrot.lane.b32.xlu0 %v6005_v36, %s4224_s15 }
 0x9c2   : > { %2235 = vmax.xlane.f32.xlu1 %v5530_v52 }
 0x9c6   : > { %2231 = vmax.xlane.f32.xlu1 %v5534_v37 }
 0x9d7   : > { %2367 = vrot.lane.b32.xlu1 %v6008_v51, %s4224_s15 }
 0xa04   : > { %v2210_v49 = vpop.xlane.xlu0 %2209 }
 0xa05   : > { %v2239_v35 = vsub.f32 %v2151_v59, %v2210_v49 }
 0xa07   : > { %v2257_v5 = vmul.f32 1.442695, %v2239_v35  ;;  %v2208_v29 = vpop.xlane.xlu1 %2207 }
 0xa08   : > { %v2206_v45 = vpop.xlane.xlu0 %2205  ;;  %v2238_v28 = vsub.f32 %v2146_v50, %v2208_v29 }
 0xa09   : > { %4045 = vpow2.f32 %v2257_v5  ;;  %v2237_v25 = vsub.f32 %v2143_v24, %v2206_v45 }
 0xa0a   : > { %v2255_v57 = vmul.f32 1.442695, %v2238_v28 }
 0xa0b   : > { %v2253_v42 = vmul.f32 1.442695, %v2237_v25 }
 0xa0c   : > { %v2212_v41 = vpop.xlane.xlu0 %2211 }
 0xa0d   : > { %4047 = vpow2.f32 %v2253_v42  ;;  %v2240_v8 = vsub.f32 %v2154_v34, %v2212_v41 }
 0xa0e   : > { %v2220_v38 = vpop.xlane.xlu1 %2219 }
 0xa0f   : > { %v2259_v26 = vmul.f32 1.442695, %v2240_v8  ;;  %v2244_v50 = vsub.f32 %v5498_v19, %v2220_v38 }
 0xa10   : > { %v2218_v47 = vpop.xlane.xlu0 %2217 }
 0xa11   : > { %4049 = vpow2.f32 %v2259_v26  ;;  %v2243_v18 = vsub.f32 %v2167_v2, %v2218_v47  ;;  %v2267_v20 = vmul.f32 1.442695, %v2244_v50 }
 0xa12   : > { %v2216_v7 = vpop.xlane.xlu1 %2215  ;;  %4051 = vpow2.f32 %v2255_v57 }
 0xa13   : > { %v5539_v55 = vpop.eup %4045  ;;  %v2265_v59 = vmul.f32 1.442695, %v2243_v18  ;;  %v2242_v58 = vsub.f32 %v2162_v13, %v2216_v7 }
 0xa14   : > { %2289 = vadd.xlane.f32.xlu1 %v5539_v55  ;;  %v2214_v24 = vpop.xlane.xlu0 %2213 }
 0xa15   : > { %4053 = vpow2.f32 %v2265_v59  ;;  %v2263_v21 = vmul.f32 1.442695, %v2242_v58  ;;  %v2241_v34 = vsub.f32 %v2159_v4, %v2214_v24 }
 0xa16   : > { %v2228_v33 = vpop.xlane.xlu1 %2227 }
 0xa17   : > { %v5543_v32 = vpop.eup %4047  ;;  %v2261_v36 = vmul.f32 1.442695, %v2241_v34  ;;  %4055 = vpow2.f32 %v2263_v21  ;;  %v2248_v49 = vsub.f32 %v5505_v39, %v2228_v33  ;;  %v6009_v21 = vld [vmem:[#allocation10_spill] sm:$0xff]  ;;  %v6010_v34 = vld [vmem:[#allocation9_spill] sm:$0xff] }
 0xa18   : > { %2285 = vadd.xlane.f32.xlu1 %v5543_v32  ;;  %v2226_v2 = vpop.xlane.xlu0 %2225 }
 0xa19   : > { %4057 = vpow2.f32 %v2261_v36  ;;  %v2247_v13 = vsub.f32 %v2183_v17, %v2226_v2  ;;  %v2275_v42 = vmul.f32 1.442695, %v2248_v49  ;;  %v6011_v36 = vld [vmem:[#allocation20_spill] sm:$0xff] }
 0xa1a   : > { %4059 = vpow2.f32 %v2267_v20  ;;  %v2224_v4 = vpop.xlane.xlu1 %2223  ;;  %v6012_v33 = vpack.i.bf16 %v6010_v34, %v6011_v36  ;;  %v6013_v2 = vld [vmem:[#allocation12_spill] sm:$0xff]  ;;  %v6014_v20 = vld [vmem:[#allocation14_spill] sm:$0xff] }
 0xa1b   : > { %v5546_v51 = vpop.eup %4049  ;;  %v2273_v35 = vmul.f32 1.442695, %v2247_v13  ;;  %v2246_v17 = vsub.f32 %v5510_v14, %v2224_v4  ;;  %v6015_v13 = vld [vmem:[#allocation13_spill] sm:$0xff] }
 0xa1c   : > { %2291 = vadd.xlane.f32.xlu1 %v5546_v51  ;;  %v2222_v19 = vpop.xlane.xlu0 %2221  ;;  %v5551_v45 = vpop.eup %4051  ;;  %v6016_v49 = vpack.i.bf16 %v6014_v20, %v6015_v13  ;;  %v6018_v4 = vld [vmem:[#allocation5_spill] sm:$0xff] }
 0xa1d   : > { %v2245_v5 = vsub.f32 %v5513_v61, %v2222_v19  ;;  %4061 = vpow2.f32 %v2273_v35  ;;  %v2271_v38 = vmul.f32 1.442695, %v2246_v17  ;;  %v6017_v19 = vld [vmem:[#allocation21_spill] sm:$0xff] }
 0xa1e   : > { %v2366_v7 = vpop.permute.xlu1 %2365 }
 0xa1f   : > { %v5553_v29 = vpop.eup %4053  ;;  %v2269_v25 = vmul.f32 1.442695, %v2245_v5  ;;  %v6019_v5 = vpack.i.bf16 %v6017_v19, %v6018_v4 }
 0xa20   : > { %2287 = vadd.xlane.f32.xlu1 %v5551_v45  ;;  %2297 = vadd.xlane.f32.xlu0 %v5553_v29  ;;  %v2234_v39 = vpop.xlane.xlu0 %2233 }
 0xa21   : > { %4063 = vpow2.f32 %v2269_v25  ;;  %v2251_v28 = vsub.f32 %v5518_v27, %v2234_v39  ;;  %v5559_v41 = vpop.eup %4055 }
 0xa22   : > { %4065 = vpow2.f32 %v2275_v42 }
 0xa23   : > { %v5561_v61 = vpop.eup %4057  ;;  %v2281_v8 = vmul.f32 1.442695, %v2251_v28 }
 0xa24   : > { %2295 = vadd.xlane.f32.xlu1 %v5559_v41  ;;  %2293 = vadd.xlane.f32.xlu0 %v5561_v61  ;;  %v2230_v14 = vpop.xlane.xlu0 %2229  ;;  %v5566_v57 = vpop.eup %4059 }
 0xa25   : > { %4067 = vpow2.f32 %v2281_v8  ;;  %v2249_v26 = vsub.f32 %v5522_v6, %v2230_v14  ;;  %v6020_v8 = vld [vmem:[#allocation40_spill] sm:$0xff] }
 0xa26   : > { %4069 = vpow2.f32 %v2271_v38  ;;  %v6021_v38 = vld [vmem:[#allocation38_spill] sm:$0xff] }
 0xa27   : > { %v2277_v47 = vmul.f32 1.442695, %v2249_v26  ;;  %v5569_v18 = vpop.eup %4061  ;;  %v6022_v14 = vpack.i.bf16 %v6020_v8, %v6021_v38 }
 0xa28   : > { %2299 = vadd.xlane.f32.xlu0 %v5566_v57  ;;  %v2364_v27 = vpop.permute.xlu0 %2363 }
 0xa29   : > { %4071 = vpow2.f32 %v2277_v47  ;;  %3510 = vmatprep.subr.bf16.mxu0 %v2364_v27  ;;  %v6032_v47 = vld [vmem:[#allocation19_spill] sm:$0xff] }
 0xa2a   : > { %3511 = vmatpush3.bf16.msra.mxu0 %v2364_v27  ;;  %v6033_v27 = vld [vmem:[#allocation16_spill] sm:$0xff] }
 0xa2b   : > { %v5571_v59 = vpop.eup %4063  ;;  %3512 = vmatprep.subr.bf16.mxu0 %v2366_v7 }
 0xa2c   : > { %2305 = vadd.xlane.f32.xlu0 %v5569_v18  ;;  %2301 = vadd.xlane.f32.xlu1 %v5571_v59  ;;  %v5575_v6 = vpop.eup %4065 }
 0xa2e   : > { %3513 = vmatpush3.bf16.msra.mxu0 %v2366_v7  ;;  %v6034_v7 = vpack.i.bf16 %v6032_v47, %v6033_v27 }
 0xa2f   : > { %v5577_v58 = vpop.eup %4067 }
 0xa30   : > { %2307 = vadd.xlane.f32.xlu0 %v5575_v6  ;;  %2313 = vadd.xlane.f32.xlu1 %v5577_v58  ;;  %v5581_v24 = vpop.eup %4069 }
 0xa33   : > { %v5583_v50 = vpop.eup %4071 }
 0xa34   : > { %2303 = vadd.xlane.f32.xlu0 %v5581_v24  ;;  %2309 = vadd.xlane.f32.xlu1 %v5583_v50 }
 0xa45   : > { %2371 = vrot.lane.b32.xlu1 %v6009_v21, %s4224_s15 }
 0xa49   : > { %3699 = vrot.lane.b32.xlu1 %v6012_v33, %s4224_s15 }
 0xa4a   : > { %2369 = vrot.lane.b32.xlu0 %v6013_v2, %s4224_s15 }
 0xa4d   : > { %3704 = vrot.lane.b32.xlu1 %v6016_v49, %s4224_s15 }
 0xa4f   : > { %v2236_v35 = vpop.xlane.xlu1 %2235 }
 0xa50   : > { %v2252_v39 = vsub.f32 %v5530_v52, %v2236_v35  ;;  %v6027_v52 = vld [vmem:[#allocation15_spill] sm:$0xff] }
 0xa51   : > { %3709 = vrot.lane.b32.xlu1 %v6019_v5, %s4224_s15 }
 0xa52   : > { %v2283_v43 = vmul.f32 1.442695, %v2252_v39 }
 0xa53   : > { %v2232_v25 = vpop.xlane.xlu1 %2231 }
 0xa54   : > { %v2250_v42 = vsub.f32 %v5534_v37, %v2232_v25 }
 0xa55   : > { %3719 = vrot.lane.b32.xlu1 %v3718_v3, %s4223_s14  ;;  %v6024_v3 = vld [vmem:[#allocation11_spill] sm:$0xff] }
 0xa56   : > { %v2279_v28 = vmul.f32 1.442695, %v2250_v42  ;;  %v6025_v37 = vpack.i.bf16 %v6023_v12, %v6024_v3 }
 0xa57   : > { %v2368_v17 = vpop.permute.xlu1 %2367 }
 0xa58   : > { %3514 = vmatprep.subr.bf16.mxu0 %v2368_v17  ;;  %4073 = vpow2.f32 %v2279_v28 }
 0xa59   : > { %3729 = vrot.lane.b32.xlu1 %v3728_v0, %s4223_s14  ;;  %3515 = vmatpush3.bf16.msra.mxu0 %v2368_v17  ;;  %4075 = vpow2.f32 %v2283_v43  ;;  %v6026_v0 = vld [vmem:[#allocation17_spill] sm:$0xff] }
 0xa5a   : > { %v6028_v26 = vpack.i.bf16 %v6026_v0, %v6027_v52 }
 0xa5d   : > { %3739 = vrot.lane.b32.xlu1 %v6022_v14, %s4224_s15 }
 0xa61   : > { %3749 = vrot.lane.b32.xlu1 %v6025_v37, %s4224_s15 }
 0xa62   : > { %v5625_v9 = vpop.eup %4073 }
 0xa63   : > { %v5628_v10 = vpop.eup %4075 }
 0xa65   : > { %3759 = vrot.lane.b32.xlu1 %v3758_v62, %s4223_s14  ;;  %v6031_v62 = vpack.i.bf16 %v6029_v22, %v6030_v30 }
 0xa69   : > { %2311 = vadd.xlane.f32.xlu0 %v5625_v9 }
 0xa6d   : > { %2315 = vadd.xlane.f32.xlu0 %v5628_v10 }
 0xa83   : > { %3694 = vrot.lane.b32.xlu0 %v6028_v26, %s4224_s15 }
 0xa87   : > { %3714 = vrot.lane.b32.xlu0 %v3713_v60, %s4223_s14 }
 0xa8b   : > { %3724 = vrot.lane.b32.xlu0 %v3723_v54, %s4223_s14 }
 0xa8f   : > { %3734 = vrot.lane.b32.xlu0 %v6031_v62, %s4224_s15 }
 0xa93   : > { %3744 = vrot.lane.b32.xlu0 %v6034_v7, %s4224_s15 }
 0xa97   : > { %3754 = vrot.lane.b32.xlu0 %v3753_v63, %s4223_s14 }
 0xaa1   : > { %v2290_v48 = vpop.xlane.xlu1 %2289 }
 0xaa5   : > { %v2286_v40 = vpop.xlane.xlu1 %2285 }
 0xaa6   : > { %4077 = vrcp.f32 %v2286_v40 }
 0xaa9   : > { %v2292_v60 = vpop.xlane.xlu1 %2291 }
 0xaad   : > { %v2288_v11 = vpop.xlane.xlu1 %2287  ;;  %v2298_v53 = vpop.xlane.xlu0 %2297 }
 0xaae   : > { %4079 = vrcp.f32 %v2288_v11 }
 0xaaf   : > { %4081 = vrcp.f32 %v2292_v60 }
 0xab0   : > { %v4078_v36 = vpop.eup %4077 }
 0xab1   : > { %v2294_v54 = vpop.xlane.xlu0 %2293  ;;  %v2296_v21 = vpop.xlane.xlu1 %2295  ;;  %v2333_v13 = vmul.f32 %v4078_v36, %v5543_v32 }
 0xab2   : > { %4083 = vrcp.f32 %v2296_v21  ;;  %v3851_v21 = vld [vmem:[%s5896_s2 + $0x30] sm:$0xff]  }
 0xab3   : > { %4085 = vrcp.f32 %v2294_v54  ;;  %v3850_v54 = vld [vmem:[%s5896_s2 + $0x28] sm:$0xff]  }
 0xab4   : > { %4087 = vrcp.f32 %v2290_v48 }
 0xab5   : > { %v2300_v34 = vpop.xlane.xlu0 %2299 }
 0xab6   : > { %4089 = vrcp.f32 %v2300_v34  ;;  %v3852_v34 = vld [vmem:[%s5896_s2 + $0x38] sm:$0xff]  }
 0xab8   : > { %v4080_v33 = vpop.eup %4079 }
 0xab9   : > { %v2302_v2 = vpop.xlane.xlu1 %2301  ;;  %v2306_v20 = vpop.xlane.xlu0 %2305  ;;  %v2334_v49 = vmul.f32 %v4080_v33, %v5551_v45 }
 0xaba   : > { %v4082_v4 = vpop.eup %4081 }
 0xabb   : > { %v2349_v1 = vpack.c.bf16 %v2334_v49, %v2333_v13  ;;  %v2336_v17 = vmul.f32 %v4082_v4, %v5546_v51 }
 0xabc   : > { %v4084_v5 = vpop.eup %4083 }
 0xabd   : > { %3520 = vmatprep.mubr.bf16.mxu0 %v2349_v1  ;;  %v2314_v46 = vpop.xlane.xlu1 %2313  ;;  %v2308_v63 = vpop.xlane.xlu0 %2307  ;;  %v2338_v28 = vmul.f32 %v4084_v5, %v5559_v41 }
 0xabe   : > { %v4086_v42 = vpop.eup %4085 }
 0xabf   : > { %v4088_v32 = vpop.eup %4087  ;;  %v2337_v39 = vmul.f32 %v4086_v42, %v5561_v61 }
 0xac0   : > { %v2335_v8 = vmul.f32 %v4088_v32, %v5539_v55  ;;  %v4090_v14 = vpop.eup %4089 }
 0xac1   : > { %v2310_v35 = vpop.xlane.xlu1 %2309  ;;  %v2304_v19 = vpop.xlane.xlu0 %2303  ;;  %v2351_v43 = vpack.c.bf16 %v2338_v28, %v2337_v39  ;;  %v2340_v51 = vmul.f32 %v4090_v14, %v5566_v57 }
 0xac2   : > { %4091 = vrcp.f32 %v2304_v19  ;;  %v2350_v38 = vpack.c.bf16 %v2336_v17, %v2335_v8 }
 0xac3   : > { %4093 = vrcp.f32 %v2298_v53  ;;  %v3845_v53 = vld [vmem:[%s5896_s2] sm:$0xff]  }
 0xac4   : > { %4095 = vrcp.f32 %v2302_v2  ;;  %3568 = vmatprep.subr.bf16.mxu1 %v3845_v53 }
 0xac5   : > { %v2370_v25 = vpop.permute.xlu0 %2369  ;;  %v2372_v45 = vpop.permute.xlu1 %2371  ;;  %4097 = vrcp.f32 %v2308_v63  ;;  %3576 = vmatpush3.bf16.msra.mxu1 %v3845_v53 }
 0xac6   : > { %3516 = vmatprep.subr.bf16.mxu0 %v2370_v25  ;;  %4099 = vrcp.f32 %v2306_v20 }
 0xac7   : > { %3517 = vmatpush3.bf16.msra.mxu0 %v2370_v25  ;;  %4101 = vrcp.f32 %v2310_v35 }
 0xac8   : > { %3518 = vmatprep.subr.bf16.mxu0 %v2372_v45 }
 0xac9   : > { %v5711_v14 = vpop.permute.xlu1 %3699 }
 0xacb   : > { %3519 = vmatpush3.bf16.msra.mxu0 %v2372_v45 }
 0xacc   : > { %v4092_v12 = vpop.eup %4091  ;;  %3536 = vmatprep.subr.bf16.mxu0 %v3845_v53 }
 0xacd   : > { %v4094_v3 = vpop.eup %4093  ;;  %v2342_v0 = vmul.f32 %v4092_v12, %v5581_v24  ;;  %v3705_v12 = vpop.permute.xlu1 %3704 }
 0xace   : > { %3521 = vmatmul.mubr.bf16.vlgmr.msra.gmra.mrb[80].mxu0 %v2350_v38  ;;  %v4096_v37 = vpop.eup %4095  ;;  %v2339_v61 = vmul.f32 %v4094_v3, %v5553_v29 }
 0xacf   : > { %3524 = vmatprep.mubr.bf16.mxu0 %v2351_v43  ;;  %v2341_v41 = vmul.f32 %v4096_v37, %v5571_v59  ;;  %v4098_v52 = vpop.eup %4097  ;;  %3537 = vmatpush3.bf16.msra.mxu0 %v3845_v53 }
 0xad0   : > { %v2352_v55 = vpack.c.bf16 %v2340_v51, %v2339_v61  ;;  %v4100_v22 = vpop.eup %4099  ;;  %v2344_v30 = vmul.f32 %v4098_v52, %v5575_v6  ;;  %v3706_v61 = vunpack.i.l.bf16 %v3705_v12 }
 0xad1   : > { %v2353_v26 = vpack.c.bf16 %v2342_v0, %v2341_v41  ;;  %v2343_v62 = vmul.f32 %v4100_v22, %v5569_v18  ;;  %v4102_v29 = vpop.eup %4101  ;;  %v5713_v37 = vpop.permute.xlu1 %3709  ;;  %v3707_v0 = vunpack.i.h.bf16 %v3705_v12 }
 0xad2   : > { %v2345_v27 = vmul.f32 %v4102_v29, %v5583_v50  ;;  %v3846_v50 = vld [vmem:[%s5896_s2 + $0x8] sm:$0xff]  }
 0xad3   : > { %v2354_v47 = vpack.c.bf16 %v2344_v30, %v2343_v62  ;;  %3538 = vmatprep.subr.bf16.mxu0 %v3846_v50  ;;  %3569 = vmatprep.subr.bf16.mxu1 %v3846_v50  ;;  %v6036_v30 = vld [vmem:[#allocation22_spill] sm:$0xff] }
 0xad4   : > { %3539 = vmatpush3.bf16.msra.mxu0 %v3846_v50  ;;  %3577 = vmatpush3.bf16.msra.mxu1 %v3846_v50  ;;  %v2672_v62 = vsel %vm709_vm0, %v6036_v30, %v3706_v61  ;;  %v6037_v50 = vld [vmem:[#allocation25_spill] sm:$0xff]  ;;  %v6044_v30 = vld [vmem:[#allocation26_spill] sm:$0xff] }
 0xad5   : > { %v5715_v15 = vpop.permute.xlu1 %3719 }
 0xad6   : > { %3525 = vmatmul.mubr.bf16.gmra.mrb[84].mxu0 %v2352_v55 }
 0xad7   : > { %3528 = vmatprep.mubr.bf16.mxu0 %v2353_v26  ;;  %v6035_v26 = vld [vmem:[#allocation24_spill] sm:$0xff] }
 0xad8   : > { %v2673_v22 = vsel %vm709_vm0, %v6035_v26, %v3707_v0  ;;  %v6042_v0 = vld [vmem:[#allocation30_spill] sm:$0xff]  ;;  %v6043_v26 = vld [vmem:[#allocation28_spill] sm:$0xff] }
 0xad9   : > { %v5719_v51 = vpop.permute.xlu1 %3729 }
 0xade   : > { %3529 = vmatmul.mubr.bf16.gmra.mrb[88].mxu0 %v2354_v47  ;;  %v5725_v47 = vpop.permute.xlu1 %3739 }
 0xaf6   : > { %v2312_v57 = vpop.xlane.xlu0 %2311 }
 0xaf7   : > { %4103 = vrcp.f32 %v2312_v57 }
 0xaf8   : > { %4105 = vrcp.f32 %v2314_v46 }
 0xafa   : > { %v2316_v24 = vpop.xlane.xlu0 %2315 }
 0xafb   : > { %4107 = vrcp.f32 %v2316_v24 }
 0xafe   : > { %v3695_v38 = vpop.permute.xlu0 %3694 }
 0xaff   : > { %v3697_v24 = vunpack.i.h.bf16 %v3695_v38  ;;  %v3696_v29 = vunpack.i.l.bf16 %v3695_v38  ;;  %v6041_v38 = vld [vmem:[#allocation27_spill] sm:$0xff] }
 0xb01   : > { %v4104_v59 = vpop.eup %4103 }
 0xb02   : > { %v2346_v7 = vmul.f32 %v4104_v59, %v5625_v9  ;;  %v4106_v48 = vpop.eup %4105  ;;  %v3848_v9 = vld [vmem:[%s5896_s2 + $0x18] sm:$0xff]   ;;  %v3715_v43 = vpop.permute.xlu0 %3714 }
 0xb03   : > { %v2347_v18 = vmul.f32 %v4106_v48, %v5577_v58  ;;  %v3847_v58 = vld [vmem:[%s5896_s2 + $0x10] sm:$0xff]   ;;  %v3716_v48 = vunpack.i.l.bf16 %v3715_v43 }
 0xb04   : > { %v2355_v40 = vpack.c.bf16 %v2346_v7, %v2345_v27  ;;  %3540 = vmatprep.subr.bf16.mxu0 %v3847_v58  ;;  %3570 = vmatprep.subr.bf16.mxu1 %v3847_v58  ;;  %v3717_v7 = vunpack.i.h.bf16 %v3715_v43 }
 0xb05   : > { %v4108_v60 = vpop.eup %4107  ;;  %3541 = vmatpush3.bf16.msra.mxu0 %v3847_v58  ;;  %3578 = vmatpush3.bf16.msra.mxu1 %v3847_v58  ;;  %v2671_v58 = vsel %vm709_vm0, %v6037_v50, %v3697_v24 }
 0xb06   : > { %3532 = vmatprep.mubr.bf16.mxu0 %v2355_v40  ;;  %v2348_v6 = vmul.f32 %v4108_v60, %v5628_v10  ;;  %3542 = vmatprep.subr.bf16.mxu0 %v3848_v9  ;;  %v3849_v10 = vld [vmem:[%s5896_s2 + $0x20] sm:$0xff]   ;;  %v3725_v3 = vpop.permute.xlu0 %3724 }
 0xb07   : > { %3571 = vmatprep.subr.bf16.mxu1 %v3848_v9  ;;  %v3727_v55 = vunpack.i.h.bf16 %v3725_v3  ;;  %v3726_v52 = vunpack.i.l.bf16 %v3725_v3 }
 0xb08   : > { %v2356_v11 = vpack.c.bf16 %v2348_v6, %v2347_v18 }
 0xb09   : > { %3543 = vmatpush3.bf16.msra.mxu0 %v3848_v9  ;;  %3579 = vmatpush3.bf16.msra.mxu1 %v3848_v9  ;;  %v2690_v40 = vsel %vm2686_vm1, %v2673_v22, %v3727_v55  ;;  %v2689_v60 = vsel %vm2686_vm1, %v2672_v62, %v3726_v52  ;;  %v6038_v9 = vld [vmem:[#allocation23_spill] sm:$0xff]  ;;  %v3721_v52 = vunpack.i.l.bf16 %v5715_v15 }
 0xb0a   : > { %3533 = vmatmul.mubr.bf16.gmra.mrb[92].mxu0 %v2356_v11  ;;  %3544 = vmatprep.subr.bf16.mxu0 %v3849_v10  ;;  %v3735_v44 = vpop.permute.xlu0 %3734 }
 0xb0b   : > { %3572 = vmatprep.subr.bf16.mxu1 %v3849_v10 }
 0xb0d   : > { %3545 = vmatpush3.bf16.msra.mxu0 %v3849_v10  ;;  %3580 = vmatpush3.bf16.msra.mxu1 %v3849_v10  ;;  %v2670_v10 = vsel %vm709_vm0, %v6038_v9, %v3696_v29 }
 0xb0e   : > { %3546 = vmatprep.subr.bf16.mxu0 %v3850_v54  ;;  %3573 = vmatprep.subr.bf16.mxu1 %v3850_v54 }
 0xb11   : > { %3547 = vmatpush3.bf16.msra.mxu0 %v3850_v54  ;;  %3581 = vmatpush3.bf16.msra.mxu1 %v3850_v54 }
 0xb12   : > { %3548 = vmatprep.subr.bf16.mxu0 %v3851_v21  ;;  %3574 = vmatprep.subr.bf16.mxu1 %v3851_v21 }
 0xb15   : > { %3549 = vmatpush3.bf16.msra.mxu0 %v3851_v21  ;;  %3582 = vmatpush3.bf16.msra.mxu1 %v3851_v21 }
 0xb16   : > { %3550 = vmatprep.subr.bf16.mxu0 %v3852_v34  ;;  %3575 = vmatprep.subr.bf16.mxu1 %v3852_v34 }
 0xb19   : > { %3551 = vmatpush3.bf16.msra.mxu0 %v3852_v34  ;;  %3583 = vmatpush3.bf16.msra.mxu1 %v3852_v34  ;;  %v5735_v34 = vpop.permute.xlu1 %3749 }
 0xba1   : > { %v3522_v36 = vpop.f32.mrb[80].mxu0 }
 0xba2   : > { %v2415_v33 = vpop.f32.mrb[81].mxu0 }
 0xba3   : > { %v3523_v2 = vpop.f32.mrb[82].mxu0 }
 0xba4   : > { %v3763_v20 = vpack.i.bf16 %v3523_v2, %v3522_v36  ;;  %v2418_v13 = vpop.f32.mrb[83].mxu0  ;;  %v2687_v36 = vsel %vm2686_vm1, %v2670_v10, %v3716_v48  ;;  %v3712_v2 = vunpack.i.h.bf16 %v5713_v37 }
 0xba5   : > { %v3768_v49 = vpack.i.bf16 %v2418_v13, %v2415_v33  ;;  %v2688_v33 = vsel %vm2686_vm1, %v2671_v58, %v3717_v7 }
 0xba6   : > { %3764 = vrot.lane.b32.xlu0 %v3763_v20, %s4222_s6 }
 0xba9   : > { %v3526_v1 = vpop.f32.mrb[84].mxu0 }
 0xbaa   : > { %3769 = vrot.lane.b32.xlu0 %v3768_v49, %s4222_s6  ;;  %v2431_v46 = vpop.f32.mrb[85].mxu0 }
 0xbab   : > { %v3527_v63 = vpop.f32.mrb[86].mxu0 }
 0xbac   : > { %v3803_v35 = vpack.i.bf16 %v3527_v63, %v3526_v1  ;;  %v2434_v19 = vpop.f32.mrb[87].mxu0  ;;  %v3736_v63 = vunpack.i.l.bf16 %v3735_v44 }
 0xbad   : > { %v3793_v4 = vpack.i.bf16 %v2434_v19, %v2431_v46  ;;  %v3737_v46 = vunpack.i.h.bf16 %v3735_v44 }
 0xbae   : > { %3774 = vrot.lane.b32.xlu0 %v3773_v31, %s4223_s14 }
 0xbb1   : > { %v3530_v5 = vpop.f32.mrb[88].mxu0 }
 0xbb2   : > { %3794 = vrot.lane.b32.xlu0 %v3793_v4, %s4222_s6  ;;  %v2447_v25 = vpop.f32.mrb[89].mxu0  ;;  %v3702_v4 = vunpack.i.h.bf16 %v5711_v14 }
 0xbb3   : > { %v3531_v42 = vpop.f32.mrb[90].mxu0 }
 0xbb4   : > { %v3778_v32 = vpack.i.bf16 %v3531_v42, %v3530_v5  ;;  %v2450_v45 = vpop.f32.mrb[91].mxu0  ;;  %v3701_v5 = vunpack.i.l.bf16 %v5711_v14  ;;  %v2674_v14 = vsel %vm709_vm0, %v6041_v38, %v3736_v63 }
 0xbb5   : > { %v3783_v17 = vpack.i.bf16 %v2450_v45, %v2447_v25  ;;  %v6039_v25 = vld [vmem:[#allocation32_spill] sm:$0xff]  ;;  %v3732_v45 = vunpack.i.h.bf16 %v5719_v51 }
 0xbb6   : > { %3804 = vrot.lane.b32.xlu0 %v3803_v35, %s4222_s6  ;;  %3779 = vrot.lane.b32.xlu1 %v3778_v32, %s4222_s6  ;;  %v2681_v42 = vsel %vm709_vm0, %v6039_v25, %v3712_v2  ;;  %v3711_v32 = vunpack.i.l.bf16 %v5713_v37 }
 0xbb8   : > { %v2680_v61 = vsel %vm709_vm0, %v6042_v0, %v3711_v32 }
 0xbba   : > { %3784 = vrot.lane.b32.xlu1 %v3783_v17, %s4222_s6  ;;  %v3731_v17 = vunpack.i.l.bf16 %v5719_v51 }
 0xbbe   : > { %3789 = vrot.lane.b32.xlu1 %v3788_v23, %s4223_s14  ;;  %v5717_v23 = vpop.permute.xlu0 %3744 }
 0xbc2   : > { %v3755_v41 = vpop.permute.xlu0 %3754 }
 0xbc3   : > { %v3757_v35 = vunpack.i.h.bf16 %v3755_v41  ;;  %v3756_v19 = vunpack.i.l.bf16 %v3755_v41 }
 0xbc5   : > { %v2691_v3 = vsel %vm2686_vm1, %v2674_v14, %v3756_v19  ;;  %v3741_v19 = vunpack.i.l.bf16 %v5725_v47 }
 0xbdd   : > { %v3534_v56 = vpop.f32.mrb[92].mxu0 }
 0xbde   : > { %v2463_v16 = vpop.f32.mrb[93].mxu0 }
 0xbdf   : > { %v3535_v31 = vpop.f32.mrb[94].mxu0 }
 0xbe0   : > { %v3808_v39 = vpack.i.bf16 %v3535_v31, %v3534_v56  ;;  %v2466_v28 = vpop.f32.mrb[95].mxu0  ;;  %v5749_v56 = vpop.permute.xlu1 %3759  ;;  %v3746_v31 = vunpack.i.l.bf16 %v5717_v23 }
 0xbe1   : > { %v3798_v8 = vpack.i.bf16 %v2466_v28, %v2463_v16  ;;  %v3747_v16 = vunpack.i.h.bf16 %v5717_v23  ;;  %v6040_v28 = vld [vmem:[#allocation29_spill] sm:$0xff]  ;;  %v3722_v23 = vunpack.i.h.bf16 %v5715_v15  ;;  %v3761_v25 = vunpack.i.l.bf16 %v5749_v56 }
 0xbe2   : > { %v2676_v62 = vsel %vm709_vm0, %v6044_v30, %v3746_v31  ;;  %v3752_v31 = vunpack.i.h.bf16 %v5735_v34  ;;  %v3072_v30 = vld [vmem:[%s5897_s3] ss:$0 sm:$0xff] }
 0xbe3   : > { %3799 = vrot.lane.b32.xlu1 %v3798_v8, %s4222_s6  ;;  %v2675_v8 = vsel %vm709_vm0, %v6040_v28, %v3737_v46  ;;  %v2677_v22 = vsel %vm709_vm0, %v6043_v26, %v3747_v16 }
 0xbe4   : > { %v2692_v37 = vsel %vm2686_vm1, %v2675_v8, %v3757_v35  ;;  %v3742_v35 = vunpack.i.h.bf16 %v5725_v47 }
 0xbe7   : > { %3809 = vrot.lane.b32.xlu1 %v3808_v39, %s4222_s6  ;;  %s242_s6 = sand.u32 1, %s4195_s19  }
 0xbe8   : > { %s3012_s14 = sshll.u32 %s242_s6, 7  ;;  %s5842_s29 = scalar_lea.sflag [#allocation3], %s242_s6 }
 0xbe9   : > { %s5813_s12 = scalar_lea.vmem [#allocation2], %s3012_s14  ;;  %s4131_s14 = scalar_lea.vmem %s4130_s11, 4096 }
 0xbea   : > { %s2928_s16 = sshll.u32 %s5813_s12, 4  ;;  %s5836_s16 = int_to_ptr.vmem [resolvable:$true] %s2928_s16 }
 0xbeb   : > { %s4125_s30 = scalar_lea.vmem %s5836_s16, 2048  ;;  %p4132_p2 = scmp.lt.s32.totalorder %s5836_s16, %s4130_s11 }
 0xbec   : > { %p4126_p13 = scmp.ne.s32.totalorder %s5836_s16, %s4125_s30  ;;  %p4133_p3 = scmp.lt.s32.totalorder %s4131_s14, %s4125_s30 }
 0xbee   : > { %p4127_p0 = pnand %p4126_p13, %p4311_p5  ;;  %p4134_p4 = por %p4133_p3, %p4132_p2 }
 0xbf0   : > { %p4128_p1 = pneg %p4127_p0 }
 0xbf2   : > { %p4135_p6 = pnand %p4134_p4, %p4128_p1 }
 0xc18   : > { %v3765_v57 = vpop.permute.xlu0 %3764 }
 0xc19   : > { %v3767_v59 = vunpack.i.h.bf16 %v3765_v57  ;;  %v3766_v27 = vunpack.i.l.bf16 %v3765_v57 }
 0xc1b   : > { %v2706_v18 = vsel %vm2703_vm2, %v2689_v60, %v3766_v27  ;;  %v2707_v6 = vsel %vm2703_vm2, %v2690_v40, %v3767_v59  ;;  %v2697_v40 = vsel %vm2686_vm1, %v2680_v61, %v3731_v17  ;;  %v2698_v60 = vsel %vm2686_vm1, %v2681_v42, %v3732_v45  ;;  %v6047_v42 = vld [vmem:[#allocation37_spill] sm:$0xff]  ;;  %v6048_v45 = vld [vmem:[#allocation35_spill] sm:$0xff] }
 0xc1c   : > { %v2721_v11 = vpack.c.bf16 %v2707_v6, %v2706_v18  ;;  %v3770_v53 = vpop.permute.xlu0 %3769  ;;  %v2683_v32 = vsel %vm709_vm0, %v6047_v42, %v3742_v35  ;;  %v2682_v17 = vsel %vm709_vm0, %v6048_v45, %v3741_v19 }
 0xc1d   : > { %v3772_v54 = vunpack.i.h.bf16 %v3770_v53  ;;  %v3771_v21 = vunpack.i.l.bf16 %v3770_v53  ;;  %v2699_v47 = vsel %vm2686_vm1, %v2682_v17, %v3761_v25 }
 0xc1f   : > { %v2704_v20 = vsel %vm2703_vm2, %v2687_v36, %v3771_v21  ;;  %v2705_v13 = vsel %vm2703_vm2, %v2688_v33, %v3772_v54  ;;  %v6045_v54 = vld [vmem:[#allocation33_spill] sm:$0xff]  ;;  %v6046_v36 = vld [vmem:[#allocation31_spill] sm:$0xff] }
 0xc20   : > { %v3775_v49 = vpop.permute.xlu0 %3774  ;;  %v2720_v1 = vpack.c.bf16 %v2705_v13, %v2704_v20  ;;  %v2679_v21 = vsel %vm709_vm0, %v6045_v54, %v3702_v4  ;;  %v2678_v33 = vsel %vm709_vm0, %v6046_v36, %v3701_v5  ;;  %v3762_v5 = vunpack.i.h.bf16 %v5749_v56 }
 0xc21   : > { %v3777_v44 = vunpack.i.h.bf16 %v3775_v49  ;;  %v3776_v51 = vunpack.i.l.bf16 %v3775_v49  ;;  %v2695_v13 = vsel %vm2686_vm1, %v2678_v33, %v3721_v52  ;;  %v2696_v49 = vsel %vm2686_vm1, %v2679_v21, %v3722_v23 }
 0xc22   : > { %3552 = vmatprep.mubr.bf16.mxu0 %v2720_v1  ;;  %v2700_v38 = vsel %vm2686_vm1, %v2683_v32, %v3762_v5 }
 0xc23   : > { %3553 = vmatmul.mubr.bf16.vlgmr.msra.gmra.mrb[96].mxu0 %v2721_v11  ;;  %v2693_v18 = vsel %vm2686_vm1, %v2676_v62, %v3776_v51  ;;  %v2694_v15 = vsel %vm2686_vm1, %v2677_v22, %v3777_v44  ;;  %v6049_v44 = vld [vmem:[#allocation36_spill] sm:$0xff] }
 0xc24   : > { %v3795_v39 = vpop.permute.xlu0 %3794  ;;  %v2685_v51 = vsel %vm709_vm0, %v6049_v44, %v3752_v31 }
 0xc25   : > { %v3797_v43 = vunpack.i.h.bf16 %v3795_v39  ;;  %v3796_v12 = vunpack.i.l.bf16 %v3795_v39  ;;  %v3751_v39 = vunpack.i.l.bf16 %v5735_v34  ;;  %v6050_v34 = vld [vmem:[#allocation34_spill] sm:$0xff] }
 0xc27   : > { %v2708_v41 = vsel %vm2703_vm2, %v2691_v3, %v3796_v12  ;;  %v2709_v55 = vsel %vm2703_vm2, %v2692_v37, %v3797_v43  ;;  %v2684_v0 = vsel %vm709_vm0, %v6050_v34, %v3751_v39 }
 0xc28   : > { %v3780_v57 = vpop.permute.xlu1 %3779  ;;  %v3805_v24 = vpop.permute.xlu0 %3804  ;;  %v2722_v29 = vpack.c.bf16 %v2709_v55, %v2708_v41 }
 0xc29   : > { %v3782_v59 = vunpack.i.h.bf16 %v3780_v57  ;;  %v3781_v27 = vunpack.i.l.bf16 %v3780_v57  ;;  %v3807_v7 = vunpack.i.h.bf16 %v3805_v24  ;;  %v3806_v48 = vunpack.i.l.bf16 %v3805_v24 }
 0xc2a   : > { %3556 = vmatprep.mubr.bf16.mxu0 %v2722_v29 }
 0xc2b   : > { %v2715_v6 = vsel %vm2703_vm2, %v2698_v60, %v3782_v59  ;;  %v2714_v11 = vsel %vm2703_vm2, %v2697_v40, %v3781_v27  ;;  %v2710_v53 = vsel %vm2703_vm2, %v2693_v18, %v3806_v48  ;;  %v2711_v50 = vsel %vm2703_vm2, %v2694_v15, %v3807_v7 }
 0xc2c   : > { %v2725_v58 = vpack.c.bf16 %v2715_v6, %v2714_v11  ;;  %v3785_v9 = vpop.permute.xlu1 %3784  ;;  %v2723_v10 = vpack.c.bf16 %v2711_v50, %v2710_v53 }
 0xc2d   : > { %v3787_v2 = vunpack.i.h.bf16 %v3785_v9  ;;  %v3786_v20 = vunpack.i.l.bf16 %v3785_v9 }
 0xc2e   : > { %3557 = vmatmul.mubr.bf16.gmra.mrb[100].mxu0 %v2723_v10 }
 0xc2f   : > { %v2712_v1 = vsel %vm2703_vm2, %v2695_v13, %v3786_v20  ;;  %v2713_v46 = vsel %vm2703_vm2, %v2696_v49, %v3787_v2 }
 0xc30   : > { %v2724_v63 = vpack.c.bf16 %v2713_v46, %v2712_v1  ;;  %v3790_v4 = vpop.permute.xlu1 %3789 }
 0xc31   : > { %v3792_v14 = vunpack.i.h.bf16 %v3790_v4  ;;  %v3791_v43 = vunpack.i.l.bf16 %v3790_v4 }
 0xc32   : > { %3560 = vmatprep.mubr.bf16.mxu1 %v2724_v63 }
 0xc33   : > { %3561 = vmatmul.mubr.bf16.vlgmr.msra.gmra.mrb[80].mxu1 %v2725_v58  ;;  %v2702_v41 = vsel %vm2686_vm1, %v2685_v51, %v3792_v14  ;;  %v2701_v55 = vsel %vm2686_vm1, %v2684_v0, %v3791_v43 }
 0xc55   : > { %v3800_v16 = vpop.permute.xlu1 %3799 }
 0xc56   : > { %v3802_v28 = vunpack.i.h.bf16 %v3800_v16  ;;  %v3801_v8 = vunpack.i.l.bf16 %v3800_v16 }
 0xc58   : > { %v2716_v56 = vsel %vm2703_vm2, %v2699_v47, %v3801_v8  ;;  %v2717_v12 = vsel %vm2703_vm2, %v2700_v38, %v3802_v28 }
 0xc59   : > { %v3810_v3 = vpop.permute.xlu1 %3809  ;;  %v2726_v37 = vpack.c.bf16 %v2717_v12, %v2716_v56 }
 0xc5a   : > { %v3812_v61 = vunpack.i.h.bf16 %v3810_v3  ;;  %v3811_v23 = vunpack.i.l.bf16 %v3810_v3 }
 0xc5b   : > { %3564 = vmatprep.mubr.bf16.mxu1 %v2726_v37 }
 0xc5c   : > { %v2718_v52 = vsel %vm2703_vm2, %v2701_v55, %v3811_v23  ;;  %v2719_v26 = vsel %vm2703_vm2, %v2702_v41, %v3812_v61 }
 0xc5d   : > { %v2727_v22 = vpack.c.bf16 %v2719_v26, %v2718_v52 }
 0xc5f   : > { %3565 = vmatmul.mubr.bf16.gmra.mrb[84].mxu1 %v2727_v22 }
 0xcf6   : > { %v3554_v62 = vpop.f32.mrb[96].mxu0 }
 0xcf7   : > { %v2842_v57 = vadd.f32 %v3554_v62, %v3072_v30  ;;  %v2833_v24 = vpop.f32.mrb[97].mxu0 }
 0xcf8   : > { %v2834_v29 = vadd.f32 %v3072_v30, %v2833_v24  ;;  %v3555_v59 = vpop.f32.mrb[98].mxu0 }
 0xcf9   : > { %2898 = vst [vmem:[%s5813_s12 + $0x10] sm:$0xff] %v2842_v57  ;;  %v2845_v27 = vadd.f32 %v3555_v59, %v3072_v30  ;;  %v2836_v7 = vpop.f32.mrb[99].mxu0 }
 0xcfa   : > { %2896 = vst [vmem:[%s5813_s12] sm:$0xff] %v2834_v29  ;;  %v2837_v48 = vadd.f32 %v3072_v30, %v2836_v7 }
 0xcfb   : > { %2899 = vst [vmem:[%s5813_s12 + $0x18] sm:$0xff] %v2845_v27 }
 0xcfc   : > { %2897 = vst [vmem:[%s5813_s12 + $0x8] sm:$0xff] %v2837_v48 }
 0xd01   : > { %v3558_v40 = vpop.f32.mrb[100].mxu0 }
 0xd02   : > { %v2858_v60 = vadd.f32 %v3558_v40, %v3072_v30  ;;  %v2849_v18 = vpop.f32.mrb[101].mxu0 }
 0xd03   : > { %v2850_v15 = vadd.f32 %v3072_v30, %v2849_v18  ;;  %v3559_v6 = vpop.f32.mrb[102].mxu0 }
 0xd04   : > { %2902 = vst [vmem:[%s5813_s12 + $0x30] sm:$0xff] %v2858_v60  ;;  %v2861_v11 = vadd.f32 %v3559_v6, %v3072_v30  ;;  %v2852_v53 = vpop.f32.mrb[103].mxu0 }
 0xd05   : > { %2900 = vst [vmem:[%s5813_s12 + $0x20] sm:$0xff] %v2850_v15  ;;  %v2853_v50 = vadd.f32 %v3072_v30, %v2852_v53 }
 0xd06   : > { %2903 = vst [vmem:[%s5813_s12 + $0x38] sm:$0xff] %v2861_v11  ;;  %v3562_v58 = vpop.f32.mrb[80].mxu1 }
 0xd07   : > { %2901 = vst [vmem:[%s5813_s12 + $0x28] sm:$0xff] %v2853_v50  ;;  %v2874_v9 = vadd.f32 %v3562_v58, %v3072_v30  ;;  %v2865_v10 = vpop.f32.mrb[81].mxu1 }
 0xd08   : > { %v2866_v54 = vadd.f32 %v3072_v30, %v2865_v10  ;;  %v3563_v21 = vpop.f32.mrb[82].mxu1 }
 0xd09   : > { %2906 = vst [vmem:[%s5813_s12 + $0x50] sm:$0xff] %v2874_v9  ;;  %v2877_v36 = vadd.f32 %v3563_v21, %v3072_v30  ;;  %v2868_v33 = vpop.f32.mrb[83].mxu1 }
 0xd0a   : > { %2904 = vst [vmem:[%s5813_s12 + $0x40] sm:$0xff] %v2866_v54  ;;  %v2869_v2 = vadd.f32 %v3072_v30, %v2868_v33 }
 0xd0b   : > { %2907 = vst [vmem:[%s5813_s12 + $0x58] sm:$0xff] %v2877_v36 }
 0xd0c   : > { %2905 = vst [vmem:[%s5813_s12 + $0x48] sm:$0xff] %v2869_v2 }
 0xd32   : > { %v3566_v20 = vpop.f32.mrb[84].mxu1 }
 0xd33   : > { %v2890_v13 = vadd.f32 %v3566_v20, %v3072_v30  ;;  %v2881_v49 = vpop.f32.mrb[85].mxu1 }
 0xd34   : > { %v2882_v1 = vadd.f32 %v3072_v30, %v2881_v49  ;;  %v3567_v46 = vpop.f32.mrb[86].mxu1 }
 0xd35   : > { %2910 = vst [vmem:[%s5813_s12 + $0x70] sm:$0xff] %v2890_v13  ;;  %v2893_v63 = vadd.f32 %v3567_v46, %v3072_v30  ;;  %v2884_v35 = vpop.f32.mrb[87].mxu1 }
 0xd36   : > { %2908 = vst [vmem:[%s5813_s12 + $0x60] sm:$0xff] %v2882_v1  ;;  %v2885_v19 = vadd.f32 %v3072_v30, %v2884_v35 }
 0xd37   : > { %2911 = vst [vmem:[%s5813_s12 + $0x78] sm:$0xff] %v2893_v63 }
 0xd38   : > { %2909 = vst [vmem:[%s5813_s12 + $0x68] sm:$0xff] %v2885_v19 }
 0xd39   : > { %4138 = shalt.err (!%p4135_p6)
}
 0xd3a   : > { %s4139_s6 = scalar_lea.hbm %s5832_s26, 2048  ;;  %s4143_s12 = scalar_lea.hbm %s5899_s5, 8192 }
 0xd3b   : > { %p4140_p8 = scmp.ne.s32.totalorder %s5832_s26, %s4139_s6  ;;  %p4144_p11 = scmp.lt.u32.totalorder %s5832_s26, %s5899_s5 }
 0xd3c   : > { %p4145_p12 = scmp.lt.u32.totalorder %s4143_s12, %s4139_s6  ;;  %p4147_p0 = scmp.lt.u32.totalorder %s4139_s6, %s5832_s26 }
 0xd3d   : > { %p4141_p9 = pnand %p4140_p8, %p4311_p5 }
 0xd3e   : > { %p4146_p13 = por %p4145_p12, %p4144_p11 }
 0xd3f   : > { %p4142_p10 = pneg %p4141_p9 }
 0xd40   : > { %p4148_p1 = por %p4147_p0, %p4146_p13 }
 0xd42   : > { %p4149_p2 = pnand %p4148_p1, %p4142_p10 }
 0xd44   : > { %4152 = shalt.err (!%p4149_p2)
}
 0xd45   : > { %s4226_s15 = smov 128   ;;  %s4227_s30 = smov 8  }
 0xd46   : > { %3616 = dma.vmem_to_hbm [thread:$0]  (%p4311_p5), %s5836_s16, 2048, %s5832_s26, %s5842_s29, %s4226_s15, %s4226_s15, %s4227_s30  }
 0xd47 PF: > { %p3622_p3 = scmp.ge.s32.totalorder %s4219_s25, 2  ;;  %s2943_s10 = sand.u32 1, %s4191_s18  }
 0xd48   : > { %s2944_s11 = scalar_lea.sflag [#allocation3], %s2943_s10 }
 0xd49   : > { %p3619_p4 = pnand %p3622_p3, %p4317_p7 }
 0xd4b   : > { %4186 = dma.done.wait (!%p3619_p4), %s2944_s11, 2048  }
 0xd4c   : > { %4188 = vsyncadd (!%p3619_p4), %s2944_s11, 4294965248  ;;  %s18_s25 = sadd.s32 1, %s4219_s25   ;;  %s6051_s18 = smov %s4195_s19 }
 0xd4d   : > { %p15_p6 = scmp.ge.s32.totalorder %s18_s25, 6   ;;  %s6052_s19 = smov %s4199_s20 }
 0xd4e   : > { %s6053_s20 = smov %s4327_s13  ;;  %s6054_s21 = smov %s4211_s23 }
 0xd4f   : > { %s6055_s22 = smov %s4215_s24  ;;  %s6056_s23 = smov %s6059_s27 }
 0xd50   : > { %s6057_s24 = smov %s6063_s28  ;;  %17 = sbr.rel (!%p15_p6) target bundleno = 5 (0x5), region = 75 }
 0xd57   :  { %2949 = vsyncpa [#allocation3], 1 }
 0xd58   :  { %2951 = vsyncpa [#allocation3 + $0x1], 1 }

</bundles_post_ra>
